<compile_context>
chip_gen: v5e
topology: v5e:2x2
jax: 0.10.0
libtpu: 0.0.40
codegen_flags: <defaults>
</compile_context>

<pallas_src>
import math
from functools import partial

import jax
import jax.numpy as jnp
from jax.experimental import pallas as pl
from jax.experimental.pallas import tpu as pltpu


# ----------------------------------------------------------------------------------------
# small helpers shared by kernels and the pure-JAX reference path (identical numerics)
# ----------------------------------------------------------------------------------------
def _silu(x):
    return x * (1.0 / (1.0 + jnp.exp(-x)))


def _softplus(x):
    # matches torch.nn.functional.softplus (threshold = 20)
    safe = jnp.minimum(x, 20.0)
    return jnp.where(x > 20.0, x, jnp.log(1.0 + jnp.exp(safe)))


# ----------------------------------------------------------------------------------------
# Kernel 1: (M, Cin) @ (Cin, Cout) + bias     (1x1 convolutions)
# ----------------------------------------------------------------------------------------
def _matmul_bias_kernel(x_ref, w_ref, b_ref, o_ref):
    acc = jnp.dot(x_ref[...], w_ref[...], preferred_element_type=jnp.float32)
    o_ref[...] = (acc + b_ref[...]).astype(o_ref.dtype)


def pallas_matmul_bias(x, w, b, *, tile_m=512):
    """y = x @ w + b   with x:(M,Cin) w:(Cin,Cout) b:(Cout,)."""
    M, Cin = x.shape
    Cout = w.shape[1]
    if M <= tile_m:
        tm, x_p = M, x
    else:
        tm = tile_m
        m_pad = pl.cdiv(M, tm) * tm
        x_p = jnp.pad(x, ((0, m_pad - M), (0, 0))) if m_pad != M else x
    grid_m = x_p.shape[0] // tm
    out = pl.pallas_call(
        _matmul_bias_kernel,
        out_shape=jax.ShapeDtypeStruct((x_p.shape[0], Cout), x.dtype),
        grid_spec=pltpu.PrefetchScalarGridSpec(
            num_scalar_prefetch=0,
            grid=(grid_m,),
            in_specs=[
                pl.BlockSpec((tm, Cin), lambda i: (i, 0)),
                pl.BlockSpec((Cin, Cout), lambda i: (0, 0)),
                pl.BlockSpec((1, Cout), lambda i: (0, 0)),
            ],
            out_specs=pl.BlockSpec((tm, Cout), lambda i: (i, 0)),
        ),
        compiler_params=pltpu.CompilerParams(dimension_semantics=("parallel",)),
    )(x_p, w, b.reshape(1, Cout))
    return out[:M]


# ----------------------------------------------------------------------------------------
# Kernel 2: depthwise 3x3 conv + bias + SiLU (one image per grid step, NHWC)
# ----------------------------------------------------------------------------------------
def _dwconv3x3_silu_kernel(x_ref, w_ref, b_ref, o_ref):
    # x_ref: (H+2, W+2, C) zero padded, w_ref: (9, C), b_ref: (1, C), o_ref: (H, W, C)
    H, W, C = o_ref.shape
    acc = jnp.zeros((H, W, C), dtype=jnp.float32)
    for ky in range(3):
        for kx in range(3):
            k0 = ky * 3 + kx
            tap = x_ref[ky:ky + H, kx:kx + W, :].astype(jnp.float32)
            acc = acc + tap * w_ref[k0:k0 + 1, :]
    acc = acc + b_ref[...]
    o_ref[...] = _silu(acc).astype(o_ref.dtype)


def pallas_dwconv3x3_silu(x_nhwc, w33, b):
    """Depthwise 3x3 conv (stride 1, 'same' zero padding) + bias + SiLU.  x:(B,H,W,C)."""
    B, H, W, C = x_nhwc.shape
    x_pad = jnp.pad(x_nhwc, ((0, 0), (1, 1), (1, 1), (0, 0)))
    return pl.pallas_call(
        _dwconv3x3_silu_kernel,
        out_shape=jax.ShapeDtypeStruct((B, H, W, C), x_nhwc.dtype),
        grid_spec=pltpu.PrefetchScalarGridSpec(
            num_scalar_prefetch=0,
            grid=(B,),
            in_specs=[
                pl.BlockSpec((None, H + 2, W + 2, C), lambda bi: (bi, 0, 0, 0)),
                pl.BlockSpec((9, C), lambda bi: (0, 0)),
                pl.BlockSpec((1, C), lambda bi: (0, 0)),
            ],
            out_specs=pl.BlockSpec((None, H, W, C), lambda bi: (bi, 0, 0, 0)),
        ),
        compiler_params=pltpu.CompilerParams(dimension_semantics=("parallel",)),
    )(x_pad, w33.reshape(9, C), b.reshape(1, C))


# ----------------------------------------------------------------------------------------
# Kernel 3: PyTorch 'WithBias' LayerNorm over the last dim, optionally fused with * SiLU(z)
# ----------------------------------------------------------------------------------------
def _ln_kernel(x_ref, w_ref, b_ref, o_ref):
    x = x_ref[...].astype(jnp.float32)
    mu = jnp.mean(x, axis=-1, keepdims=True)
    xc = x - mu
    var = jnp.mean(xc * xc, axis=-1, keepdims=True)
    y = xc * jax.lax.rsqrt(var + 1e-5) * w_ref[...] + b_ref[...]
    o_ref[...] = y.astype(o_ref.dtype)


def _ln_silu_gate_kernel(x_ref, z_ref, w_ref, b_ref, o_ref):
    x = x_ref[...].astype(jnp.float32)
    mu = jnp.mean(x, axis=-1, keepdims=True)
    xc = x - mu
    var = jnp.mean(xc * xc, axis=-1, keepdims=True)
    y = xc * jax.lax.rsqrt(var + 1e-5) * w_ref[...] + b_ref[...]
    o_ref[...] = (y * _silu(z_ref[...].astype(jnp.float32))).astype(o_ref.dtype)


def pallas_layernorm(x, w, b, z=None, *, tile_m=1024):
    """WithBias LayerNorm over the last dim; optionally fused with `* SiLU(z)` gating."""
    M, C = x.shape
    if M <= tile_m:
        tm, pad = M, 0
    else:
        tm = tile_m
        pad = pl.cdiv(M, tm) * tm - M
    xp = jnp.pad(x, ((0, pad), (0, 0))) if pad else x
    row_spec = pl.BlockSpec((tm, C), lambda i: (i, 0))
    vec_spec = pl.BlockSpec((1, C), lambda i: (0, 0))
    if z is None:
        kernel = _ln_kernel
        in_specs = [row_spec, vec_spec, vec_spec]
        operands = (xp, w.reshape(1, C), b.reshape(1, C))
    else:
        zp = jnp.pad(z, ((0, pad), (0, 0))) if pad else z
        kernel = _ln_silu_gate_kernel
        in_specs = [row_spec, row_spec, vec_spec, vec_spec]
        operands = (xp, zp, w.reshape(1, C), b.reshape(1, C))
    out = pl.pallas_call(
        kernel,
        out_shape=jax.ShapeDtypeStruct((xp.shape[0], C), x.dtype),
        grid_spec=pltpu.PrefetchScalarGridSpec(
            num_scalar_prefetch=0,
            grid=(xp.shape[0] // tm,),
            in_specs=in_specs,
            out_specs=row_spec,
        ),
        compiler_params=pltpu.CompilerParams(dimension_semantics=("parallel",)),
    )(*operands)
    return out[:M]


# ----------------------------------------------------------------------------------------
# Kernel 4: S6 selective scan (delta_softplus=True), one (batch, direction) per grid step
# ----------------------------------------------------------------------------------------
def _selective_scan_kernel(u_ref, dt_ref, A_ref, B_ref, C_ref, Dskip_ref, bias_ref,
                           o_ref, dt_scr, du_scr):
    """u_ref, dt_ref, o_ref : (L, D)  channels on lanes
       A_ref                : (N, D)  (= -exp(A_log), pre-transposed)
       B_ref, C_ref         : (L, N)
       Dskip_ref, bias_ref  : (1, D)
       dt_scr, du_scr       : (L, D)  VMEM scratch
    """
    L, Dch = u_ref.shape
    N = A_ref.shape[0]

    # vectorised pre-compute over the whole sequence
    u = u_ref[...].astype(jnp.float32)
    dt = _softplus(dt_ref[...].astype(jnp.float32) + bias_ref[...])
    dt_scr[...] = dt
    du_scr[...] = dt * u

    A = A_ref[...].astype(jnp.float32)                          # (N, D)
    # small identity: turns B's (1, N) row into an (N, 1) column with a
    # broadcast-multiply + lane reduction (no in-loop transpose / relayout).
    rows = jax.lax.broadcasted_iota(jnp.int32, (N, N), 0)
    cols = jax.lax.broadcasted_iota(jnp.int32, (N, N), 1)
    eye = (rows == cols).astype(jnp.float32)

    def step(l, h):
        dt_l = dt_scr[pl.ds(l, 1), :]                            # (1, D)
        du_l = du_scr[pl.ds(l, 1), :]                            # (1, D)
        b_l = B_ref[pl.ds(l, 1), :].astype(jnp.float32)          # (1, N)
        c_l = C_ref[pl.ds(l, 1), :].astype(jnp.float32)          # (1, N)
        dA = jnp.exp(A * dt_l)                                   # (N, D)
        b_col = jnp.sum(b_l * eye, axis=1, keepdims=True)        # (N, 1)
        h = dA * h + b_col * du_l                                # (N, D)
        y = jnp.dot(c_l, h, preferred_element_type=jnp.float32)  # (1, D) on the MXU
        o_ref[pl.ds(l, 1), :] = y.astype(o_ref.dtype)
        return h

    jax.lax.fori_loop(0, L, step, jnp.zeros((N, Dch), jnp.float32))
    # skip connection  y += D * u
    o_ref[...] = o_ref[...] + u_ref[...].astype(jnp.float32) * Dskip_ref[...]


def pallas_selective_scan(u, dt, A_t, Bmat, Cmat, Dskip, delta_bias):
    """Selective scan over channel-last inputs.

    u, dt        : (B, K, L, D)
    A_t          : (K, N, D)
    Bmat, Cmat   : (B, K, L, N)
    Dskip, bias  : (K, 1, D)
    returns      : (B, K, L, D) float32
    """
    Bsz, K, L, D = u.shape
    N = A_t.shape[1]
    flops = int(Bsz * K * L * (7 * N * D + 2 * N))
    transcendentals = int(Bsz * K * L * (N * D + D))
    bytes_accessed = int(4 * (3 * Bsz * K * L * D + 2 * Bsz * K * L * N + K * N * D + 2 * K * D))
    return pl.pallas_call(
        _selective_scan_kernel,
        out_shape=jax.ShapeDtypeStruct((Bsz, K, L, D), jnp.float32),
        grid_spec=pltpu.PrefetchScalarGridSpec(
            num_scalar_prefetch=0,
            grid=(Bsz, K),
            in_specs=[
                pl.BlockSpec((None, None, L, D), lambda b, k: (b, k, 0, 0)),
                pl.BlockSpec((None, None, L, D), lambda b, k: (b, k, 0, 0)),
                pl.BlockSpec((None, N, D), lambda b, k: (k, 0, 0)),
                pl.BlockSpec((None, None, L, N), lambda b, k: (b, k, 0, 0)),
                pl.BlockSpec((None, None, L, N), lambda b, k: (b, k, 0, 0)),
                pl.BlockSpec((None, 1, D), lambda b, k: (k, 0, 0)),
                pl.BlockSpec((None, 1, D), lambda b, k: (k, 0, 0)),
            ],
            out_specs=pl.BlockSpec((None, None, L, D), lambda b, k: (b, k, 0, 0)),
            scratch_shapes=[pltpu.VMEM((L, D), jnp.float32),
                            pltpu.VMEM((L, D), jnp.float32)],
        ),
        compiler_params=pltpu.CompilerParams(
            dimension_semantics=("parallel", "parallel")),
        cost_estimate=pl.CostEstimate(flops=flops,
                                      transcendentals=transcendentals,
                                      bytes_accessed=bytes_accessed),
    )(u, dt, A_t, Bmat, Cmat, Dskip, delta_bias)


def reference_selective_scan(u, dt, A_t, Bmat, Cmat, Dskip, delta_bias):
    """Pure-JAX reference for the selective scan (same layouts as the Pallas wrapper)."""
    Bsz, K, L, D = u.shape
    N = A_t.shape[1]
    dt_eff = _softplus(dt + delta_bias[None])                                    # (B,K,L,D)
    dA = jnp.exp(dt_eff[:, :, :, None, :] * A_t[None, :, None, :, :])            # (B,K,L,N,D)
    inj = Bmat[..., None] * (dt_eff * u)[:, :, :, None, :]                       # (B,K,L,N,D)

    def step(h, xs):
        dA_l, inj_l, c_l = xs
        h = dA_l * h + inj_l                                                     # (B,K,N,D)
        y = jnp.sum(h * c_l[..., None], axis=-2)                                 # (B,K,D)
        return h, y

    h0 = jnp.zeros((Bsz, K, N, D), jnp.float32)
    xs = (jnp.moveaxis(dA, 2, 0), jnp.moveaxis(inj, 2, 0), jnp.moveaxis(Cmat, 2, 0))
    _, ys = jax.lax.scan(step, h0, xs)
    return jnp.moveaxis(ys, 0, 2) + u * Dskip[None]


# ----------------------------------------------------------------------------------------
# Parameters (same shapes/semantics as the PyTorch module; values are synthetic)
# ----------------------------------------------------------------------------------------
def init_ss2d_params(key, d_model=32, d_state=16, ssm_ratio=2.0):
    d_expand = int(ssm_ratio * d_model)
    d_inner = d_expand
    dt_rank = math.ceil(d_model / 16)
    K, KC = 4, 2
    dc_inner, dtc_rank, dc_state = 4, 6, 16
    ks = jax.random.split(key, 24)

    def n(k, shape, s=1.0):
        return (s * jax.random.normal(k, shape)).astype(jnp.float32)

    p = {}
    p['in_conv_w'] = n(ks[0], (2 * d_expand, d_model), 1.0 / math.sqrt(d_model))
    p['in_conv_b'] = n(ks[1], (2 * d_expand,), 0.02)
    p['conv2d_w'] = n(ks[2], (d_expand, 3, 3), 1.0 / 3.0)
    p['conv2d_b'] = n(ks[3], (d_expand,), 0.02)
    p['x_proj_w'] = n(ks[4], (K, dt_rank + 2 * d_state, d_inner), 1.0 / math.sqrt(d_inner))
    p['dt_projs_w'] = n(ks[5], (K, d_inner, dt_rank), 1.0 / math.sqrt(dt_rank))
    p['dt_projs_b'] = n(ks[6], (K, d_inner), 0.5)
    a_row = jnp.tile(jnp.arange(1, d_state + 1, dtype=jnp.float32)[None, :], (d_inner, 1))
    p['A_logs'] = jnp.tile(jnp.log(a_row), (K, 1))                  # (K*d_inner, d_state)
    p['Ds'] = jnp.ones((K * d_inner,), jnp.float32)
    p['out_norm_w'] = 1.0 + n(ks[7], (d_inner,), 0.1)
    p['out_norm_b'] = n(ks[8], (d_inner,), 0.1)
    p['out_conv_w'] = n(ks[9], (d_model, d_expand), 1.0 / math.sqrt(d_expand))
    p['out_conv_b'] = n(ks[10], (d_model,), 0.02)
    # channel branch
    p['conv_cin_w'] = n(ks[11], (dc_inner,), 1.0)
    p['conv_cin_b'] = n(ks[12], (dc_inner,), 0.1)
    p['conv_cout_w'] = n(ks[13], (dc_inner,), 1.0 / math.sqrt(dc_inner))
    p['conv_cout_b'] = n(ks[14], (1,), 0.02)
    p['xc_proj_w'] = n(ks[15], (KC, dtc_rank + 2 * dc_state, dc_inner), 1.0 / math.sqrt(dc_inner))
    p['dtc_projs_w'] = n(ks[16], (KC, dc_inner, dtc_rank), 1.0)
    p['dtc_projs_b'] = n(ks[17], (KC, dc_inner), 1.0)
    p['Ac_logs'] = n(ks[18], (KC * dc_inner, dc_state), 1.0)
    p['Dsc'] = jnp.ones((KC * dc_inner,), jnp.float32)
    p['channel_norm_w'] = 1.0 + n(ks[19], (d_inner,), 0.1)
    p['channel_norm_b'] = n(ks[20], (d_inner,), 0.1)
    return p


# ----------------------------------------------------------------------------------------
# Full SS2D_1 forward (NCHW in, NCHW out) — use_pallas=False gives a pure-JAX reference
# ----------------------------------------------------------------------------------------
def ss2d_forward(params, x, *, use_pallas=True):
    Bn, d_model, H, W = x.shape
    L = H * W
    d_expand = params['in_conv_w'].shape[0] // 2
    d_inner = d_expand
    K = params['x_proj_w'].shape[0]
    dt_rank = params['dt_projs_w'].shape[2]
    d_state = (params['x_proj_w'].shape[1] - dt_rank) // 2
    KC = params['xc_proj_w'].shape[0]
    dc_inner = params['dtc_projs_w'].shape[1]
    dtc_rank = params['dtc_projs_w'].shape[2]
    dc_state = (params['xc_proj_w'].shape[1] - dtc_rank) // 2

    def mm_bias(xr, w, b):
        if use_pallas:
            return pallas_matmul_bias(xr, w, b)
        return xr @ w + b[None, :]

    def layernorm(xr, w, b, z=None):
        if use_pallas:
            return pallas_layernorm(xr, w, b, z=z)
        mu = jnp.mean(xr, axis=-1, keepdims=True)
        var = jnp.mean((xr - mu) ** 2, axis=-1, keepdims=True)
        y = (xr - mu) * jax.lax.rsqrt(var + 1e-5) * w[None, :] + b[None, :]
        return y if z is None else y * _silu(z)

    def dwconv_silu(img, w33, b):
        if use_pallas:
            return pallas_dwconv3x3_silu(img, w33, b)
        xp = jnp.pad(img, ((0, 0), (1, 1), (1, 1), (0, 0)))
        acc = jnp.zeros_like(img)
        for ky in range(3):
            for kx in range(3):
                acc = acc + xp[:, ky:ky + H, kx:kx + W, :] * w33[ky, kx, :]
        return _silu(acc + b[None, None, None, :])

    scan_fn = pallas_selective_scan if use_pallas else reference_selective_scan

    # ---- in_conv (1x1) + split into (x, z) -----------------------------------------------
    x_cl = jnp.transpose(x, (0, 2, 3, 1)).reshape(Bn * L, d_model)
    xz = mm_bias(x_cl, params['in_conv_w'].T, params['in_conv_b'])         # (B*L, 2*de)
    x_lin = xz[:, :d_expand]
    z_lin = xz[:, d_expand:]            # SiLU fused into the gating LayerNorm kernel below

    # ---- depthwise 3x3 conv + SiLU ---------------------------------------------------------
    x_img = x_lin.reshape(Bn, H, W, d_expand)
    xconv = dwconv_silu(x_img, jnp.transpose(params['conv2d_w'], (1, 2, 0)), params['conv2d_b'])

    # ---- spatial 4-direction cross scan (forward_corev1) -----------------------------------
    xh = xconv.reshape(Bn, L, d_inner)                                             # h-major
    xw = jnp.transpose(xconv, (0, 2, 1, 3)).reshape(Bn, L, d_inner)                # w-major
    xs = jnp.stack([xh, xw, jnp.flip(xh, axis=1), jnp.flip(xw, axis=1)], axis=1)   # (B,4,L,D)

    x_dbl = jnp.einsum('bkld,kcd->bklc', xs, params['x_proj_w'])
    dts = jnp.einsum('bklr,kdr->bkld', x_dbl[..., :dt_rank], params['dt_projs_w'])
    Bs = x_dbl[..., dt_rank:dt_rank + d_state]
    Cs = x_dbl[..., dt_rank + d_state:]

    As = -jnp.exp(params['A_logs'].astype(jnp.float32))                            # (K*D, N)
    A_t = jnp.transpose(As.reshape(K, d_inner, d_state), (0, 2, 1))                # (K, N, D)
    Dk = params['Ds'].reshape(K, 1, d_inner)
    dbias = params['dt_projs_b'].reshape(K, 1, d_inner)

    out_y = scan_fn(xs, dts, A_t, Bs, Cs, Dk, dbias)                               # (B,4,L,D)

    def w_major_to_h_major(t):
        return jnp.transpose(t.reshape(Bn, W, H, d_inner), (0, 2, 1, 3)).reshape(Bn, L, d_inner)

    y = (out_y[:, 0]
         + jnp.flip(out_y[:, 2], axis=1)
         + w_major_to_h_major(out_y[:, 1])
         + w_major_to_h_major(jnp.flip(out_y[:, 3], axis=1)))                      # (B, L, D)

    # ---- out_norm (WithBias LN over channels) fused with the SiLU(z) gate -------------------
    y2 = layernorm(y.reshape(Bn * L, d_inner), params['out_norm_w'], params['out_norm_b'],
                   z=z_lin)                                                        # (B*L, D)
    y2_img = y2.reshape(Bn, L, d_inner)

    # ---- channel branch (cforward_corev1) ---------------------------------------------------
    xc_pool = jnp.mean(y2_img, axis=1)                                             # (B, d_inner)
    xc = xc_pool[:, :, None] * params['conv_cin_w'][None, None, :] \
        + params['conv_cin_b'][None, None, :]                                      # (B, Lc, 4)
    xsc = jnp.stack([xc, jnp.flip(xc, axis=1)], axis=1)                            # (B,2,Lc,4)

    xc_dbl = jnp.einsum('bkld,kcd->bklc', xsc, params['xc_proj_w'])
    dtsc = jnp.einsum('bklr,kdr->bkld', xc_dbl[..., :dtc_rank], params['dtc_projs_w'])
    Bsc = xc_dbl[..., dtc_rank:dtc_rank + dc_state]
    Csc = xc_dbl[..., dtc_rank + dc_state:]

    Asc = -jnp.exp(params['Ac_logs'].astype(jnp.float32))                          # (KC*4, 16)
    Asc_t = jnp.transpose(Asc.reshape(KC, dc_inner, dc_state), (0, 2, 1))          # (KC, 16, 4)
    Dck = params['Dsc'].reshape(KC, 1, dc_inner)
    dbias_c = params['dtc_projs_b'].reshape(KC, 1, dc_inner)

    outc = scan_fn(xsc, dtsc, Asc_t, Bsc, Csc, Dck, dbias_c)                       # (B,2,Lc,4)
    yc = outc[:, 0] + jnp.flip(outc[:, 1], axis=1)                                 # (B, Lc, 4)
    c_vec = jnp.einsum('blj,j->bl', yc, params['conv_cout_w']) + params['conv_cout_b'][0]
    c_norm = layernorm(c_vec, params['channel_norm_w'], params['channel_norm_b'])  # (B, d_inner)

    # ---- residual add of the channel context + out_conv (1x1) -------------------------------
    y2_rows = (y2_img + c_norm[:, None, :]).reshape(Bn * L, d_inner)
    out_rows = mm_bias(y2_rows, params['out_conv_w'].T, params['out_conv_b'])      # (B*L, d_model)
    return jnp.transpose(out_rows.reshape(Bn, H, W, d_model), (0, 3, 1, 2))        # NCHW


if __name__ == "__main__":
    jax.config.update("jax_default_matmul_precision", "highest")

    key = jax.random.PRNGKey(0)
    k_param, k_x = jax.random.split(key)

    B, d_model, H, W = 2, 32, 8, 8          # -> d_expand = d_inner = 64, L = 64
    params = init_ss2d_params(k_param, d_model=d_model)
    x = jax.random.normal(k_x, (B, d_model, H, W), dtype=jnp.float32)

    fwd = jax.jit(partial(ss2d_forward, use_pallas=True))
    out = jax.block_until_ready(fwd(params, x))
    assert out.shape == (B, d_model, H, W), out.shape
    assert bool(jnp.all(jnp.isfinite(out)))

    ref = jax.block_until_ready(jax.jit(partial(ss2d_forward, use_pallas=False))(params, x))
    max_err = float(jnp.max(jnp.abs(out - ref)))
    assert jnp.allclose(out, ref, atol=2e-3, rtol=2e-3), max_err

    print("KERNEL_OK")
</pallas_src>

<mosaic_0001>
module attributes {stable_mosaic.version = 11 : i64} {
  func.func @_matmul_bias_kernel(%arg0: i32, %arg1: memref<128x32xf32, #tpu.memory_space<vmem>>, %arg2: memref<32x128xf32, #tpu.memory_space<vmem>>, %arg3: memref<1x128xf32, #tpu.memory_space<vmem>>, %arg4: memref<128x128xf32, #tpu.memory_space<vmem>>) attributes {dimension_semantics = [#tpu.dimension_semantics<parallel>], iteration_bounds = array<i64: 1>, scalar_prefetch = 0 : i64, scratch_operands = 0 : i64, tpu.core_type = #tpu.core_type<tc>, window_params = [{transform_indices = @transform_0, window_bounds = array<i64: 128, 32>}, {pipeline_mode = #tpu.pipeline_mode<synchronous>, transform_indices = @transform_1, window_bounds = array<i64: 32, 128>}, {pipeline_mode = #tpu.pipeline_mode<synchronous>, transform_indices = @transform_2, window_bounds = array<i64: 1, 128>}, {transform_indices = @transform_3, window_bounds = array<i64: 128, 128>}]} {
    %c0 = arith.constant 0 : index
    %c0_0 = arith.constant 0 : index
    %0 = vector.load %arg1[%c0, %c0_0] : memref<128x32xf32, #tpu.memory_space<vmem>>, vector<128x32xf32>
    %c0_1 = arith.constant 0 : index
    %c0_2 = arith.constant 0 : index
    %1 = vector.load %arg2[%c0_1, %c0_2] : memref<32x128xf32, #tpu.memory_space<vmem>>, vector<32x128xf32>
    %cst = arith.constant dense<0.000000e+00> : vector<128x128xf32>
    %2 = tpu.matmul %0, %1, %cst {dimension_numbers = #tpu.dot_dimension_numbers<[1], [0], [0], [1], [0, 0, 1, 1], [], []>, precision = #tpu.contract_precision<fp32>} : vector<128x32xf32>, vector<32x128xf32>, vector<128x128xf32> -> vector<128x128xf32>
    %c0_3 = arith.constant 0 : index
    %c0_4 = arith.constant 0 : index
    %3 = vector.load %arg3[%c0_3, %c0_4] : memref<1x128xf32, #tpu.memory_space<vmem>>, vector<1x128xf32>
    %4 = vector.broadcast %3 : vector<1x128xf32> to vector<128x128xf32>
    %5 = arith.addf %2, %4 : vector<128x128xf32>
    %c0_5 = arith.constant 0 : index
    %c0_6 = arith.constant 0 : index
    %6 = vector.load %arg4[%c0_5, %c0_6] : memref<128x128xf32, #tpu.memory_space<vmem>>, vector<128x128xf32>
    tpu.vector_store %arg4[%c0_5, %c0_6], %5 {strides = array<i32>} : memref<128x128xf32, #tpu.memory_space<vmem>>, vector<128x128xf32>,
    return
  }
  func.func @transform_0(%arg0: i32) -> (i32, i32) {
    %c0_i32 = arith.constant 0 : i32
    %c0_i32_0 = arith.constant 0 : i32
    return %arg0, %c0_i32 : i32, i32
  }
  func.func @transform_1(%arg0: i32) -> (i32, i32) {
    %c0_i32 = arith.constant 0 : i32
    %c0_i32_0 = arith.constant 0 : i32
    %c0_i32_1 = arith.constant 0 : i32
    return %c0_i32, %c0_i32_0 : i32, i32
  }
  func.func @transform_2(%arg0: i32) -> (i32, i32) {
    %c0_i32 = arith.constant 0 : i32
    %c0_i32_0 = arith.constant 0 : i32
    %c0_i32_1 = arith.constant 0 : i32
    return %c0_i32, %c0_i32_0 : i32, i32
  }
  func.func @transform_3(%arg0: i32) -> (i32, i32) {
    %c0_i32 = arith.constant 0 : i32
    %c0_i32_0 = arith.constant 0 : i32
    return %arg0, %c0_i32 : i32, i32
  }
}

module attributes {stable_mosaic.version = 11 : i64} {
  func.func @_dwconv3x3_silu_kernel(%arg0: i32, %arg1: memref<1x10x10x64xf32, #tpu.memory_space<vmem>>, %arg2: memref<9x64xf32, #tpu.memory_space<vmem>>, %arg3: memref<1x64xf32, #tpu.memory_space<vmem>>, %arg4: memref<1x8x8x64xf32, #tpu.memory_space<vmem>>) attributes {dimension_semantics = [#tpu.dimension_semantics<parallel>], iteration_bounds = array<i64: 2>, scalar_prefetch = 0 : i64, scratch_operands = 0 : i64, tpu.core_type = #tpu.core_type<tc>, window_params = [{transform_indices = @transform_0, window_bounds = array<i64: 1, 10, 10, 64>}, {pipeline_mode = #tpu.pipeline_mode<synchronous>, transform_indices = @transform_1, window_bounds = array<i64: 9, 64>}, {pipeline_mode = #tpu.pipeline_mode<synchronous>, transform_indices = @transform_2, window_bounds = array<i64: 1, 64>}, {transform_indices = @transform_3, window_bounds = array<i64: 1, 8, 8, 64>}]} {
    %cst = arith.constant 0.000000e+00 : f32
    %0 = vector.broadcast %cst : f32 to vector<8x8x64xf32>
    %c0 = arith.constant 0 : index
    %c0_0 = arith.constant 0 : index
    %c0_1 = arith.constant 0 : index
    %c0_2 = arith.constant 0 : index
    %1 = vector.load %arg1[%c0, %c0_0, %c0_1, %c0_2] : memref<1x10x10x64xf32, #tpu.memory_space<vmem>>, vector<1x8x8x64xf32>
    %2 = vector.shape_cast %1 : vector<1x8x8x64xf32> to vector<8x8x64xf32>
    %c0_3 = arith.constant 0 : index
    %c0_4 = arith.constant 0 : index
    %3 = vector.load %arg2[%c0_3, %c0_4] : memref<9x64xf32, #tpu.memory_space<vmem>>, vector<1x64xf32>
    %4 = vector.shape_cast %3 : vector<1x64xf32> to vector<1x1x64xf32>
    %5 = vector.broadcast %4 : vector<1x1x64xf32> to vector<8x8x64xf32>
    %6 = arith.mulf %2, %5 : vector<8x8x64xf32>
    %7 = arith.addf %0, %6 : vector<8x8x64xf32>
    %c0_5 = arith.constant 0 : index
    %c0_6 = arith.constant 0 : index
    %c1 = arith.constant 1 : index
    %c0_7 = arith.constant 0 : index
    %8 = vector.load %arg1[%c0_5, %c0_6, %c1, %c0_7] : memref<1x10x10x64xf32, #tpu.memory_space<vmem>>, vector<1x8x8x64xf32>
    %9 = vector.shape_cast %8 : vector<1x8x8x64xf32> to vector<8x8x64xf32>
    %c1_8 = arith.constant 1 : index
    %c0_9 = arith.constant 0 : index
    %10 = vector.load %arg2[%c1_8, %c0_9] : memref<9x64xf32, #tpu.memory_space<vmem>>, vector<1x64xf32>
    %11 = vector.shape_cast %10 : vector<1x64xf32> to vector<1x1x64xf32>
    %12 = vector.broadcast %11 : vector<1x1x64xf32> to vector<8x8x64xf32>
    %13 = arith.mulf %9, %12 : vector<8x8x64xf32>
    %14 = arith.addf %7, %13 : vector<8x8x64xf32>
    %c0_10 = arith.constant 0 : index
    %c0_11 = arith.constant 0 : index
    %c2 = arith.constant 2 : index
    %c0_12 = arith.constant 0 : index
    %15 = vector.load %arg1[%c0_10, %c0_11, %c2, %c0_12] : memref<1x10x10x64xf32, #tpu.memory_space<vmem>>, vector<1x8x8x64xf32>
    %16 = vector.shape_cast %15 : vector<1x8x8x64xf32> to vector<8x8x64xf32>
    %c2_13 = arith.constant 2 : index
    %c0_14 = arith.constant 0 : index
    %17 = vector.load %arg2[%c2_13, %c0_14] : memref<9x64xf32, #tpu.memory_space<vmem>>, vector<1x64xf32>
    %18 = vector.shape_cast %17 : vector<1x64xf32> to vector<1x1x64xf32>
    %19 = vector.broadcast %18 : vector<1x1x64xf32> to vector<8x8x64xf32>
    %20 = arith.mulf %16, %19 : vector<8x8x64xf32>
    %21 = arith.addf %14, %20 : vector<8x8x64xf32>
    %c0_15 = arith.constant 0 : index
    %c1_16 = arith.constant 1 : index
    %c0_17 = arith.constant 0 : index
    %c0_18 = arith.constant 0 : index
    %22 = vector.load %arg1[%c0_15, %c1_16, %c0_17, %c0_18] : memref<1x10x10x64xf32, #tpu.memory_space<vmem>>, vector<1x8x8x64xf32>
    %23 = vector.shape_cast %22 : vector<1x8x8x64xf32> to vector<8x8x64xf32>
    %c3 = arith.constant 3 : index
    %c0_19 = arith.constant 0 : index
    %24 = vector.load %arg2[%c3, %c0_19] : memref<9x64xf32, #tpu.memory_space<vmem>>, vector<1x64xf32>
    %25 = vector.shape_cast %24 : vector<1x64xf32> to vector<1x1x64xf32>
    %26 = vector.broadcast %25 : vector<1x1x64xf32> to vector<8x8x64xf32>
    %27 = arith.mulf %23, %26 : vector<8x8x64xf32>
    %28 = arith.addf %21, %27 : vector<8x8x64xf32>
    %c0_20 = arith.constant 0 : index
    %c1_21 = arith.constant 1 : index
    %c1_22 = arith.constant 1 : index
    %c0_23 = arith.constant 0 : index
    %29 = vector.load %arg1[%c0_20, %c1_21, %c1_22, %c0_23] : memref<1x10x10x64xf32, #tpu.memory_space<vmem>>, vector<1x8x8x64xf32>
    %30 = vector.shape_cast %29 : vector<1x8x8x64xf32> to vector<8x8x64xf32>
    %c4 = arith.constant 4 : index
    %c0_24 = arith.constant 0 : index
    %31 = vector.load %arg2[%c4, %c0_24] : memref<9x64xf32, #tpu.memory_space<vmem>>, vector<1x64xf32>
    %32 = vector.shape_cast %31 : vector<1x64xf32> to vector<1x1x64xf32>
    %33 = vector.broadcast %32 : vector<1x1x64xf32> to vector<8x8x64xf32>
    %34 = arith.mulf %30, %33 : vector<8x8x64xf32>
    %35 = arith.addf %28, %34 : vector<8x8x64xf32>
    %c0_25 = arith.constant 0 : index
    %c1_26 = arith.constant 1 : index
    %c2_27 = arith.constant 2 : index
    %c0_28 = arith.constant 0 : index
    %36 = vector.load %arg1[%c0_25, %c1_26, %c2_27, %c0_28] : memref<1x10x10x64xf32, #tpu.memory_space<vmem>>, vector<1x8x8x64xf32>
    %37 = vector.shape_cast %36 : vector<1x8x8x64xf32> to vector<8x8x64xf32>
    %c5 = arith.constant 5 : index
    %c0_29 = arith.constant 0 : index
    %38 = vector.load %arg2[%c5, %c0_29] : memref<9x64xf32, #tpu.memory_space<vmem>>, vector<1x64xf32>
    %39 = vector.shape_cast %38 : vector<1x64xf32> to vector<1x1x64xf32>
    %40 = vector.broadcast %39 : vector<1x1x64xf32> to vector<8x8x64xf32>
    %41 = arith.mulf %37, %40 : vector<8x8x64xf32>
    %42 = arith.addf %35, %41 : vector<8x8x64xf32>
    %c0_30 = arith.constant 0 : index
    %c2_31 = arith.constant 2 : index
    %c0_32 = arith.constant 0 : index
    %c0_33 = arith.constant 0 : index
    %43 = vector.load %arg1[%c0_30, %c2_31, %c0_32, %c0_33] : memref<1x10x10x64xf32, #tpu.memory_space<vmem>>, vector<1x8x8x64xf32>
    %44 = vector.shape_cast %43 : vector<1x8x8x64xf32> to vector<8x8x64xf32>
    %c6 = arith.constant 6 : index
    %c0_34 = arith.constant 0 : index
    %45 = vector.load %arg2[%c6, %c0_34] : memref<9x64xf32, #tpu.memory_space<vmem>>, vector<1x64xf32>
    %46 = vector.shape_cast %45 : vector<1x64xf32> to vector<1x1x64xf32>
    %47 = vector.broadcast %46 : vector<1x1x64xf32> to vector<8x8x64xf32>
    %48 = arith.mulf %44, %47 : vector<8x8x64xf32>
    %49 = arith.addf %42, %48 : vector<8x8x64xf32>
    %c0_35 = arith.constant 0 : index
    %c2_36 = arith.constant 2 : index
    %c1_37 = arith.constant 1 : index
    %c0_38 = arith.constant 0 : index
    %50 = vector.load %arg1[%c0_35, %c2_36, %c1_37, %c0_38] : memref<1x10x10x64xf32, #tpu.memory_space<vmem>>, vector<1x8x8x64xf32>
    %51 = vector.shape_cast %50 : vector<1x8x8x64xf32> to vector<8x8x64xf32>
    %c7 = arith.constant 7 : index
    %c0_39 = arith.constant 0 : index
    %52 = vector.load %arg2[%c7, %c0_39] : memref<9x64xf32, #tpu.memory_space<vmem>>, vector<1x64xf32>
    %53 = vector.shape_cast %52 : vector<1x64xf32> to vector<1x1x64xf32>
    %54 = vector.broadcast %53 : vector<1x1x64xf32> to vector<8x8x64xf32>
    %55 = arith.mulf %51, %54 : vector<8x8x64xf32>
    %56 = arith.addf %49, %55 : vector<8x8x64xf32>
    %c0_40 = arith.constant 0 : index
    %c2_41 = arith.constant 2 : index
    %c2_42 = arith.constant 2 : index
    %c0_43 = arith.constant 0 : index
    %57 = vector.load %arg1[%c0_40, %c2_41, %c2_42, %c0_43] : memref<1x10x10x64xf32, #tpu.memory_space<vmem>>, vector<1x8x8x64xf32>
    %58 = vector.shape_cast %57 : vector<1x8x8x64xf32> to vector<8x8x64xf32>
    %c8 = arith.constant 8 : index
    %c0_44 = arith.constant 0 : index
    %59 = vector.load %arg2[%c8, %c0_44] : memref<9x64xf32, #tpu.memory_space<vmem>>, vector<1x64xf32>
    %60 = vector.shape_cast %59 : vector<1x64xf32> to vector<1x1x64xf32>
    %61 = vector.broadcast %60 : vector<1x1x64xf32> to vector<8x8x64xf32>
    %62 = arith.mulf %58, %61 : vector<8x8x64xf32>
    %63 = arith.addf %56, %62 : vector<8x8x64xf32>
    %c0_45 = arith.constant 0 : index
    %c0_46 = arith.constant 0 : index
    %64 = vector.load %arg3[%c0_45, %c0_46] : memref<1x64xf32, #tpu.memory_space<vmem>>, vector<1x64xf32>
    %65 = vector.shape_cast %64 : vector<1x64xf32> to vector<1x1x64xf32>
    %66 = vector.broadcast %65 : vector<1x1x64xf32> to vector<8x8x64xf32>
    %67 = arith.addf %63, %66 : vector<8x8x64xf32>
    %cst_47 = arith.constant 0.000000e+00 : f32
    %68 = vector.broadcast %cst_47 : f32 to vector<8x8x64xf32>
    %69 = arith.subf %68, %67 : vector<8x8x64xf32>
    %70 = math.exp %69 : vector<8x8x64xf32>
    %cst_48 = arith.constant 1.000000e+00 : f32
    %71 = vector.broadcast %cst_48 : f32 to vector<8x8x64xf32>
    %72 = arith.addf %71, %70 : vector<8x8x64xf32>
    %cst_49 = arith.constant 1.000000e+00 : f32
    %73 = vector.broadcast %cst_49 : f32 to vector<8x8x64xf32>
    %74 = arith.divf %73, %72 : vector<8x8x64xf32>
    %75 = arith.mulf %67, %74 : vector<8x8x64xf32>
    %c0_50 = arith.constant 0 : index
    %c0_51 = arith.constant 0 : index
    %c0_52 = arith.constant 0 : index
    %c0_53 = arith.constant 0 : index
    %76 = vector.load %arg4[%c0_50, %c0_51, %c0_52, %c0_53] : memref<1x8x8x64xf32, #tpu.memory_space<vmem>>, vector<1x8x8x64xf32>
    %77 = vector.shape_cast %76 : vector<1x8x8x64xf32> to vector<8x8x64xf32>
    %78 = vector.shape_cast %75 : vector<8x8x64xf32> to vector<1x8x8x64xf32>
    tpu.vector_store %arg4[%c0_50, %c0_51, %c0_52, %c0_53], %78 {strides = array<i32>} : memref<1x8x8x64xf32, #tpu.memory_space<vmem>>, vector<1x8x8x64xf32>,
    return
  }
  func.func @transform_0(%arg0: i32) -> (i32, i32, i32, i32) {
    %c0_i32 = arith.constant 0 : i32
    %c0_i32_0 = arith.constant 0 : i32
    %c0_i32_1 = arith.constant 0 : i32
    %c0_i32_2 = arith.constant 0 : i32
    return %arg0, %c0_i32, %c0_i32_0, %c0_i32_1 : i32, i32, i32, i32
  }
  func.func @transform_1(%arg0: i32) -> (i32, i32) {
    %c0_i32 = arith.constant 0 : i32
    %c0_i32_0 = arith.constant 0 : i32
    %c0_i32_1 = arith.constant 0 : i32
    return %c0_i32, %c0_i32_0 : i32, i32
  }
  func.func @transform_2(%arg0: i32) -> (i32, i32) {
    %c0_i32 = arith.constant 0 : i32
    %c0_i32_0 = arith.constant 0 : i32
    %c0_i32_1 = arith.constant 0 : i32
    return %c0_i32, %c0_i32_0 : i32, i32
  }
  func.func @transform_3(%arg0: i32) -> (i32, i32, i32, i32) {
    %c0_i32 = arith.constant 0 : i32
    %c0_i32_0 = arith.constant 0 : i32
    %c0_i32_1 = arith.constant 0 : i32
    %c0_i32_2 = arith.constant 0 : i32
    return %arg0, %c0_i32, %c0_i32_0, %c0_i32_1 : i32, i32, i32, i32
  }
}

module attributes {stable_mosaic.version = 11 : i64} {
  func.func @_selective_scan_kernel(%arg0: i32, %arg1: i32, %arg2: memref<1x1x64x64xf32, #tpu.memory_space<vmem>>, %arg3: memref<1x1x64x64xf32, #tpu.memory_space<vmem>>, %arg4: memref<1x16x64xf32, #tpu.memory_space<vmem>>, %arg5: memref<1x1x64x16xf32, #tpu.memory_space<vmem>>, %arg6: memref<1x1x64x16xf32, #tpu.memory_space<vmem>>, %arg7: memref<1x1x64xf32, #tpu.memory_space<vmem>>, %arg8: memref<1x1x64xf32, #tpu.memory_space<vmem>>, %arg9: memref<1x1x64x64xf32, #tpu.memory_space<vmem>>, %arg10: memref<64x64xf32, #tpu.memory_space<vmem>>, %arg11: memref<64x64xf32, #tpu.memory_space<vmem>>) attributes {dimension_semantics = [#tpu.dimension_semantics<parallel>, #tpu.dimension_semantics<parallel>], iteration_bounds = array<i64: 2, 4>, scalar_prefetch = 0 : i64, scratch_operands = 2 : i64, tpu.core_type = #tpu.core_type<tc>, window_params = [{transform_indices = @transform_0, window_bounds = array<i64: 1, 1, 64, 64>}, {transform_indices = @transform_1, window_bounds = array<i64: 1, 1, 64, 64>}, {transform_indices = @transform_2, window_bounds = array<i64: 1, 16, 64>}, {transform_indices = @transform_3, window_bounds = array<i64: 1, 1, 64, 16>}, {transform_indices = @transform_4, window_bounds = array<i64: 1, 1, 64, 16>}, {transform_indices = @transform_5, window_bounds = array<i64: 1, 1, 64>}, {transform_indices = @transform_6, window_bounds = array<i64: 1, 1, 64>}, {transform_indices = @transform_7, window_bounds = array<i64: 1, 1, 64, 64>}]} {
    %c0 = arith.constant 0 : index
    %c0_0 = arith.constant 0 : index
    %c0_1 = arith.constant 0 : index
    %c0_2 = arith.constant 0 : index
    %0 = vector.load %arg2[%c0, %c0_0, %c0_1, %c0_2] : memref<1x1x64x64xf32, #tpu.memory_space<vmem>>, vector<1x1x64x64xf32>
    %1 = vector.shape_cast %0 : vector<1x1x64x64xf32> to vector<64x64xf32>
    %c0_3 = arith.constant 0 : index
    %c0_4 = arith.constant 0 : index
    %c0_5 = arith.constant 0 : index
    %c0_6 = arith.constant 0 : index
    %2 = vector.load %arg3[%c0_3, %c0_4, %c0_5, %c0_6] : memref<1x1x64x64xf32, #tpu.memory_space<vmem>>, vector<1x1x64x64xf32>
    %3 = vector.shape_cast %2 : vector<1x1x64x64xf32> to vector<64x64xf32>
    %c0_7 = arith.constant 0 : index
    %c0_8 = arith.constant 0 : index
    %c0_9 = arith.constant 0 : index
    %4 = vector.load %arg8[%c0_7, %c0_8, %c0_9] : memref<1x1x64xf32, #tpu.memory_space<vmem>>, vector<1x1x64xf32>
    %5 = vector.shape_cast %4 : vector<1x1x64xf32> to vector<1x64xf32>
    %6 = vector.broadcast %5 : vector<1x64xf32> to vector<64x64xf32>
    %7 = arith.addf %3, %6 : vector<64x64xf32>
    %cst = arith.constant 2.000000e+01 : f32
    %8 = vector.broadcast %cst : f32 to vector<64x64xf32>
    %9 = arith.minimumf %7, %8 : vector<64x64xf32>
    %cst_10 = arith.constant 2.000000e+01 : f32
    %10 = vector.broadcast %cst_10 : f32 to vector<64x64xf32>
    %11 = arith.cmpf ogt, %7, %10 : vector<64x64xf32>
    %12 = math.exp %9 : vector<64x64xf32>
    %cst_11 = arith.constant 1.000000e+00 : f32
    %13 = vector.broadcast %cst_11 : f32 to vector<64x64xf32>
    %14 = arith.addf %13, %12 : vector<64x64xf32>
    %15 = math.log %14 : vector<64x64xf32>
    %16 = arith.select %11, %7, %15 : vector<64x64xi1>, vector<64x64xf32>
    %c0_12 = arith.constant 0 : index
    %c0_13 = arith.constant 0 : index
    %17 = vector.load %arg10[%c0_12, %c0_13] : memref<64x64xf32, #tpu.memory_space<vmem>>, vector<64x64xf32>
    tpu.vector_store %arg10[%c0_12, %c0_13], %16 {strides = array<i32>} : memref<64x64xf32, #tpu.memory_space<vmem>>, vector<64x64xf32>,
    %18 = arith.mulf %16, %1 : vector<64x64xf32>
    %c0_14 = arith.constant 0 : index
    %c0_15 = arith.constant 0 : index
    %19 = vector.load %arg11[%c0_14, %c0_15] : memref<64x64xf32, #tpu.memory_space<vmem>>, vector<64x64xf32>
    tpu.vector_store %arg11[%c0_14, %c0_15], %18 {strides = array<i32>} : memref<64x64xf32, #tpu.memory_space<vmem>>, vector<64x64xf32>,
    %c0_16 = arith.constant 0 : index
    %c0_17 = arith.constant 0 : index
    %c0_18 = arith.constant 0 : index
    %20 = vector.load %arg4[%c0_16, %c0_17, %c0_18] : memref<1x16x64xf32, #tpu.memory_space<vmem>>, vector<1x16x64xf32>
    %21 = vector.shape_cast %20 : vector<1x16x64xf32> to vector<16x64xf32>
    %22 = tpu.iota {dimensions = array<i32: 0>} : vector<16x16xi32>
    %23 = tpu.iota {dimensions = array<i32: 1>} : vector<16x16xi32>
    %24 = arith.cmpi eq, %22, %23 : vector<16x16xi32>
    %25 = arith.extui %24 : vector<16x16xi1> to vector<16x16xi32>
    %26 = arith.sitofp %25 : vector<16x16xi32> to vector<16x16xf32>
    %cst_19 = arith.constant 0.000000e+00 : f32
    %27 = vector.broadcast %cst_19 : f32 to vector<16x64xf32>
    %c0_i32 = arith.constant 0 : i32
    %c64_i32 = arith.constant 64 : i32
    %28 = arith.addi %c0_i32, %c64_i32 : i32
    %c1_i32 = arith.constant 1 : i32
    %29 = scf.for %arg12 = %c0_i32 to %28 step %c1_i32 iter_args(%arg13 = %27) -> (vector<16x64xf32>)  : i32 {
      %42 = arith.index_cast %arg12 : i32 to index
      %c0_36 = arith.constant 0 : index
      %43 = vector.load %arg10[%42, %c0_36] : memref<64x64xf32, #tpu.memory_space<vmem>>, vector<1x64xf32>
      %44 = arith.index_cast %arg12 : i32 to index
      %c0_37 = arith.constant 0 : index
      %45 = vector.load %arg11[%44, %c0_37] : memref<64x64xf32, #tpu.memory_space<vmem>>, vector<1x64xf32>
      %c0_38 = arith.constant 0 : index
      %c0_39 = arith.constant 0 : index
      %46 = arith.index_cast %arg12 : i32 to index
      %c0_40 = arith.constant 0 : index
      %47 = vector.load %arg5[%c0_38, %c0_39, %46, %c0_40] : memref<1x1x64x16xf32, #tpu.memory_space<vmem>>, vector<1x1x1x16xf32>
      %48 = vector.shape_cast %47 : vector<1x1x1x16xf32> to vector<1x16xf32>
      %c0_41 = arith.constant 0 : index
      %c0_42 = arith.constant 0 : index
      %49 = arith.index_cast %arg12 : i32 to index
      %c0_43 = arith.constant 0 : index
      %50 = vector.load %arg6[%c0_41, %c0_42, %49, %c0_43] : memref<1x1x64x16xf32, #tpu.memory_space<vmem>>, vector<1x1x1x16xf32>
      %51 = vector.shape_cast %50 : vector<1x1x1x16xf32> to vector<1x16xf32>
      %52 = vector.broadcast %43 : vector<1x64xf32> to vector<16x64xf32>
      %53 = arith.mulf %21, %52 : vector<16x64xf32>
      %54 = math.exp %53 : vector<16x64xf32>
      %55 = vector.broadcast %48 : vector<1x16xf32> to vector<16x16xf32>
      %56 = arith.mulf %55, %26 : vector<16x16xf32>
      %cst_44 = arith.constant dense<0.000000e+00> : vector<16xf32>
      %57 = vector.multi_reduction <add>, %56, %cst_44 [1] : vector<16x16xf32> to vector<16xf32>
      %58 = vector.shape_cast %57 : vector<16xf32> to vector<16x1xf32>
      %59 = arith.mulf %54, %arg13 : vector<16x64xf32>
      %60 = vector.broadcast %58 : vector<16x1xf32> to vector<16x64xf32>
      %61 = vector.broadcast %45 : vector<1x64xf32> to vector<16x64xf32>
      %62 = arith.mulf %60, %61 : vector<16x64xf32>
      %63 = arith.addf %59, %62 : vector<16x64xf32>
      %cst_45 = arith.constant dense<0.000000e+00> : vector<1x64xf32>
      %64 = tpu.matmul %51, %63, %cst_45 {dimension_numbers = #tpu.dot_dimension_numbers<[1], [0], [0], [1], [0, 0, 1, 1], [], []>, precision = #tpu.contract_precision<fp32>} : vector<1x16xf32>, vector<16x64xf32>, vector<1x64xf32> -> vector<1x64xf32>
      %c0_46 = arith.constant 0 : index
      %c0_47 = arith.constant 0 : index
      %65 = arith.index_cast %arg12 : i32 to index
      %c0_48 = arith.constant 0 : index
      %66 = vector.load %arg9[%c0_46, %c0_47, %65, %c0_48] : memref<1x1x64x64xf32, #tpu.memory_space<vmem>>, vector<1x1x1x64xf32>
      %67 = vector.shape_cast %66 : vector<1x1x1x64xf32> to vector<1x64xf32>
      %68 = vector.shape_cast %64 : vector<1x64xf32> to vector<1x1x1x64xf32>
      tpu.vector_store %arg9[%c0_46, %c0_47, %65, %c0_48], %68 {strides = array<i32>} : memref<1x1x64x64xf32, #tpu.memory_space<vmem>>, vector<1x1x1x64xf32>,
      scf.yield %63 : vector<16x64xf32>
    }
    %c64_i32_20 = arith.constant 64 : i32
    %c0_21 = arith.constant 0 : index
    %c0_22 = arith.constant 0 : index
    %c0_23 = arith.constant 0 : index
    %c0_24 = arith.constant 0 : index
    %30 = vector.load %arg9[%c0_21, %c0_22, %c0_23, %c0_24] : memref<1x1x64x64xf32, #tpu.memory_space<vmem>>, vector<1x1x64x64xf32>
    %31 = vector.shape_cast %30 : vector<1x1x64x64xf32> to vector<64x64xf32>
    %c0_25 = arith.constant 0 : index
    %c0_26 = arith.constant 0 : index
    %c0_27 = arith.constant 0 : index
    %c0_28 = arith.constant 0 : index
    %32 = vector.load %arg2[%c0_25, %c0_26, %c0_27, %c0_28] : memref<1x1x64x64xf32, #tpu.memory_space<vmem>>, vector<1x1x64x64xf32>
    %33 = vector.shape_cast %32 : vector<1x1x64x64xf32> to vector<64x64xf32>
    %c0_29 = arith.constant 0 : index
    %c0_30 = arith.constant 0 : index
    %c0_31 = arith.constant 0 : index
    %34 = vector.load %arg7[%c0_29, %c0_30, %c0_31] : memref<1x1x64xf32, #tpu.memory_space<vmem>>, vector<1x1x64xf32>
    %35 = vector.shape_cast %34 : vector<1x1x64xf32> to vector<1x64xf32>
    %36 = vector.broadcast %35 : vector<1x64xf32> to vector<64x64xf32>
    %37 = arith.mulf %33, %36 : vector<64x64xf32>
    %38 = arith.addf %31, %37 : vector<64x64xf32>
    %c0_32 = arith.constant 0 : index
    %c0_33 = arith.constant 0 : index
    %c0_34 = arith.constant 0 : index
    %c0_35 = arith.constant 0 : index
    %39 = vector.load %arg9[%c0_32, %c0_33, %c0_34, %c0_35] : memref<1x1x64x64xf32, #tpu.memory_space<vmem>>, vector<1x1x64x64xf32>
    %40 = vector.shape_cast %39 : vector<1x1x64x64xf32> to vector<64x64xf32>
    %41 = vector.shape_cast %38 : vector<64x64xf32> to vector<1x1x64x64xf32>
    tpu.vector_store %arg9[%c0_32, %c0_33, %c0_34, %c0_35], %41 {strides = array<i32>} : memref<1x1x64x64xf32, #tpu.memory_space<vmem>>, vector<1x1x64x64xf32>,
    return
  }
  func.func @transform_0(%arg0: i32, %arg1: i32) -> (i32, i32, i32, i32) {
    %c0_i32 = arith.constant 0 : i32
    %c0_i32_0 = arith.constant 0 : i32
    %c0_i32_1 = arith.constant 0 : i32
    return %arg0, %arg1, %c0_i32, %c0_i32_0 : i32, i32, i32, i32
  }
  func.func @transform_1(%arg0: i32, %arg1: i32) -> (i32, i32, i32, i32) {
    %c0_i32 = arith.constant 0 : i32
    %c0_i32_0 = arith.constant 0 : i32
    %c0_i32_1 = arith.constant 0 : i32
    return %arg0, %arg1, %c0_i32, %c0_i32_0 : i32, i32, i32, i32
  }
  func.func @transform_2(%arg0: i32, %arg1: i32) -> (i32, i32, i32) {
    %c0_i32 = arith.constant 0 : i32
    %c0_i32_0 = arith.constant 0 : i32
    %c0_i32_1 = arith.constant 0 : i32
    return %arg1, %c0_i32, %c0_i32_0 : i32, i32, i32
  }
  func.func @transform_3(%arg0: i32, %arg1: i32) -> (i32, i32, i32, i32) {
    %c0_i32 = arith.constant 0 : i32
    %c0_i32_0 = arith.constant 0 : i32
    %c0_i32_1 = arith.constant 0 : i32
    return %arg0, %arg1, %c0_i32, %c0_i32_0 : i32, i32, i32, i32
  }
  func.func @transform_4(%arg0: i32, %arg1: i32) -> (i32, i32, i32, i32) {
    %c0_i32 = arith.constant 0 : i32
    %c0_i32_0 = arith.constant 0 : i32
    %c0_i32_1 = arith.constant 0 : i32
    return %arg0, %arg1, %c0_i32, %c0_i32_0 : i32, i32, i32, i32
  }
  func.func @transform_5(%arg0: i32, %arg1: i32) -> (i32, i32, i32) {
    %c0_i32 = arith.constant 0 : i32
    %c0_i32_0 = arith.constant 0 : i32
    %c0_i32_1 = arith.constant 0 : i32
    return %arg1, %c0_i32, %c0_i32_0 : i32, i32, i32
  }
  func.func @transform_6(%arg0: i32, %arg1: i32) -> (i32, i32, i32) {
    %c0_i32 = arith.constant 0 : i32
    %c0_i32_0 = arith.constant 0 : i32
    %c0_i32_1 = arith.constant 0 : i32
    return %arg1, %c0_i32, %c0_i32_0 : i32, i32, i32
  }
  func.func @transform_7(%arg0: i32, %arg1: i32) -> (i32, i32, i32, i32) {
    %c0_i32 = arith.constant 0 : i32
    %c0_i32_0 = arith.constant 0 : i32
    %c0_i32_1 = arith.constant 0 : i32
    return %arg0, %arg1, %c0_i32, %c0_i32_0 : i32, i32, i32, i32
  }
}

module attributes {stable_mosaic.version = 11 : i64} {
  func.func @_ln_silu_gate_kernel(%arg0: i32, %arg1: memref<128x64xf32, #tpu.memory_space<vmem>>, %arg2: memref<128x64xf32, #tpu.memory_space<vmem>>, %arg3: memref<1x64xf32, #tpu.memory_space<vmem>>, %arg4: memref<1x64xf32, #tpu.memory_space<vmem>>, %arg5: memref<128x64xf32, #tpu.memory_space<vmem>>) attributes {dimension_semantics = [#tpu.dimension_semantics<parallel>], iteration_bounds = array<i64: 1>, scalar_prefetch = 0 : i64, scratch_operands = 0 : i64, tpu.core_type = #tpu.core_type<tc>, window_params = [{transform_indices = @transform_0, window_bounds = array<i64: 128, 64>}, {transform_indices = @transform_1, window_bounds = array<i64: 128, 64>}, {pipeline_mode = #tpu.pipeline_mode<synchronous>, transform_indices = @transform_2, window_bounds = array<i64: 1, 64>}, {pipeline_mode = #tpu.pipeline_mode<synchronous>, transform_indices = @transform_3, window_bounds = array<i64: 1, 64>}, {transform_indices = @transform_4, window_bounds = array<i64: 128, 64>}]} {
    %c0 = arith.constant 0 : index
    %c0_0 = arith.constant 0 : index
    %0 = vector.load %arg1[%c0, %c0_0] : memref<128x64xf32, #tpu.memory_space<vmem>>, vector<128x64xf32>
    %cst = arith.constant dense<0.000000e+00> : vector<128xf32>
    %1 = vector.multi_reduction <add>, %0, %cst [1] : vector<128x64xf32> to vector<128xf32>
    %2 = vector.shape_cast %1 : vector<128xf32> to vector<128x1xf32>
    %cst_1 = arith.constant 6.400000e+01 : f32
    %3 = vector.broadcast %cst_1 : f32 to vector<128x1xf32>
    %4 = arith.divf %2, %3 : vector<128x1xf32>
    %5 = vector.broadcast %4 : vector<128x1xf32> to vector<128x64xf32>
    %6 = arith.subf %0, %5 : vector<128x64xf32>
    %7 = arith.mulf %6, %6 : vector<128x64xf32>
    %cst_2 = arith.constant dense<0.000000e+00> : vector<128xf32>
    %8 = vector.multi_reduction <add>, %7, %cst_2 [1] : vector<128x64xf32> to vector<128xf32>
    %9 = vector.shape_cast %8 : vector<128xf32> to vector<128x1xf32>
    %cst_3 = arith.constant 6.400000e+01 : f32
    %10 = vector.broadcast %cst_3 : f32 to vector<128x1xf32>
    %11 = arith.divf %9, %10 : vector<128x1xf32>
    %cst_4 = arith.constant 9.99999974E-6 : f32
    %12 = vector.broadcast %cst_4 : f32 to vector<128x1xf32>
    %13 = arith.addf %11, %12 : vector<128x1xf32>
    %14 = math.rsqrt %13 : vector<128x1xf32>
    %15 = vector.broadcast %14 : vector<128x1xf32> to vector<128x64xf32>
    %16 = arith.mulf %6, %15 : vector<128x64xf32>
    %c0_5 = arith.constant 0 : index
    %c0_6 = arith.constant 0 : index
    %17 = vector.load %arg3[%c0_5, %c0_6] : memref<1x64xf32, #tpu.memory_space<vmem>>, vector<1x64xf32>
    %18 = vector.broadcast %17 : vector<1x64xf32> to vector<128x64xf32>
    %19 = arith.mulf %16, %18 : vector<128x64xf32>
    %c0_7 = arith.constant 0 : index
    %c0_8 = arith.constant 0 : index
    %20 = vector.load %arg4[%c0_7, %c0_8] : memref<1x64xf32, #tpu.memory_space<vmem>>, vector<1x64xf32>
    %21 = vector.broadcast %20 : vector<1x64xf32> to vector<128x64xf32>
    %22 = arith.addf %19, %21 : vector<128x64xf32>
    %c0_9 = arith.constant 0 : index
    %c0_10 = arith.constant 0 : index
    %23 = vector.load %arg2[%c0_9, %c0_10] : memref<128x64xf32, #tpu.memory_space<vmem>>, vector<128x64xf32>
    %cst_11 = arith.constant 0.000000e+00 : f32
    %24 = vector.broadcast %cst_11 : f32 to vector<128x64xf32>
    %25 = arith.subf %24, %23 : vector<128x64xf32>
    %26 = math.exp %25 : vector<128x64xf32>
    %cst_12 = arith.constant 1.000000e+00 : f32
    %27 = vector.broadcast %cst_12 : f32 to vector<128x64xf32>
    %28 = arith.addf %27, %26 : vector<128x64xf32>
    %cst_13 = arith.constant 1.000000e+00 : f32
    %29 = vector.broadcast %cst_13 : f32 to vector<128x64xf32>
    %30 = arith.divf %29, %28 : vector<128x64xf32>
    %31 = arith.mulf %23, %30 : vector<128x64xf32>
    %32 = arith.mulf %22, %31 : vector<128x64xf32>
    %c0_14 = arith.constant 0 : index
    %c0_15 = arith.constant 0 : index
    %33 = vector.load %arg5[%c0_14, %c0_15] : memref<128x64xf32, #tpu.memory_space<vmem>>, vector<128x64xf32>
    tpu.vector_store %arg5[%c0_14, %c0_15], %32 {strides = array<i32>} : memref<128x64xf32, #tpu.memory_space<vmem>>, vector<128x64xf32>,
    return
  }
  func.func @transform_0(%arg0: i32) -> (i32, i32) {
    %c0_i32 = arith.constant 0 : i32
    %c0_i32_0 = arith.constant 0 : i32
    return %arg0, %c0_i32 : i32, i32
  }
  func.func @transform_1(%arg0: i32) -> (i32, i32) {
    %c0_i32 = arith.constant 0 : i32
    %c0_i32_0 = arith.constant 0 : i32
    return %arg0, %c0_i32 : i32, i32
  }
  func.func @transform_2(%arg0: i32) -> (i32, i32) {
    %c0_i32 = arith.constant 0 : i32
    %c0_i32_0 = arith.constant 0 : i32
    %c0_i32_1 = arith.constant 0 : i32
    return %c0_i32, %c0_i32_0 : i32, i32
  }
  func.func @transform_3(%arg0: i32) -> (i32, i32) {
    %c0_i32 = arith.constant 0 : i32
    %c0_i32_0 = arith.constant 0 : i32
    %c0_i32_1 = arith.constant 0 : i32
    return %c0_i32, %c0_i32_0 : i32, i32
  }
  func.func @transform_4(%arg0: i32) -> (i32, i32) {
    %c0_i32 = arith.constant 0 : i32
    %c0_i32_0 = arith.constant 0 : i32
    return %arg0, %c0_i32 : i32, i32
  }
}

module attributes {stable_mosaic.version = 11 : i64} {
  func.func @_selective_scan_kernel(%arg0: i32, %arg1: i32, %arg2: memref<1x1x64x4xf32, #tpu.memory_space<vmem>>, %arg3: memref<1x1x64x4xf32, #tpu.memory_space<vmem>>, %arg4: memref<1x16x4xf32, #tpu.memory_space<vmem>>, %arg5: memref<1x1x64x16xf32, #tpu.memory_space<vmem>>, %arg6: memref<1x1x64x16xf32, #tpu.memory_space<vmem>>, %arg7: memref<1x1x4xf32, #tpu.memory_space<vmem>>, %arg8: memref<1x1x4xf32, #tpu.memory_space<vmem>>, %arg9: memref<1x1x64x4xf32, #tpu.memory_space<vmem>>, %arg10: memref<64x4xf32, #tpu.memory_space<vmem>>, %arg11: memref<64x4xf32, #tpu.memory_space<vmem>>) attributes {dimension_semantics = [#tpu.dimension_semantics<parallel>, #tpu.dimension_semantics<parallel>], iteration_bounds = array<i64: 2, 2>, scalar_prefetch = 0 : i64, scratch_operands = 2 : i64, tpu.core_type = #tpu.core_type<tc>, window_params = [{transform_indices = @transform_0, window_bounds = array<i64: 1, 1, 64, 4>}, {transform_indices = @transform_1, window_bounds = array<i64: 1, 1, 64, 4>}, {transform_indices = @transform_2, window_bounds = array<i64: 1, 16, 4>}, {transform_indices = @transform_3, window_bounds = array<i64: 1, 1, 64, 16>}, {transform_indices = @transform_4, window_bounds = array<i64: 1, 1, 64, 16>}, {transform_indices = @transform_5, window_bounds = array<i64: 1, 1, 4>}, {transform_indices = @transform_6, window_bounds = array<i64: 1, 1, 4>}, {transform_indices = @transform_7, window_bounds = array<i64: 1, 1, 64, 4>}]} {
    %c0 = arith.constant 0 : index
    %c0_0 = arith.constant 0 : index
    %c0_1 = arith.constant 0 : index
    %c0_2 = arith.constant 0 : index
    %0 = vector.load %arg2[%c0, %c0_0, %c0_1, %c0_2] : memref<1x1x64x4xf32, #tpu.memory_space<vmem>>, vector<1x1x64x4xf32>
    %1 = vector.shape_cast %0 : vector<1x1x64x4xf32> to vector<64x4xf32>
    %c0_3 = arith.constant 0 : index
    %c0_4 = arith.constant 0 : index
    %c0_5 = arith.constant 0 : index
    %c0_6 = arith.constant 0 : index
    %2 = vector.load %arg3[%c0_3, %c0_4, %c0_5, %c0_6] : memref<1x1x64x4xf32, #tpu.memory_space<vmem>>, vector<1x1x64x4xf32>
    %3 = vector.shape_cast %2 : vector<1x1x64x4xf32> to vector<64x4xf32>
    %c0_7 = arith.constant 0 : index
    %c0_8 = arith.constant 0 : index
    %c0_9 = arith.constant 0 : index
    %4 = vector.load %arg8[%c0_7, %c0_8, %c0_9] : memref<1x1x4xf32, #tpu.memory_space<vmem>>, vector<1x1x4xf32>
    %5 = vector.shape_cast %4 : vector<1x1x4xf32> to vector<1x4xf32>
    %6 = vector.broadcast %5 : vector<1x4xf32> to vector<64x4xf32>
    %7 = arith.addf %3, %6 : vector<64x4xf32>
    %cst = arith.constant 2.000000e+01 : f32
    %8 = vector.broadcast %cst : f32 to vector<64x4xf32>
    %9 = arith.minimumf %7, %8 : vector<64x4xf32>
    %cst_10 = arith.constant 2.000000e+01 : f32
    %10 = vector.broadcast %cst_10 : f32 to vector<64x4xf32>
    %11 = arith.cmpf ogt, %7, %10 : vector<64x4xf32>
    %12 = math.exp %9 : vector<64x4xf32>
    %cst_11 = arith.constant 1.000000e+00 : f32
    %13 = vector.broadcast %cst_11 : f32 to vector<64x4xf32>
    %14 = arith.addf %13, %12 : vector<64x4xf32>
    %15 = math.log %14 : vector<64x4xf32>
    %16 = arith.select %11, %7, %15 : vector<64x4xi1>, vector<64x4xf32>
    %c0_12 = arith.constant 0 : index
    %c0_13 = arith.constant 0 : index
    %17 = vector.load %arg10[%c0_12, %c0_13] : memref<64x4xf32, #tpu.memory_space<vmem>>, vector<64x4xf32>
    tpu.vector_store %arg10[%c0_12, %c0_13], %16 {strides = array<i32>} : memref<64x4xf32, #tpu.memory_space<vmem>>, vector<64x4xf32>,
    %18 = arith.mulf %16, %1 : vector<64x4xf32>
    %c0_14 = arith.constant 0 : index
    %c0_15 = arith.constant 0 : index
    %19 = vector.load %arg11[%c0_14, %c0_15] : memref<64x4xf32, #tpu.memory_space<vmem>>, vector<64x4xf32>
    tpu.vector_store %arg11[%c0_14, %c0_15], %18 {strides = array<i32>} : memref<64x4xf32, #tpu.memory_space<vmem>>, vector<64x4xf32>,
    %c0_16 = arith.constant 0 : index
    %c0_17 = arith.constant 0 : index
    %c0_18 = arith.constant 0 : index
    %20 = vector.load %arg4[%c0_16, %c0_17, %c0_18] : memref<1x16x4xf32, #tpu.memory_space<vmem>>, vector<1x16x4xf32>
    %21 = vector.shape_cast %20 : vector<1x16x4xf32> to vector<16x4xf32>
    %22 = tpu.iota {dimensions = array<i32: 0>} : vector<16x16xi32>
    %23 = tpu.iota {dimensions = array<i32: 1>} : vector<16x16xi32>
    %24 = arith.cmpi eq, %22, %23 : vector<16x16xi32>
    %25 = arith.extui %24 : vector<16x16xi1> to vector<16x16xi32>
    %26 = arith.sitofp %25 : vector<16x16xi32> to vector<16x16xf32>
    %cst_19 = arith.constant 0.000000e+00 : f32
    %27 = vector.broadcast %cst_19 : f32 to vector<16x4xf32>
    %c0_i32 = arith.constant 0 : i32
    %c64_i32 = arith.constant 64 : i32
    %28 = arith.addi %c0_i32, %c64_i32 : i32
    %c1_i32 = arith.constant 1 : i32
    %29 = scf.for %arg12 = %c0_i32 to %28 step %c1_i32 iter_args(%arg13 = %27) -> (vector<16x4xf32>)  : i32 {
      %42 = arith.index_cast %arg12 : i32 to index
      %c0_36 = arith.constant 0 : index
      %43 = vector.load %arg10[%42, %c0_36] : memref<64x4xf32, #tpu.memory_space<vmem>>, vector<1x4xf32>
      %44 = arith.index_cast %arg12 : i32 to index
      %c0_37 = arith.constant 0 : index
      %45 = vector.load %arg11[%44, %c0_37] : memref<64x4xf32, #tpu.memory_space<vmem>>, vector<1x4xf32>
      %c0_38 = arith.constant 0 : index
      %c0_39 = arith.constant 0 : index
      %46 = arith.index_cast %arg12 : i32 to index
      %c0_40 = arith.constant 0 : index
      %47 = vector.load %arg5[%c0_38, %c0_39, %46, %c0_40] : memref<1x1x64x16xf32, #tpu.memory_space<vmem>>, vector<1x1x1x16xf32>
      %48 = vector.shape_cast %47 : vector<1x1x1x16xf32> to vector<1x16xf32>
      %c0_41 = arith.constant 0 : index
      %c0_42 = arith.constant 0 : index
      %49 = arith.index_cast %arg12 : i32 to index
      %c0_43 = arith.constant 0 : index
      %50 = vector.load %arg6[%c0_41, %c0_42, %49, %c0_43] : memref<1x1x64x16xf32, #tpu.memory_space<vmem>>, vector<1x1x1x16xf32>
      %51 = vector.shape_cast %50 : vector<1x1x1x16xf32> to vector<1x16xf32>
      %52 = vector.broadcast %43 : vector<1x4xf32> to vector<16x4xf32>
      %53 = arith.mulf %21, %52 : vector<16x4xf32>
      %54 = math.exp %53 : vector<16x4xf32>
      %55 = vector.broadcast %48 : vector<1x16xf32> to vector<16x16xf32>
      %56 = arith.mulf %55, %26 : vector<16x16xf32>
      %cst_44 = arith.constant dense<0.000000e+00> : vector<16xf32>
      %57 = vector.multi_reduction <add>, %56, %cst_44 [1] : vector<16x16xf32> to vector<16xf32>
      %58 = vector.shape_cast %57 : vector<16xf32> to vector<16x1xf32>
      %59 = arith.mulf %54, %arg13 : vector<16x4xf32>
      %60 = vector.broadcast %58 : vector<16x1xf32> to vector<16x4xf32>
      %61 = vector.broadcast %45 : vector<1x4xf32> to vector<16x4xf32>
      %62 = arith.mulf %60, %61 : vector<16x4xf32>
      %63 = arith.addf %59, %62 : vector<16x4xf32>
      %cst_45 = arith.constant dense<0.000000e+00> : vector<1x4xf32>
      %64 = tpu.matmul %51, %63, %cst_45 {dimension_numbers = #tpu.dot_dimension_numbers<[1], [0], [0], [1], [0, 0, 1, 1], [], []>, precision = #tpu.contract_precision<fp32>} : vector<1x16xf32>, vector<16x4xf32>, vector<1x4xf32> -> vector<1x4xf32>
      %c0_46 = arith.constant 0 : index
      %c0_47 = arith.constant 0 : index
      %65 = arith.index_cast %arg12 : i32 to index
      %c0_48 = arith.constant 0 : index
      %66 = vector.load %arg9[%c0_46, %c0_47, %65, %c0_48] : memref<1x1x64x4xf32, #tpu.memory_space<vmem>>, vector<1x1x1x4xf32>
      %67 = vector.shape_cast %66 : vector<1x1x1x4xf32> to vector<1x4xf32>
      %68 = vector.shape_cast %64 : vector<1x4xf32> to vector<1x1x1x4xf32>
      tpu.vector_store %arg9[%c0_46, %c0_47, %65, %c0_48], %68 {strides = array<i32>} : memref<1x1x64x4xf32, #tpu.memory_space<vmem>>, vector<1x1x1x4xf32>,
      scf.yield %63 : vector<16x4xf32>
    }
    %c64_i32_20 = arith.constant 64 : i32
    %c0_21 = arith.constant 0 : index
    %c0_22 = arith.constant 0 : index
    %c0_23 = arith.constant 0 : index
    %c0_24 = arith.constant 0 : index
    %30 = vector.load %arg9[%c0_21, %c0_22, %c0_23, %c0_24] : memref<1x1x64x4xf32, #tpu.memory_space<vmem>>, vector<1x1x64x4xf32>
    %31 = vector.shape_cast %30 : vector<1x1x64x4xf32> to vector<64x4xf32>
    %c0_25 = arith.constant 0 : index
    %c0_26 = arith.constant 0 : index
    %c0_27 = arith.constant 0 : index
    %c0_28 = arith.constant 0 : index
    %32 = vector.load %arg2[%c0_25, %c0_26, %c0_27, %c0_28] : memref<1x1x64x4xf32, #tpu.memory_space<vmem>>, vector<1x1x64x4xf32>
    %33 = vector.shape_cast %32 : vector<1x1x64x4xf32> to vector<64x4xf32>
    %c0_29 = arith.constant 0 : index
    %c0_30 = arith.constant 0 : index
    %c0_31 = arith.constant 0 : index
    %34 = vector.load %arg7[%c0_29, %c0_30, %c0_31] : memref<1x1x4xf32, #tpu.memory_space<vmem>>, vector<1x1x4xf32>
    %35 = vector.shape_cast %34 : vector<1x1x4xf32> to vector<1x4xf32>
    %36 = vector.broadcast %35 : vector<1x4xf32> to vector<64x4xf32>
    %37 = arith.mulf %33, %36 : vector<64x4xf32>
    %38 = arith.addf %31, %37 : vector<64x4xf32>
    %c0_32 = arith.constant 0 : index
    %c0_33 = arith.constant 0 : index
    %c0_34 = arith.constant 0 : index
    %c0_35 = arith.constant 0 : index
    %39 = vector.load %arg9[%c0_32, %c0_33, %c0_34, %c0_35] : memref<1x1x64x4xf32, #tpu.memory_space<vmem>>, vector<1x1x64x4xf32>
    %40 = vector.shape_cast %39 : vector<1x1x64x4xf32> to vector<64x4xf32>
    %41 = vector.shape_cast %38 : vector<64x4xf32> to vector<1x1x64x4xf32>
    tpu.vector_store %arg9[%c0_32, %c0_33, %c0_34, %c0_35], %41 {strides = array<i32>} : memref<1x1x64x4xf32, #tpu.memory_space<vmem>>, vector<1x1x64x4xf32>,
    return
  }
  func.func @transform_0(%arg0: i32, %arg1: i32) -> (i32, i32, i32, i32) {
    %c0_i32 = arith.constant 0 : i32
    %c0_i32_0 = arith.constant 0 : i32
    %c0_i32_1 = arith.constant 0 : i32
    return %arg0, %arg1, %c0_i32, %c0_i32_0 : i32, i32, i32, i32
  }
  func.func @transform_1(%arg0: i32, %arg1: i32) -> (i32, i32, i32, i32) {
    %c0_i32 = arith.constant 0 : i32
    %c0_i32_0 = arith.constant 0 : i32
    %c0_i32_1 = arith.constant 0 : i32
    return %arg0, %arg1, %c0_i32, %c0_i32_0 : i32, i32, i32, i32
  }
  func.func @transform_2(%arg0: i32, %arg1: i32) -> (i32, i32, i32) {
    %c0_i32 = arith.constant 0 : i32
    %c0_i32_0 = arith.constant 0 : i32
    %c0_i32_1 = arith.constant 0 : i32
    return %arg1, %c0_i32, %c0_i32_0 : i32, i32, i32
  }
  func.func @transform_3(%arg0: i32, %arg1: i32) -> (i32, i32, i32, i32) {
    %c0_i32 = arith.constant 0 : i32
    %c0_i32_0 = arith.constant 0 : i32
    %c0_i32_1 = arith.constant 0 : i32
    return %arg0, %arg1, %c0_i32, %c0_i32_0 : i32, i32, i32, i32
  }
  func.func @transform_4(%arg0: i32, %arg1: i32) -> (i32, i32, i32, i32) {
    %c0_i32 = arith.constant 0 : i32
    %c0_i32_0 = arith.constant 0 : i32
    %c0_i32_1 = arith.constant 0 : i32
    return %arg0, %arg1, %c0_i32, %c0_i32_0 : i32, i32, i32, i32
  }
  func.func @transform_5(%arg0: i32, %arg1: i32) -> (i32, i32, i32) {
    %c0_i32 = arith.constant 0 : i32
    %c0_i32_0 = arith.constant 0 : i32
    %c0_i32_1 = arith.constant 0 : i32
    return %arg1, %c0_i32, %c0_i32_0 : i32, i32, i32
  }
  func.func @transform_6(%arg0: i32, %arg1: i32) -> (i32, i32, i32) {
    %c0_i32 = arith.constant 0 : i32
    %c0_i32_0 = arith.constant 0 : i32
    %c0_i32_1 = arith.constant 0 : i32
    return %arg1, %c0_i32, %c0_i32_0 : i32, i32, i32
  }
  func.func @transform_7(%arg0: i32, %arg1: i32) -> (i32, i32, i32, i32) {
    %c0_i32 = arith.constant 0 : i32
    %c0_i32_0 = arith.constant 0 : i32
    %c0_i32_1 = arith.constant 0 : i32
    return %arg0, %arg1, %c0_i32, %c0_i32_0 : i32, i32, i32, i32
  }
}

module attributes {stable_mosaic.version = 11 : i64} {
  func.func @_matmul_bias_kernel(%arg0: i32, %arg1: memref<128x64xf32, #tpu.memory_space<vmem>>, %arg2: memref<64x32xf32, #tpu.memory_space<vmem>>, %arg3: memref<1x32xf32, #tpu.memory_space<vmem>>, %arg4: memref<128x32xf32, #tpu.memory_space<vmem>>) attributes {dimension_semantics = [#tpu.dimension_semantics<parallel>], iteration_bounds = array<i64: 1>, scalar_prefetch = 0 : i64, scratch_operands = 0 : i64, tpu.core_type = #tpu.core_type<tc>, window_params = [{transform_indices = @transform_0, window_bounds = array<i64: 128, 64>}, {pipeline_mode = #tpu.pipeline_mode<synchronous>, transform_indices = @transform_1, window_bounds = array<i64: 64, 32>}, {pipeline_mode = #tpu.pipeline_mode<synchronous>, transform_indices = @transform_2, window_bounds = array<i64: 1, 32>}, {transform_indices = @transform_3, window_bounds = array<i64: 128, 32>}]} {
    %c0 = arith.constant 0 : index
    %c0_0 = arith.constant 0 : index
    %0 = vector.load %arg1[%c0, %c0_0] : memref<128x64xf32, #tpu.memory_space<vmem>>, vector<128x64xf32>
    %c0_1 = arith.constant 0 : index
    %c0_2 = arith.constant 0 : index
    %1 = vector.load %arg2[%c0_1, %c0_2] : memref<64x32xf32, #tpu.memory_space<vmem>>, vector<64x32xf32>
    %cst = arith.constant dense<0.000000e+00> : vector<128x32xf32>
    %2 = tpu.matmul %0, %1, %cst {dimension_numbers = #tpu.dot_dimension_numbers<[1], [0], [0], [1], [0, 0, 1, 1], [], []>, precision = #tpu.contract_precision<fp32>} : vector<128x64xf32>, vector<64x32xf32>, vector<128x32xf32> -> vector<128x32xf32>
    %c0_3 = arith.constant 0 : index
    %c0_4 = arith.constant 0 : index
    %3 = vector.load %arg3[%c0_3, %c0_4] : memref<1x32xf32, #tpu.memory_space<vmem>>, vector<1x32xf32>
    %4 = vector.broadcast %3 : vector<1x32xf32> to vector<128x32xf32>
    %5 = arith.addf %2, %4 : vector<128x32xf32>
    %c0_5 = arith.constant 0 : index
    %c0_6 = arith.constant 0 : index
    %6 = vector.load %arg4[%c0_5, %c0_6] : memref<128x32xf32, #tpu.memory_space<vmem>>, vector<128x32xf32>
    tpu.vector_store %arg4[%c0_5, %c0_6], %5 {strides = array<i32>} : memref<128x32xf32, #tpu.memory_space<vmem>>, vector<128x32xf32>,
    return
  }
  func.func @transform_0(%arg0: i32) -> (i32, i32) {
    %c0_i32 = arith.constant 0 : i32
    %c0_i32_0 = arith.constant 0 : i32
    return %arg0, %c0_i32 : i32, i32
  }
  func.func @transform_1(%arg0: i32) -> (i32, i32) {
    %c0_i32 = arith.constant 0 : i32
    %c0_i32_0 = arith.constant 0 : i32
    %c0_i32_1 = arith.constant 0 : i32
    return %c0_i32, %c0_i32_0 : i32, i32
  }
  func.func @transform_2(%arg0: i32) -> (i32, i32) {
    %c0_i32 = arith.constant 0 : i32
    %c0_i32_0 = arith.constant 0 : i32
    %c0_i32_1 = arith.constant 0 : i32
    return %c0_i32, %c0_i32_0 : i32, i32
  }
  func.func @transform_3(%arg0: i32) -> (i32, i32) {
    %c0_i32 = arith.constant 0 : i32
    %c0_i32_0 = arith.constant 0 : i32
    return %arg0, %c0_i32 : i32, i32
  }
}

module attributes {stable_mosaic.version = 11 : i64} {
  func.func @_ln_kernel(%arg0: i32, %arg1: memref<2x64xf32, #tpu.memory_space<vmem>>, %arg2: memref<1x64xf32, #tpu.memory_space<vmem>>, %arg3: memref<1x64xf32, #tpu.memory_space<vmem>>, %arg4: memref<2x64xf32, #tpu.memory_space<vmem>>) attributes {dimension_semantics = [#tpu.dimension_semantics<parallel>], iteration_bounds = array<i64: 1>, scalar_prefetch = 0 : i64, scratch_operands = 0 : i64, tpu.core_type = #tpu.core_type<tc>, window_params = [{transform_indices = @transform_0, window_bounds = array<i64: 2, 64>}, {pipeline_mode = #tpu.pipeline_mode<synchronous>, transform_indices = @transform_1, window_bounds = array<i64: 1, 64>}, {pipeline_mode = #tpu.pipeline_mode<synchronous>, transform_indices = @transform_2, window_bounds = array<i64: 1, 64>}, {transform_indices = @transform_3, window_bounds = array<i64: 2, 64>}]} {
    %c0 = arith.constant 0 : index
    %c0_0 = arith.constant 0 : index
    %0 = vector.load %arg1[%c0, %c0_0] : memref<2x64xf32, #tpu.memory_space<vmem>>, vector<2x64xf32>
    %cst = arith.constant dense<0.000000e+00> : vector<2xf32>
    %1 = vector.multi_reduction <add>, %0, %cst [1] : vector<2x64xf32> to vector<2xf32>
    %2 = vector.shape_cast %1 : vector<2xf32> to vector<2x1xf32>
    %cst_1 = arith.constant 6.400000e+01 : f32
    %3 = vector.broadcast %cst_1 : f32 to vector<2x1xf32>
    %4 = arith.divf %2, %3 : vector<2x1xf32>
    %5 = vector.broadcast %4 : vector<2x1xf32> to vector<2x64xf32>
    %6 = arith.subf %0, %5 : vector<2x64xf32>
    %7 = arith.mulf %6, %6 : vector<2x64xf32>
    %cst_2 = arith.constant dense<0.000000e+00> : vector<2xf32>
    %8 = vector.multi_reduction <add>, %7, %cst_2 [1] : vector<2x64xf32> to vector<2xf32>
    %9 = vector.shape_cast %8 : vector<2xf32> to vector<2x1xf32>
    %cst_3 = arith.constant 6.400000e+01 : f32
    %10 = vector.broadcast %cst_3 : f32 to vector<2x1xf32>
    %11 = arith.divf %9, %10 : vector<2x1xf32>
    %cst_4 = arith.constant 9.99999974E-6 : f32
    %12 = vector.broadcast %cst_4 : f32 to vector<2x1xf32>
    %13 = arith.addf %11, %12 : vector<2x1xf32>
    %14 = math.rsqrt %13 : vector<2x1xf32>
    %15 = vector.broadcast %14 : vector<2x1xf32> to vector<2x64xf32>
    %16 = arith.mulf %6, %15 : vector<2x64xf32>
    %c0_5 = arith.constant 0 : index
    %c0_6 = arith.constant 0 : index
    %17 = vector.load %arg2[%c0_5, %c0_6] : memref<1x64xf32, #tpu.memory_space<vmem>>, vector<1x64xf32>
    %18 = vector.broadcast %17 : vector<1x64xf32> to vector<2x64xf32>
    %19 = arith.mulf %16, %18 : vector<2x64xf32>
    %c0_7 = arith.constant 0 : index
    %c0_8 = arith.constant 0 : index
    %20 = vector.load %arg3[%c0_7, %c0_8] : memref<1x64xf32, #tpu.memory_space<vmem>>, vector<1x64xf32>
    %21 = vector.broadcast %20 : vector<1x64xf32> to vector<2x64xf32>
    %22 = arith.addf %19, %21 : vector<2x64xf32>
    %c0_9 = arith.constant 0 : index
    %c0_10 = arith.constant 0 : index
    %23 = vector.load %arg4[%c0_9, %c0_10] : memref<2x64xf32, #tpu.memory_space<vmem>>, vector<2x64xf32>
    tpu.vector_store %arg4[%c0_9, %c0_10], %22 {strides = array<i32>} : memref<2x64xf32, #tpu.memory_space<vmem>>, vector<2x64xf32>,
    return
  }
  func.func @transform_0(%arg0: i32) -> (i32, i32) {
    %c0_i32 = arith.constant 0 : i32
    %c0_i32_0 = arith.constant 0 : i32
    return %arg0, %c0_i32 : i32, i32
  }
  func.func @transform_1(%arg0: i32) -> (i32, i32) {
    %c0_i32 = arith.constant 0 : i32
    %c0_i32_0 = arith.constant 0 : i32
    %c0_i32_1 = arith.constant 0 : i32
    return %c0_i32, %c0_i32_0 : i32, i32
  }
  func.func @transform_2(%arg0: i32) -> (i32, i32) {
    %c0_i32 = arith.constant 0 : i32
    %c0_i32_0 = arith.constant 0 : i32
    %c0_i32_1 = arith.constant 0 : i32
    return %c0_i32, %c0_i32_0 : i32, i32
  }
  func.func @transform_3(%arg0: i32) -> (i32, i32) {
    %c0_i32 = arith.constant 0 : i32
    %c0_i32_0 = arith.constant 0 : i32
    return %arg0, %c0_i32 : i32, i32
  }
}

</mosaic_0001>

<bundles_post_ra>
// kernel: ss2d_forward.7
= control target key start
LH: loop header
LB: loop body
LE: loop exit
PB: predicated region body
PF: predicated region fallthrough
CT: control target
= control target key end

     0   :  { %8 = vsyncpa [#allocation3], 0  ;;  %s1296_s0 = inlined_call_operand.hbm [shape: f32[128,32], index: 0, kind: input, shape index: {}]   ;;  %s1297_s1 = inlined_call_operand.hbm [shape: f32[32,128], index: 1, kind: input, shape index: {}]   ;;  %s1298_s2 = inlined_call_operand.vmem [shape: f32[1,128], index: 2, kind: input, shape index: {}]   ;;  %s1299_s3 = inlined_call_operand.vmem [shape: f32[128,128], index: 3, kind: output, shape index: {}]  }
   0x1   :  { %s14_s14 = sshll.u32 %s1296_s0, 4  ;;  %s15_s14 = int_to_ptr.hbm [resolvable:$true] %s14_s14 }
   0x2   :  { %9 = vsyncpa [#allocation5], 0  ;;  %s856_s15 = smov [#allocation2]   ;;  %s27_s19 = sshll.u32 %s1297_s1, 4  ;;  %s28_s19 = int_to_ptr.hbm [resolvable:$true] %s27_s19 }
   0x3   :  { %s16_s16 = sshll.u32 %s856_s15, 4  ;;  %s857_s20 = smov 128   ;;  %s17_s16 = int_to_ptr.vmem [resolvable:$true] %s16_s16 }
   0x4   :  { %s858_s21 = smov 8   ;;  %s859_s22 = smov [#allocation4]  }
   0x5   :  { %22 = dma.hbm_to_vmem [thread:$0]  %s15_s14, 2048, %s17_s16, [#allocation3], %s857_s20, %s857_s20, %s858_s21  }
   0x6   :  { %s29_s23 = sshll.u32 %s859_s22, 4  ;;  %s30_s23 = int_to_ptr.vmem [resolvable:$true] %s29_s23 }
   0x7   :  { %35 = dma.hbm_to_vmem [thread:$0]  %s28_s19, 512, %s30_s23, [#allocation5], %s857_s20, %s857_s20, %s858_s21  }
   0x8   :  { %852 = dma.done.wait [#allocation3], 2048  }
   0x9   :  { %853 = vsyncadd [#allocation3], 4294965248 }
   0xa   :  { %854 = dma.done.wait [#allocation5], 512  }
   0xb   :  { %855 = vsyncadd [#allocation5], 4294966784  ;;  %vm70_vm0 = vcmask 261120   ;;  %v65_v0 = vld [vmem:[#allocation4 + $0x18] sm:$0xff]  ;;  %v64_v1 = vld [vmem:[#allocation4 + $0x10] sm:$0xff] }
   0xc   :  { %v63_v2 = vld [vmem:[#allocation4 + $0x8] sm:$0xff]  ;;  %v886_v3 = vand.u32 4294901760, %v65_v0  ;;  %v888_v4 = vand.u32 4294901760, %v64_v1  ;;  %v62_v6 = vld [vmem:[#allocation4] sm:$0xff]  ;;  %v56_v13 = vld [vmem:[#allocation2 + $0x50] sm:$0xff] }
   0xd   :  { %v890_v5 = vand.u32 4294901760, %v63_v2  ;;  %v54_v7 = vld [vmem:[#allocation2 + $0x40] sm:$0xff]  ;;  %v55_v8 = vld [vmem:[#allocation2 + $0x48] sm:$0xff]  ;;  %v892_v9 = vand.u32 4294901760, %v62_v6  ;;  %v102_v21 = vsel %vm70_vm0, %v56_v13, 0  ;;  %v48_v37 = vld [vmem:[#allocation2 + $0x10] sm:$0xff] }
   0xe   :  { %v96_v10 = vsel %vm70_vm0, %v54_v7, 0  ;;  %v99_v11 = vsel %vm70_vm0, %v55_v8, 0  ;;  %v46_v12 = vld [vmem:[#allocation2] sm:$0xff]  ;;  %791 = vmatpush.msra.mxu2 %v886_v3  ;;  %v281_v14 = vsub.f32 %v65_v0, %v886_v3  ;;  %v287_v16 = vsub.f32 %v64_v1, %v888_v4  ;;  %132 = vmatpush.msra.mxu0 %v886_v3  ;;  %v47_v36 = vld [vmem:[#allocation2 + $0x8] sm:$0xff]  ;;  %v57_v46 = vld [vmem:[#allocation2 + $0x58] sm:$0xff] }
   0xf   :  { %v898_v15 = vand.u32 4294901760, %v96_v10  ;;  %v293_v17 = vsub.f32 %v63_v2, %v890_v5  ;;  %v904_v18 = vsub.f32 %v62_v6, %v892_v9  ;;  %v906_v19 = vand.u32 4294901760, %v99_v11  ;;  %v49_v57 = vld [vmem:[#allocation2 + $0x18] sm:$0xff]  ;;  %v58_v1 = vld [vmem:[#allocation2 + $0x60] sm:$0xff] }
  0x10   :  { %v72_v20 = vsel %vm70_vm0, %v46_v12, 0  ;;  %792 = vmatpush.msra.mxu2 %v888_v4  ;;  %v282_v22 = vand.u32 4294901760, %v281_v14  ;;  %v288_v24 = vand.u32 4294901760, %v287_v16  ;;  %134 = vmatpush.msra.mxu0 %v888_v4  ;;  %v930_v35 = vand.u32 4294901760, %v102_v21 }
  0x11   :  { %v912_v23 = vsub.f32 %v96_v10, %v898_v15  ;;  %v294_v25 = vand.u32 4294901760, %v293_v17  ;;  %v300_v26 = vand.u32 4294901760, %v904_v18  ;;  %v917_v27 = vsub.f32 %v99_v11, %v906_v19  ;;  %v50_v11 = vld [vmem:[#allocation2 + $0x20] sm:$0xff] }
  0x12   :  { %v919_v28 = vand.u32 4294901760, %v72_v20  ;;  %793 = vmatpush.msra.mxu2 %v890_v5  ;;  %v283_v29 = vsub.f32 %v281_v14, %v282_v22  ;;  %v289_v31 = vsub.f32 %v287_v16, %v288_v24  ;;  %136 = vmatpush.msra.mxu0 %v890_v5  ;;  %v75_v45 = vsel %vm70_vm0, %v47_v36, 0 }
  0x13   :  { %v205_v30 = vand.u32 4294901760, %v912_v23  ;;  %v295_v32 = vsub.f32 %v293_v17, %v294_v25  ;;  %v301_v33 = vsub.f32 %v904_v18, %v300_v26  ;;  %v213_v41 = vand.u32 4294901760, %v917_v27 }
  0x14   :  { %v928_v34 = vsub.f32 %v72_v20, %v919_v28  ;;  %794 = vmatpush.msra.mxu2 %v892_v9  ;;  %v284_v38 = vand.u32 4294901760, %v283_v29  ;;  %v290_v40 = vand.u32 4294901760, %v289_v31  ;;  %138 = vmatpush.msra.mxu0 %v892_v9  ;;  %v78_v47 = vsel %vm70_vm0, %v48_v37, 0  ;;  %v60_v37 = vld [vmem:[#allocation2 + $0x70] sm:$0xff] }
  0x15   :  { %v206_v39 = vsub.f32 %v912_v23, %v205_v30  ;;  %v296_v44 = vand.u32 4294901760, %v295_v32  ;;  %v944_v49 = vand.u32 4294901760, %v75_v45  ;;  %v302_v50 = vand.u32 4294901760, %v301_v33 }
  0x16   :  { %383 = vmatpush.msrb.mxu2 %v281_v14  ;;  %v141_v42 = vand.u32 4294901760, %v928_v34  ;;  %606 = vmatpush.msrb.mxu0 %v282_v22  ;;  %v214_v51 = vsub.f32 %v917_v27, %v213_v41  ;;  %v950_v52 = vsub.f32 %v102_v21, %v930_v35  ;;  %v952_v53 = vand.u32 4294901760, %v78_v47 }
  0x17   :  { %795 = vmatpush.msra.mxu3 %v284_v38  ;;  %v207_v43 = vand.u32 4294901760, %v206_v39  ;;  %285 = vmatpush.msra.mxu1 %v284_v38  ;;  %v955_v55 = vsub.f32 %v75_v45, %v944_v49  ;;  %v105_v56 = vsel %vm70_vm0, %v57_v46, 0  ;;  %v81_v63 = vsel %vm70_vm0, %v49_v57, 0  ;;  %v52_v46 = vld [vmem:[#allocation2 + $0x30] sm:$0xff]  ;;  %v61_v57 = vld [vmem:[#allocation2 + $0x78] sm:$0xff] }
  0x18   :  { %v142_v48 = vsub.f32 %v928_v34, %v141_v42  ;;  %386 = vmatpush.msrb.mxu2 %v287_v16  ;;  %610 = vmatpush.msrb.mxu0 %v288_v24  ;;  %v960_v59 = vsub.f32 %v78_v47, %v952_v53  ;;  %v215_v60 = vand.u32 4294901760, %v214_v51  ;;  %v221_v61 = vand.u32 4294901760, %v950_v52 }
  0x19   :  { %208 = vmatmul.f32.vlgmr.msra.gmra.mxu2 %v207_v43  ;;  %796 = vmatpush.msra.mxu3 %v290_v40  ;;  %v149_v58 = vand.u32 4294901760, %v955_v55  ;;  %v963_v62 = vand.u32 4294901760, %v105_v56  ;;  %v975_v7 = vand.u32 4294901760, %v81_v63  ;;  %v114_v45 = vsel %vm70_vm0, %v60_v37, 0 }
  0x1a   :  { %291 = vmatpush.msra.mxu1 %v290_v40  ;;  %v143_v54 = vand.u32 4294901760, %v142_v48  ;;  %389 = vmatpush.msrb.mxu2 %v293_v17  ;;  %v157_v6 = vand.u32 4294901760, %v960_v59  ;;  %v222_v8 = vsub.f32 %v950_v52, %v221_v61 }
  0x1b   :  { %797 = vmatpush.msra.mxu3 %v296_v44  ;;  %614 = vmatpush.msrb.mxu0 %v294_v25  ;;  %v150_v0 = vsub.f32 %v955_v55, %v149_v58  ;;  %v984_v10 = vsub.f32 %v105_v56, %v963_v62  ;;  %v993_v13 = vsub.f32 %v81_v63, %v975_v7  ;;  %v90_v56 = vsel %vm70_vm0, %v52_v46, 0 }
  0x1c   :  { %297 = vmatpush.msra.mxu1 %v296_v44  ;;  %144 = vmatmul.f32.vlgmr.msra.gmra.mxu0 %v143_v54  ;;  %v158_v12 = vsub.f32 %v960_v59, %v157_v6  ;;  %v223_v14 = vand.u32 4294901760, %v222_v8  ;;  %v1043_v54 = vand.u32 4294901760, %v114_v45  ;;  %v117_v8 = vsel %vm70_vm0, %v61_v57, 0 }
  0x1d   :  { %798 = vmatpush.msra.mxu3 %v302_v50  ;;  %392 = vmatpush.msrb.mxu2 %v904_v18  ;;  %v151_v2 = vand.u32 4294901760, %v150_v0  ;;  %v229_v16 = vand.u32 4294901760, %v984_v10  ;;  %v59_v18 = vld [vmem:[#allocation2 + $0x68] sm:$0xff]  ;;  %v165_v21 = vand.u32 4294901760, %v993_v13  ;;  %v1049_v0 = vand.u32 4294901760, %v90_v56 }
  0x1e   :  { %337 = vmatmul.f32.vlgmr.msra.gmra.mxu3 %v898_v15  ;;  %303 = vmatpush.msra.mxu1 %v302_v50  ;;  %v159_v20 = vand.u32 4294901760, %v158_v12  ;;  %v111_v25 = vsel %vm70_vm0, %v59_v18, 0  ;;  %v1063_v18 = vand.u32 4294901760, %v117_v8 }
  0x1f   :  { %487 = vmatpush.msrb.mxu3 %v886_v3  ;;  %305 = vmatmul.f32.vlgmr.msra.gmra.mxu1 %v919_v28  ;;  %v230_v22 = vsub.f32 %v984_v10, %v229_v16  ;;  %v1021_v33 = vand.u32 4294901760, %v111_v25  ;;  %v188_v12 = vsub.f32 %v90_v56, %v1049_v0 }
  0x20   :  { %697 = vmatpush.msrb.mxu1 %v886_v3  ;;  %618 = vmatpush.msrb.mxu0 %v300_v26  ;;  %v108_v3 = vsel %vm70_vm0, %v58_v1, 0  ;;  %v51_v26 = vld [vmem:[#allocation2 + $0x28] sm:$0xff] }
  0x21   :  { %216 = vmatmul.f32.gmra.mxu2 %v215_v60  ;;  %489 = vmatpush.msrb.mxu3 %v888_v4  ;;  %v997_v17 = vand.u32 4294901760, %v108_v3  ;;  %v231_v31 = vand.u32 4294901760, %v230_v22  ;;  %v87_v36 = vsel %vm70_vm0, %v51_v26, 0  ;;  %v1033_v44 = vsub.f32 %v111_v25, %v1021_v33 }
  0x22   :  { %699 = vmatpush.msrb.mxu1 %v888_v4  ;;  %v84_v4 = vsel %vm70_vm0, %v50_v11, 0  ;;  %v1027_v40 = vand.u32 4294901760, %v87_v36  ;;  %v189_v25 = vand.u32 4294901760, %v188_v12 }
  0x23   :  { %491 = vmatpush.msrb.mxu3 %v890_v5  ;;  %v1011_v24 = vsub.f32 %v108_v3, %v997_v17  ;;  %v245_v51 = vand.u32 4294901760, %v1033_v44  ;;  %v53_v3 = vld [vmem:[#allocation2 + $0x38] sm:$0xff] }
  0x24   :  { %152 = vmatmul.f32.gmra.mxu0 %v151_v2  ;;  %701 = vmatpush.msrb.mxu1 %v890_v5  ;;  %v1005_v5 = vand.u32 4294901760, %v84_v4  ;;  %v1040_v48 = vsub.f32 %v87_v36, %v1027_v40  ;;  %v1055_v2 = vsub.f32 %v114_v45, %v1043_v54  ;;  %v190_v36 = vsub.f32 %v188_v12, %v189_v25 }
  0x25   :  { %493 = vmatpush.msrb.mxu3 %v892_v9  ;;  %v237_v32 = vand.u32 4294901760, %v1011_v24  ;;  %v246_v1 = vsub.f32 %v1033_v44, %v245_v51 }
  0x26   :  { %341 = vmatmul.f32.gmra.mxu3 %v906_v19  ;;  %703 = vmatpush.msrb.mxu1 %v892_v9  ;;  %v166_v9 = vsub.f32 %v993_v13, %v165_v21  ;;  %v1018_v29 = vsub.f32 %v84_v4, %v1005_v5  ;;  %v181_v63 = vand.u32 4294901760, %v1040_v48  ;;  %v253_v4 = vand.u32 4294901760, %v1055_v2 }
  0x27   :  { %309 = vmatmul.f32.gmra.mxu1 %v944_v49  ;;  %v238_v43 = vsub.f32 %v1011_v24, %v237_v32  ;;  %v191_v45 = vand.u32 4294901760, %v190_v36 }
  0x28   :  { %v167_v38 = vand.u32 4294901760, %v166_v9  ;;  %v173_v39 = vand.u32 4294901760, %v1018_v29  ;;  %v182_v11 = vsub.f32 %v1040_v48, %v181_v63  ;;  %v254_v9 = vsub.f32 %v1055_v2, %v253_v4 }
  0x29   :  { %224 = vmatmul.f32.gmra.mxu2 %v223_v14  ;;  %v239_v50 = vand.u32 4294901760, %v238_v43  ;;  %v247_v14 = vand.u32 4294901760, %v246_v1 }
  0x2a   :  { %v174_v47 = vsub.f32 %v1018_v29, %v173_v39  ;;  %v183_v22 = vand.u32 4294901760, %v182_v11 }
  0x2c   :  { %160 = vmatmul.f32.gmra.mxu0 %v159_v20  ;;  %v175_v60 = vand.u32 4294901760, %v174_v47  ;;  %v93_v20 = vsel %vm70_vm0, %v53_v3, 0 }
  0x2d   :  { %v195_v26 = vand.u32 4294901760, %v93_v20 }
  0x2e   :  { %345 = vmatmul.f32.gmra.mxu3 %v930_v35 }
  0x2f   :  { %313 = vmatmul.f32.gmra.mxu1 %v952_v53  ;;  %v196_v37 = vsub.f32 %v93_v20, %v195_v26 }
  0x31   :  { %232 = vmatmul.f32.gmra.mxu2 %v231_v31  ;;  %v1072_v31 = vsub.f32 %v117_v8, %v1063_v18  ;;  %v197_v46 = vand.u32 4294901760, %v196_v37 }
  0x33   :  { %v261_v43 = vand.u32 4294901760, %v1072_v31 }
  0x34   :  { %168 = vmatmul.f32.gmra.mxu0 %v167_v38  ;;  %v255_v38 = vand.u32 4294901760, %v254_v9 }
  0x35   :  { %v262_v47 = vsub.f32 %v1072_v31, %v261_v43 }
  0x36   :  { %349 = vmatmul.f32.gmra.mxu3 %v963_v62 }
  0x37   :  { %317 = vmatmul.f32.gmra.mxu1 %v975_v7  ;;  %v263_v56 = vand.u32 4294901760, %v262_v47 }
  0x39   :  { %240 = vmatmul.f32.gmra.mxu2 %v239_v50  ;;  %v198_v50 = vsub.f32 %v196_v37, %v197_v46 }
  0x3b   :  { %v199_v57 = vand.u32 4294901760, %v198_v50 }
  0x3c   :  { %176 = vmatmul.f32.gmra.mxu0 %v175_v60 }
  0x3e   :  { %353 = vmatmul.f32.gmra.mxu3 %v997_v17 }
  0x3f   :  { %321 = vmatmul.f32.gmra.mxu1 %v1005_v5 }
  0x41   :  { %248 = vmatmul.f32.gmra.mxu2 %v247_v14 }
  0x44   :  { %184 = vmatmul.f32.gmra.mxu0 %v183_v22 }
  0x46   :  { %357 = vmatmul.f32.gmra.mxu3 %v1021_v33 }
  0x47   :  { %325 = vmatmul.f32.gmra.mxu1 %v1027_v40 }
  0x49   :  { %256 = vmatmul.f32.gmra.mxu2 %v255_v38 }
  0x4c   :  { %192 = vmatmul.f32.gmra.mxu0 %v191_v45 }
  0x4e   :  { %361 = vmatmul.f32.gmra.mxu3 %v1043_v54 }
  0x4f   :  { %329 = vmatmul.f32.gmra.mxu1 %v1049_v0 }
  0x51   :  { %264 = vmatmul.f32.gmra.mxu2 %v263_v56 }
  0x54   :  { %200 = vmatmul.f32.gmra.mxu0 %v199_v57 }
  0x56   :  { %365 = vmatmul.f32.gmra.mxu3 %v1063_v18 }
  0x57   :  { %333 = vmatmul.f32.gmra.mxu1 %v195_v26 }
  0x59   :  { %395 = vmatmul.f32.vlgmr.msrb.gmra.mxu2 %v928_v34 }
  0x5c   :  { %620 = vmatmul.f32.vlgmr.msrb.gmra.mxu0 %v919_v28 }
  0x5e   :  { %497 = vmatmul.f32.vlgmr.msrb.gmra.mxu3 %v141_v42 }
  0x5f   :  { %705 = vmatmul.f32.vlgmr.msrb.gmra.mxu1 %v919_v28  ;;  %v1119_v28 = vld [vmem:[%s1298_s2] ss:$0 sm:$0xff] }
  0x61   :  { %400 = vmatmul.f32.gmra.mxu2 %v955_v55 }
  0x64   :  { %624 = vmatmul.f32.gmra.mxu0 %v944_v49 }
  0x66   :  { %503 = vmatmul.f32.gmra.mxu3 %v149_v58 }
  0x67   :  { %709 = vmatmul.f32.gmra.mxu1 %v944_v49 }
  0x69   :  { %405 = vmatmul.f32.gmra.mxu2 %v960_v59 }
  0x6c   :  { %628 = vmatmul.f32.gmra.mxu0 %v952_v53 }
  0x6e   :  { %509 = vmatmul.f32.gmra.mxu3 %v157_v6 }
  0x6f   :  { %713 = vmatmul.f32.gmra.mxu1 %v952_v53 }
  0x71   :  { %410 = vmatmul.f32.gmra.mxu2 %v993_v13 }
  0x74   :  { %632 = vmatmul.f32.gmra.mxu0 %v975_v7 }
  0x76   :  { %515 = vmatmul.f32.gmra.mxu3 %v165_v21 }
  0x77   :  { %717 = vmatmul.f32.gmra.mxu1 %v975_v7 }
  0x79   :  { %415 = vmatmul.f32.gmra.mxu2 %v1018_v29 }
  0x7c   :  { %636 = vmatmul.f32.gmra.mxu0 %v1005_v5 }
  0x7e   :  { %521 = vmatmul.f32.gmra.mxu3 %v173_v39 }
  0x7f   :  { %721 = vmatmul.f32.gmra.mxu1 %v1005_v5 }
  0x81   :  { %420 = vmatmul.f32.gmra.mxu2 %v1040_v48 }
  0x84   :  { %640 = vmatmul.f32.gmra.mxu0 %v1027_v40 }
  0x86   :  { %527 = vmatmul.f32.gmra.mxu3 %v181_v63 }
  0x87   :  { %725 = vmatmul.f32.gmra.mxu1 %v1027_v40 }
  0x89   :  { %425 = vmatmul.f32.gmra.mxu2 %v188_v12 }
  0x8c   :  { %644 = vmatmul.f32.gmra.mxu0 %v1049_v0 }
  0x8e   :  { %533 = vmatmul.f32.gmra.mxu3 %v189_v25 }
  0x8f   :  { %729 = vmatmul.f32.gmra.mxu1 %v1049_v0 }
  0x91   :  { %430 = vmatmul.f32.gmra.mxu2 %v196_v37 }
  0x94   :  { %648 = vmatmul.f32.gmra.mxu0 %v195_v26 }
  0x96   :  { %539 = vmatmul.f32.gmra.mxu3 %v197_v46 }
  0x97   :  { %733 = vmatmul.f32.gmra.mxu1 %v195_v26 }
  0x99   :  { %435 = vmatmul.f32.gmra.mxu2 %v912_v23  ;;  %v1121_v34 = vpop.f32.mrf.mxu0 }
  0x9c   :  { %v209_v42 = vpop.f32.mrf.mxu2  ;;  %v1123_v49 = vpop.f32.mrf.mxu1  ;;  %652 = vmatmul.f32.gmra.mxu0 %v898_v15 }
  0x9d   :  { %v210_v53 = vadd.f32 %v1119_v28, %v209_v42 }
  0x9e   :  { %545 = vmatmul.f32.gmra.mxu3 %v205_v30 }
  0x9f   :  { %737 = vmatmul.f32.gmra.mxu1 %v898_v15 }
  0xa1   :  { %440 = vmatmul.f32.gmra.mxu2 %v917_v27  ;;  %v338_v55 = vpop.f32.mrf.mxu3  ;;  %v1131_v58 = vpop.f32.mrf.mxu0 }
  0xa2   :  { %v1133_v59 = vadd.f32 %v338_v55, %v210_v53 }
  0xa4   :  { %v217_v6 = vpop.f32.mrf.mxu2  ;;  %v1135_v7 = vpop.f32.mrf.mxu1  ;;  %656 = vmatmul.f32.gmra.mxu0 %v906_v19 }
  0xa5   :  { %v218_v13 = vadd.f32 %v1119_v28, %v217_v6 }
  0xa6   :  { %551 = vmatmul.f32.gmra.mxu3 %v213_v41 }
  0xa7   :  { %741 = vmatmul.f32.gmra.mxu1 %v906_v19 }
  0xa9   :  { %445 = vmatmul.f32.gmra.mxu2 %v950_v52  ;;  %v342_v15 = vpop.f32.mrf.mxu3  ;;  %v1143_v23 = vpop.f32.mrf.mxu0 }
  0xaa   :  { %v1145_v30 = vadd.f32 %v342_v15, %v218_v13  ;;  %v162_v53 = vadd.f32 %v1119_v28, %v1143_v23 }
  0xac   :  { %v225_v21 = vpop.f32.mrf.mxu2  ;;  %v1147_v5 = vpop.f32.mrf.mxu1  ;;  %660 = vmatmul.f32.gmra.mxu0 %v930_v35 }
  0xad   :  { %v226_v29 = vadd.f32 %v1119_v28, %v225_v21  ;;  %v315_v15 = vadd.f32 %v1147_v5, %v162_v53 }
  0xae   :  { %557 = vmatmul.f32.gmra.mxu3 %v221_v61 }
  0xaf   :  { %745 = vmatmul.f32.gmra.mxu1 %v930_v35 }
  0xb1   :  { %450 = vmatmul.f32.gmra.mxu2 %v984_v10  ;;  %v346_v19 = vpop.f32.mrf.mxu3  ;;  %v1155_v27 = vpop.f32.mrf.mxu0 }
  0xb2   :  { %v1157_v41 = vadd.f32 %v346_v19, %v226_v29 }
  0xb4   :  { %v233_v39 = vpop.f32.mrf.mxu2  ;;  %v1159_v40 = vpop.f32.mrf.mxu1  ;;  %664 = vmatmul.f32.gmra.mxu0 %v963_v62 }
  0xb5   :  { %v234_v48 = vadd.f32 %v1119_v28, %v233_v39  ;;  %v170_v39 = vadd.f32 %v1119_v28, %v1155_v27 }
  0xb6   :  { %563 = vmatmul.f32.gmra.mxu3 %v229_v16 }
  0xb7   :  { %749 = vmatmul.f32.gmra.mxu1 %v963_v62 }
  0xb9   :  { %455 = vmatmul.f32.gmra.mxu2 %v1011_v24  ;;  %v350_v35 = vpop.f32.mrf.mxu3  ;;  %v1167_v52 = vpop.f32.mrf.mxu0 }
  0xba   :  { %v1169_v61 = vadd.f32 %v350_v35, %v234_v48 }
  0xbc   :  { %v241_v60 = vpop.f32.mrf.mxu2  ;;  %v1171_v63 = vpop.f32.mrf.mxu1  ;;  %668 = vmatmul.f32.gmra.mxu0 %v997_v17 }
  0xbd   :  { %v242_v0 = vadd.f32 %v1119_v28, %v241_v60 }
  0xbe   :  { %569 = vmatmul.f32.gmra.mxu3 %v237_v32 }
  0xbf   :  { %753 = vmatmul.f32.gmra.mxu1 %v997_v17 }
  0xc1   :  { %460 = vmatmul.f32.gmra.mxu2 %v1033_v44  ;;  %v354_v62 = vpop.f32.mrf.mxu3  ;;  %v1179_v10 = vpop.f32.mrf.mxu0 }
  0xc2   :  { %v1181_v16 = vadd.f32 %v354_v62, %v242_v0  ;;  %v319_v0 = vadd.f32 %v1159_v40, %v170_v39 }
  0xc4   :  { %v249_v1 = vpop.f32.mrf.mxu2  ;;  %v1183_v8 = vpop.f32.mrf.mxu1  ;;  %672 = vmatmul.f32.gmra.mxu0 %v1021_v33 }
  0xc5   :  { %v250_v3 = vadd.f32 %v1119_v28, %v249_v1 }
  0xc6   :  { %575 = vmatmul.f32.gmra.mxu3 %v245_v51 }
  0xc7   :  { %757 = vmatmul.f32.gmra.mxu1 %v1021_v33 }
  0xc9   :  { %465 = vmatmul.f32.gmra.mxu2 %v1055_v2  ;;  %v358_v17 = vpop.f32.mrf.mxu3  ;;  %v1191_v24 = vpop.f32.mrf.mxu0 }
  0xca   :  { %v1193_v32 = vadd.f32 %v358_v17, %v250_v3  ;;  %v178_v17 = vadd.f32 %v1119_v28, %v1167_v52 }
  0xcc   :  { %v257_v11 = vpop.f32.mrf.mxu2  ;;  %v1195_v12 = vpop.f32.mrf.mxu1  ;;  %676 = vmatmul.f32.gmra.mxu0 %v1043_v54 }
  0xcd   :  { %v258_v14 = vadd.f32 %v1119_v28, %v257_v11 }
  0xce   :  { %581 = vmatmul.f32.gmra.mxu3 %v253_v4  ;;  %v146_v4 = vadd.f32 %v1119_v28, %v1121_v34 }
  0xcf   :  { %761 = vmatmul.f32.gmra.mxu1 %v1043_v54 }
  0xd0   :  { %v307_v37 = vadd.f32 %v1123_v49, %v146_v4  ;;  %v186_v4 = vadd.f32 %v1119_v28, %v1179_v10 }
  0xd1   :  { %470 = vmatmul.f32.gmra.mxu2 %v1072_v31  ;;  %v362_v33 = vpop.f32.mrf.mxu3  ;;  %v1203_v44 = vpop.f32.mrf.mxu0  ;;  %v154_v31 = vadd.f32 %v1119_v28, %v1131_v58 }
  0xd2   :  { %v1205_v51 = vadd.f32 %v362_v33, %v258_v14 }
  0xd3   :  { %v311_v56 = vadd.f32 %v1135_v7, %v154_v31 }
  0xd4   :  { %v265_v20 = vpop.f32.mrf.mxu2  ;;  %v1207_v22 = vpop.f32.mrf.mxu1  ;;  %680 = vmatmul.f32.gmra.mxu0 %v1063_v18 }
  0xd5   :  { %v266_v25 = vadd.f32 %v1119_v28, %v265_v20  ;;  %v323_v20 = vadd.f32 %v1171_v63, %v178_v17 }
  0xd6   :  { %587 = vmatmul.f32.gmra.mxu3 %v261_v43 }
  0xd7   :  { %765 = vmatmul.f32.gmra.mxu1 %v1063_v18 }
  0xd9   :  { %v366_v54 = vpop.f32.mrf.mxu3  ;;  %v621_v2 = vpop.f32.mrf.mxu0 }
  0xda   :  { %v1216_v26 = vadd.f32 %v366_v54, %v266_v25 }
  0xdc   :  { %v396_v9 = vpop.f32.mrf.mxu2  ;;  %v706_v36 = vpop.f32.mrf.mxu1 }
  0xdd   :  { %v397_v38 = vadd.f32 %v396_v9, %v307_v37 }
  0xe1   :  { %v498_v45 = vpop.f32.mrf.mxu3  ;;  %v625_v46 = vpop.f32.mrf.mxu0 }
  0xe2   :  { %v499_v43 = vadd.f32 %v498_v45, %v397_v38  ;;  %v327_v38 = vadd.f32 %v1183_v8, %v186_v4 }
  0xe4   :  { %v401_v47 = vpop.f32.mrf.mxu2  ;;  %v622_v18 = vadd.f32 %v621_v2, %v499_v43  ;;  %v710_v50 = vpop.f32.mrf.mxu1  ;;  %v194_v43 = vadd.f32 %v1119_v28, %v1191_v24 }
  0xe5   :  { %v402_v34 = vadd.f32 %v401_v47, %v311_v56 }
  0xe6   :  { %v707_v57 = vadd.f32 %v706_v36, %v622_v18  ;;  %v331_v56 = vadd.f32 %v1195_v12, %v194_v43 }
  0xe8   :  { %769 = vst [vmem:[%s1299_s3] sm:$0xff] %v707_v57 }
  0xe9   :  { %v504_v42 = vpop.f32.mrf.mxu3  ;;  %v629_v49 = vpop.f32.mrf.mxu0 }
  0xea   :  { %v505_v55 = vadd.f32 %v504_v42, %v402_v34 }
  0xec   :  { %v406_v6 = vpop.f32.mrf.mxu2  ;;  %v626_v58 = vadd.f32 %v625_v46, %v505_v55  ;;  %v714_v13 = vpop.f32.mrf.mxu1 }
  0xed   :  { %v407_v29 = vadd.f32 %v406_v6, %v315_v15 }
  0xee   :  { %v711_v21 = vadd.f32 %v710_v50, %v626_v58 }
  0xf0   :  { %770 = vst [vmem:[%s1299_s3 + $0x8] sm:$0xff] %v711_v21 }
  0xf1   :  { %v510_v7 = vpop.f32.mrf.mxu3  ;;  %v633_v19 = vpop.f32.mrf.mxu0 }
  0xf2   :  { %v511_v48 = vadd.f32 %v510_v7, %v407_v29 }
  0xf4   :  { %v411_v35 = vpop.f32.mrf.mxu2  ;;  %v630_v23 = vadd.f32 %v629_v49, %v511_v48  ;;  %v718_v60 = vpop.f32.mrf.mxu1  ;;  %v202_v49 = vadd.f32 %v1119_v28, %v1203_v44 }
  0xf5   :  { %v412_v1 = vadd.f32 %v411_v35, %v319_v0 }
  0xf6   :  { %v715_v62 = vadd.f32 %v714_v13, %v630_v23  ;;  %v335_v58 = vadd.f32 %v1207_v22, %v202_v49 }
  0xf8   :  { %771 = vst [vmem:[%s1299_s3 + $0x10] sm:$0xff] %v715_v62 }
  0xf9   :  { %v516_v5 = vpop.f32.mrf.mxu3  ;;  %v637_v3 = vpop.f32.mrf.mxu0 }
  0xfa   :  { %v517_v11 = vadd.f32 %v516_v5, %v412_v1 }
  0xfc   :  { %v416_v14 = vpop.f32.mrf.mxu2  ;;  %v634_v27 = vadd.f32 %v633_v19, %v517_v11  ;;  %v722_v33 = vpop.f32.mrf.mxu1 }
  0xfd   :  { %v417_v54 = vadd.f32 %v416_v14, %v323_v20 }
  0xfe   :  { %v719_v25 = vadd.f32 %v718_v60, %v634_v27 }
 0x100   :  { %772 = vst [vmem:[%s1299_s3 + $0x18] sm:$0xff] %v719_v25 }
 0x101   :  { %v522_v40 = vpop.f32.mrf.mxu3  ;;  %v641_v2 = vpop.f32.mrf.mxu0 }
 0x102   :  { %v523_v9 = vadd.f32 %v522_v40, %v417_v54 }
 0x104   :  { %v421_v36 = vpop.f32.mrf.mxu2  ;;  %v638_v52 = vadd.f32 %v637_v3, %v523_v9  ;;  %v726_v37 = vpop.f32.mrf.mxu1 }
 0x105   :  { %v422_v46 = vadd.f32 %v421_v36, %v327_v38 }
 0x106   :  { %v723_v45 = vadd.f32 %v722_v33, %v638_v52 }
 0x108   :  { %773 = vst [vmem:[%s1299_s3 + $0x20] sm:$0xff] %v723_v45 }
 0x109   :  { %v528_v63 = vpop.f32.mrf.mxu3  ;;  %v645_v31 = vpop.f32.mrf.mxu0 }
 0x10a   :  { %v529_v47 = vadd.f32 %v528_v63, %v422_v46 }
 0x10c   :  { %v426_v18 = vpop.f32.mrf.mxu2  ;;  %v642_v10 = vadd.f32 %v641_v2, %v529_v47  ;;  %v730_v50 = vpop.f32.mrf.mxu1 }
 0x10d   :  { %v427_v34 = vadd.f32 %v426_v18, %v331_v56 }
 0x10e   :  { %v727_v57 = vadd.f32 %v726_v37, %v642_v10 }
 0x110   :  { %774 = vst [vmem:[%s1299_s3 + $0x28] sm:$0xff] %v727_v57 }
 0x111   :  { %v534_v8 = vpop.f32.mrf.mxu3  ;;  %v649_v42 = vpop.f32.mrf.mxu0 }
 0x112   :  { %v535_v53 = vadd.f32 %v534_v8, %v427_v34 }
 0x114   :  { %v431_v55 = vpop.f32.mrf.mxu2  ;;  %v646_v24 = vadd.f32 %v645_v31, %v535_v53  ;;  %v734_v6 = vpop.f32.mrf.mxu1 }
 0x115   :  { %v432_v15 = vadd.f32 %v431_v55, %v335_v58 }
 0x116   :  { %v731_v13 = vadd.f32 %v730_v50, %v646_v24 }
 0x118   :  { %775 = vst [vmem:[%s1299_s3 + $0x30] sm:$0xff] %v731_v13 }
 0x119   :  { %v540_v12 = vpop.f32.mrf.mxu3  ;;  %v653_v21 = vpop.f32.mrf.mxu0 }
 0x11a   :  { %v541_v29 = vadd.f32 %v540_v12, %v432_v15 }
 0x11c   :  { %v436_v7 = vpop.f32.mrf.mxu2  ;;  %v650_v19 = vadd.f32 %v649_v42, %v541_v29  ;;  %v738_v39 = vpop.f32.mrf.mxu1 }
 0x11d   :  { %v437_v28 = vadd.f32 %v436_v7, %v1133_v59 }
 0x11e   :  { %v735_v48 = vadd.f32 %v734_v6, %v650_v19 }
 0x120   :  { %776 = vst [vmem:[%s1299_s3 + $0x38] sm:$0xff] %v735_v48 }
 0x121   :  { %v546_v44 = vpop.f32.mrf.mxu3  ;;  %v657_v22 = vpop.f32.mrf.mxu0 }
 0x122   :  { %v547_v35 = vadd.f32 %v546_v44, %v437_v28 }
 0x124   :  { %v441_v23 = vpop.f32.mrf.mxu2  ;;  %v654_v60 = vadd.f32 %v653_v21, %v547_v35  ;;  %v742_v0 = vpop.f32.mrf.mxu1 }
 0x125   :  { %v442_v1 = vadd.f32 %v441_v23, %v1145_v30 }
 0x126   :  { %v739_v62 = vadd.f32 %v738_v39, %v654_v60 }
 0x128   :  { %777 = vst [vmem:[%s1299_s3 + $0x40] sm:$0xff] %v739_v62 }
 0x129   :  { %v552_v5 = vpop.f32.mrf.mxu3  ;;  %v661_v3 = vpop.f32.mrf.mxu0 }
 0x12a   :  { %v553_v59 = vadd.f32 %v552_v5, %v442_v1 }
 0x12c   :  { %v446_v17 = vpop.f32.mrf.mxu2  ;;  %v658_v11 = vadd.f32 %v657_v22, %v553_v59  ;;  %v746_v14 = vpop.f32.mrf.mxu1 }
 0x12d   :  { %v447_v33 = vadd.f32 %v446_v17, %v1157_v41 }
 0x12e   :  { %v743_v27 = vadd.f32 %v742_v0, %v658_v11 }
 0x130   :  { %778 = vst [vmem:[%s1299_s3 + $0x48] sm:$0xff] %v743_v27 }
 0x131   :  { %v558_v20 = vpop.f32.mrf.mxu3  ;;  %v665_v25 = vpop.f32.mrf.mxu0 }
 0x132   :  { %v559_v30 = vadd.f32 %v558_v20, %v447_v33 }
 0x134   :  { %v451_v54 = vpop.f32.mrf.mxu2  ;;  %v662_v40 = vadd.f32 %v661_v3, %v559_v30  ;;  %v750_v2 = vpop.f32.mrf.mxu1 }
 0x135   :  { %v452_v9 = vadd.f32 %v451_v54, %v1169_v61 }
 0x136   :  { %v747_v4 = vadd.f32 %v746_v14, %v662_v40 }
 0x138   :  { %779 = vst [vmem:[%s1299_s3 + $0x50] sm:$0xff] %v747_v4 }
 0x139   :  { %v564_v36 = vpop.f32.mrf.mxu3  ;;  %v669_v41 = vpop.f32.mrf.mxu0 }
 0x13a   :  { %v565_v52 = vadd.f32 %v564_v36, %v452_v9 }
 0x13c   :  { %v456_v37 = vpop.f32.mrf.mxu2  ;;  %v666_v38 = vadd.f32 %v665_v25, %v565_v52  ;;  %v754_v45 = vpop.f32.mrf.mxu1 }
 0x13d   :  { %v457_v63 = vadd.f32 %v456_v37, %v1181_v16 }
 0x13e   :  { %v751_v46 = vadd.f32 %v750_v2, %v666_v38 }
 0x140   :  { %780 = vst [vmem:[%s1299_s3 + $0x58] sm:$0xff] %v751_v46 }
 0x141   :  { %v570_v31 = vpop.f32.mrf.mxu3  ;;  %v673_v18 = vpop.f32.mrf.mxu0 }
 0x142   :  { %v571_v43 = vadd.f32 %v570_v31, %v457_v63 }
 0x144   :  { %v461_v61 = vpop.f32.mrf.mxu2  ;;  %v670_v47 = vadd.f32 %v669_v41, %v571_v43  ;;  %v758_v50 = vpop.f32.mrf.mxu1 }
 0x145   :  { %v462_v56 = vadd.f32 %v461_v61, %v1193_v32 }
 0x146   :  { %v755_v10 = vadd.f32 %v754_v45, %v670_v47 }
 0x148   :  { %781 = vst [vmem:[%s1299_s3 + $0x60] sm:$0xff] %v755_v10 }
 0x149   :  { %v576_v57 = vpop.f32.mrf.mxu3  ;;  %v677_v49 = vpop.f32.mrf.mxu0 }
 0x14a   :  { %v577_v34 = vadd.f32 %v576_v57, %v462_v56 }
 0x14c   :  { %v466_v16 = vpop.f32.mrf.mxu2  ;;  %v674_v8 = vadd.f32 %v673_v18, %v577_v34  ;;  %v762_v24 = vpop.f32.mrf.mxu1 }
 0x14d   :  { %v467_v53 = vadd.f32 %v466_v16, %v1205_v51 }
 0x14e   :  { %v759_v42 = vadd.f32 %v758_v50, %v674_v8 }
 0x150   :  { %782 = vst [vmem:[%s1299_s3 + $0x68] sm:$0xff] %v759_v42 }
 0x151   :  { %v582_v55 = vpop.f32.mrf.mxu3  ;;  %v681_v21 = vpop.f32.mrf.mxu0 }
 0x152   :  { %v583_v6 = vadd.f32 %v582_v55, %v467_v53 }
 0x154   :  { %v678_v32 = vadd.f32 %v677_v49, %v583_v6  ;;  %v471_v58 = vpop.f32.mrf.mxu2  ;;  %v766_v51 = vpop.f32.mrf.mxu1 }
 0x155   :  { %v472_v15 = vadd.f32 %v471_v58, %v1216_v26 }
 0x156   :  { %v763_v13 = vadd.f32 %v762_v24, %v678_v32 }
 0x158   :  { %783 = vst [vmem:[%s1299_s3 + $0x70] sm:$0xff] %v763_v13 }
 0x159   :  { %v588_v12 = vpop.f32.mrf.mxu3 }
 0x15a   :  { %v589_v29 = vadd.f32 %v588_v12, %v472_v15 }
 0x15c   :  { %v682_v7 = vadd.f32 %v681_v21, %v589_v29 }
 0x15e   :  { %v767_v19 = vadd.f32 %v766_v51, %v682_v7 }
 0x160   :  { %784 = vst [vmem:[%s1299_s3 + $0x78] sm:$0xff] %v767_v19 }
 0x161   :  { %789 = vsyncpa [#allocation3], 1 }
 0x162   :  { %790 = vsyncpa [#allocation5], 1 }

// kernel: ss2d_forward.8
= control target key start
LH: loop header
LB: loop body
LE: loop exit
PB: predicated region body
PF: predicated region fallthrough
CT: control target
= control target key end

     0   :  { %s781_s12 = smov 0   ;;  %s1109_s0 = inlined_call_operand.vmem [shape: f32[2,10,10,64], index: 0, kind: input, shape index: {}]   ;;  %s1110_s1 = inlined_call_operand.vmem [shape: f32[9,64], index: 1, kind: input, shape index: {}]   ;;  %s1111_s2 = inlined_call_operand.vmem [shape: f32[1,64], index: 2, kind: input, shape index: {}]   ;;  %s1112_s3 = inlined_call_operand.vmem [shape: f32[2,8,8,64], index: 3, kind: output, shape index: {}]  }
   0x1 LB: > { %s643_s13 = sadd.s32 4294967295, %s759_s12   ;;  %p647_p0 = scmp.ge.s32.totalorder %s759_s12, 1  ;;  %s759_s12 = sphi %s781_s12, %s13_s12  }
   0x2   : > { %p137_p1 = scmp.lt.s32.totalorder %s759_s12, 3 }
   0x4   : > { %p138_p2 = pnand %p647_p0, %p137_p1 }
   0x5   : > { %p161_p3 = scmp.lt.s32.totalorder (!%p138_p2), %s643_s13, 1 }
   0x6   : > { %141 = sbr.rel (%p138_p2) target bundleno = 113 (0x71), region = 32 }
   0xb   : > { %s1130_s13 = smov (!%p161_p3, %s643_s13), 1  ;;  %v794_v0 = vld [vmem:[%s1110_s1] ss:$0 sm:$0xff]  ;;  %v799_v1 = vld [vmem:[%s1110_s1 + $0x1] ss:$0 sm:$0xff]  ;;  %vm579_vm4 = vcmask 523264  }
   0xc   : > { %v804_v2 = vld [vmem:[%s1110_s1 + $0x2] ss:$0 sm:$0xff]  ;;  %s702_s20 = smul.u32 160, %s1130_s13  ;;  %v810_v3 = vld [vmem:[%s1110_s1 + $0x3] ss:$0 sm:$0xff]  ;;  %s701_s11 = sshll.u32 %s1130_s13, 6 }
   0xd   : > { %v815_v4 = vld [vmem:[%s1110_s1 + $0x4] ss:$0 sm:$0xff]  ;;  %v820_v5 = vld [vmem:[%s1110_s1 + $0x5] ss:$0 sm:$0xff]  ;;  %v825_v6 = vld [vmem:[%s1110_s1 + $0x6] ss:$0 sm:$0xff]  ;;  %s1027_s15 = scalar_lea.vmem %s1112_s3, %s701_s11 }
   0xe   : > { %s830_s4 = scalar_lea.vmem %s1109_s0, %s702_s20  ;;  %v835_v7 = vld [vmem:[%s1110_s1 + $0x7] ss:$0 sm:$0xff]  ;;  %v840_v8 = vld [vmem:[%s1110_s1 + $0x8] ss:$0 sm:$0xff] }
   0xf   : > { %v171_v9 = vld [vmem:[%s830_s4] sm:$0xff]  ;;  %v651_v15 = vld [vmem:[%s830_s4 + $0x10] sm:$0xff] }
  0x10   : > { %v197_v10 = vld [vmem:[%s830_s4 + $0x1] sm:$0xff]  ;;  %v181_v12 = vmul.f32 %v794_v0, %v171_v9  ;;  %v659_v16 = vld [vmem:[%s830_s4 + $0x11] sm:$0xff]  ;;  %v182_v18 = vmul.f32 %v794_v0, %v651_v15  ;;  %v260_v20 = vmul.f32 %v810_v3, %v651_v15 }
  0x11   : > { %v223_v11 = vld [vmem:[%s830_s4 + $0x2] sm:$0xff]  ;;  %v207_v13 = vmul.f32 %v799_v1, %v197_v10  ;;  %v667_v17 = vld [vmem:[%s830_s4 + $0x12] sm:$0xff]  ;;  %v286_v21 = vmul.f32 %v815_v4, %v659_v16  ;;  %v208_v28 = vmul.f32 %v799_v1, %v659_v16 }
  0x12   : > { %v233_v14 = vmul.f32 %v804_v2, %v223_v11  ;;  %v312_v22 = vmul.f32 %v820_v5, %v667_v17  ;;  %v675_v23 = vld [vmem:[%s830_s4 + $0x20] sm:$0xff]  ;;  %v234_v29 = vmul.f32 %v804_v2, %v667_v17  ;;  %v676_v36 = vld [vmem:[%s830_s4 + $0x30] sm:$0xff] }
  0x13   : > { %v215_v19 = vadd.f32 %v207_v13, %v181_v12  ;;  %v683_v24 = vld [vmem:[%s830_s4 + $0x21] sm:$0xff]  ;;  %v339_v25 = vmul.f32 %v825_v6, %v675_v23  ;;  %v261_v32 = vmul.f32 %v810_v3, %v675_v23  ;;  %v216_v34 = vadd.f32 %v208_v28, %v182_v18  ;;  %v684_v37 = vld [vmem:[%s830_s4 + $0x31] sm:$0xff] }
  0x14   : > { %v365_v26 = vmul.f32 %v835_v7, %v683_v24  ;;  %v691_v27 = vld [vmem:[%s830_s4 + $0x22] sm:$0xff]  ;;  %v287_v33 = vmul.f32 %v815_v4, %v683_v24  ;;  %v183_v38 = vmul.f32 %v794_v0, %v675_v23  ;;  %v209_v39 = vmul.f32 %v799_v1, %v683_v24  ;;  %v692_v43 = vld [vmem:[%s830_s4 + $0x32] sm:$0xff]  ;;  %v896_v23 = vld [vmem:[%s1111_s2] ss:$0 sm:$0xff] }
  0x15   : > { %v241_v30 = vadd.f32 %v233_v14, %v215_v19  ;;  %v391_v31 = vmul.f32 %v840_v8, %v691_v27  ;;  %v313_v35 = vmul.f32 %v820_v5, %v691_v27  ;;  %v340_v41 = vmul.f32 %v825_v6, %v676_v36  ;;  %v677_v55 = vld [vmem:[%s830_s4 + $0x40] sm:$0xff] }
  0x16   : > { %v366_v42 = vmul.f32 %v835_v7, %v684_v37  ;;  %v235_v44 = vmul.f32 %v804_v2, %v691_v27  ;;  %v242_v45 = vadd.f32 %v234_v29, %v216_v34  ;;  %v392_v46 = vmul.f32 %v840_v8, %v692_v43  ;;  %v685_v56 = vld [vmem:[%s830_s4 + $0x41] sm:$0xff] }
  0x17   : > { %v268_v40 = vadd.f32 %v260_v20, %v241_v30  ;;  %v217_v47 = vadd.f32 %v209_v39, %v183_v38  ;;  %v262_v48 = vmul.f32 %v810_v3, %v676_v36  ;;  %v288_v50 = vmul.f32 %v815_v4, %v684_v37  ;;  %v693_v57 = vld [vmem:[%s830_s4 + $0x42] sm:$0xff]  ;;  %v678_v20 = vld [vmem:[%s830_s4 + $0x50] sm:$0xff] }
  0x18   : > { %v314_v51 = vmul.f32 %v820_v5, %v692_v43  ;;  %v184_v52 = vmul.f32 %v794_v0, %v676_v36  ;;  %v269_v53 = vadd.f32 %v261_v32, %v242_v45  ;;  %v210_v58 = vmul.f32 %v799_v1, %v684_v37  ;;  %v686_v32 = vld [vmem:[%s830_s4 + $0x51] sm:$0xff] }
  0x19   : > { %v294_v49 = vadd.f32 %v286_v21, %v268_v40  ;;  %v243_v54 = vadd.f32 %v235_v44, %v217_v47  ;;  %v236_v59 = vmul.f32 %v804_v2, %v692_v43  ;;  %v341_v61 = vmul.f32 %v825_v6, %v677_v55  ;;  %v679_v44 = vld [vmem:[%s830_s4 + $0x60] sm:$0xff] }
  0x1a   : > { %v367_v62 = vmul.f32 %v835_v7, %v685_v56  ;;  %v393_v63 = vmul.f32 %v840_v8, %v693_v57  ;;  %v295_v9 = vadd.f32 %v287_v33, %v269_v53  ;;  %v218_v11 = vadd.f32 %v210_v58, %v184_v52  ;;  %v694_v33 = vld [vmem:[%s830_s4 + $0x52] sm:$0xff]  ;;  %v687_v52 = vld [vmem:[%s830_s4 + $0x61] sm:$0xff] }
  0x1b   : > { %v320_v60 = vadd.f32 %v312_v22, %v294_v49  ;;  %v270_v10 = vadd.f32 %v262_v48, %v243_v54  ;;  %v263_v12 = vmul.f32 %v810_v3, %v677_v55  ;;  %v289_v14 = vmul.f32 %v815_v4, %v685_v56 }
  0x1c   : > { %v315_v15 = vmul.f32 %v820_v5, %v693_v57  ;;  %v185_v16 = vmul.f32 %v794_v0, %v677_v55  ;;  %v321_v17 = vadd.f32 %v313_v35, %v295_v9  ;;  %v244_v19 = vadd.f32 %v236_v59, %v218_v11 }
  0x1d   : > { %v347_v13 = vadd.f32 %v339_v25, %v320_v60  ;;  %v296_v18 = vadd.f32 %v288_v50, %v270_v10  ;;  %v211_v21 = vmul.f32 %v799_v1, %v685_v56  ;;  %v342_v24 = vmul.f32 %v825_v6, %v678_v20  ;;  %v695_v60 = vld [vmem:[%s830_s4 + $0x62] sm:$0xff] }
  0x1e   : > { %v237_v25 = vmul.f32 %v804_v2, %v693_v57  ;;  %v264_v27 = vmul.f32 %v810_v3, %v678_v20  ;;  %v348_v28 = vadd.f32 %v340_v41, %v321_v17  ;;  %v271_v30 = vadd.f32 %v263_v12, %v244_v19 }
  0x1f   : > { %v373_v22 = vadd.f32 %v365_v26, %v347_v13  ;;  %v322_v29 = vadd.f32 %v314_v51, %v296_v18  ;;  %v219_v34 = vadd.f32 %v211_v21, %v185_v16  ;;  %v368_v26 = vmul.f32 %v835_v7, %v686_v32 }
  0x20   : > { %v394_v36 = vmul.f32 %v840_v8, %v694_v33  ;;  %v290_v37 = vmul.f32 %v815_v4, %v686_v32  ;;  %v374_v38 = vadd.f32 %v366_v42, %v348_v28  ;;  %v297_v40 = vadd.f32 %v289_v14, %v271_v30 }
  0x21   : > { %v399_v35 = vadd.f32 %v391_v31, %v373_v22  ;;  %v349_v39 = vadd.f32 %v341_v61, %v322_v29  ;;  %v245_v43 = vadd.f32 %v237_v25, %v219_v34  ;;  %v316_v45 = vmul.f32 %v820_v5, %v694_v33 }
  0x22   : > { %v343_v31 = vmul.f32 %v825_v6, %v679_v44  ;;  %v186_v47 = vmul.f32 %v794_v0, %v678_v20  ;;  %v400_v48 = vadd.f32 %v392_v46, %v374_v38  ;;  %v323_v50 = vadd.f32 %v315_v15, %v297_v40  ;;  %v680_v20 = vld [vmem:[%s830_s4 + $0x70] sm:$0xff] }
  0x23   : > { %v908_v41 = vadd.f32 %v896_v23, %v399_v35  ;;  %v375_v49 = vadd.f32 %v367_v62, %v349_v39  ;;  %v272_v51 = vadd.f32 %v264_v27, %v245_v43  ;;  %v369_v53 = vmul.f32 %v835_v7, %v687_v52 }
  0x24   : > { %v212_v54 = vmul.f32 %v799_v1, %v686_v32  ;;  %v238_v55 = vmul.f32 %v804_v2, %v694_v33  ;;  %v919_v56 = vadd.f32 %v896_v23, %v400_v48  ;;  %v350_v58 = vadd.f32 %v342_v24, %v323_v50 }
  0x25   : > { %v419_v42 = vsub.f32 0.0, %v908_v41  ;;  %v401_v57 = vadd.f32 %v393_v63, %v375_v49  ;;  %v298_v59 = vadd.f32 %v290_v37, %v272_v51  ;;  %v395_v61 = vmul.f32 %v840_v8, %v695_v60 }
  0x26   : > { %v220_v62 = vadd.f32 %v212_v54, %v186_v47  ;;  %v265_v9 = vmul.f32 %v810_v3, %v679_v44  ;;  %v420_v10 = vsub.f32 0.0, %v919_v56  ;;  %v376_v12 = vadd.f32 %v368_v26, %v350_v58 }
  0x27   : > { %v427_v46 = vmul.f32 1.442695, %v419_v42  ;;  %v926_v11 = vadd.f32 %v896_v23, %v401_v57  ;;  %v324_v13 = vadd.f32 %v316_v45, %v298_v59  ;;  %v291_v63 = vmul.f32 %v815_v4, %v687_v52  ;;  %v681_v59 = vld [vmem:[%s830_s4 + $0x80] sm:$0xff] }
  0x28   : > { %v246_v14 = vadd.f32 %v238_v55, %v220_v62  ;;  %v317_v15 = vmul.f32 %v820_v5, %v695_v60  ;;  %v429_v16 = vmul.f32 1.442695, %v420_v10  ;;  %v402_v18 = vadd.f32 %v394_v36, %v376_v12  ;;  %v688_v36 = vld [vmem:[%s830_s4 + $0x71] sm:$0xff]  ;;  %v689_v62 = vld [vmem:[%s830_s4 + $0x81] sm:$0xff] }
  0x29   : > { %721 = vpow2.f32 %v427_v46  ;;  %v421_v17 = vsub.f32 0.0, %v926_v11  ;;  %v351_v19 = vadd.f32 %v343_v31, %v324_v13  ;;  %v344_v22 = vmul.f32 %v825_v6, %v680_v20  ;;  %v696_v31 = vld [vmem:[%s830_s4 + $0x72] sm:$0xff] }
  0x2a   : > { %v273_v21 = vadd.f32 %v265_v9, %v246_v14  ;;  %v187_v24 = vmul.f32 %v794_v0, %v679_v44  ;;  %v213_v25 = vmul.f32 %v799_v1, %v687_v52  ;;  %723 = vpow2.f32 %v429_v16  ;;  %v963_v9 = vld [vmem:[%s830_s4 + $0x82] sm:$0xff] }
  0x2b   : > { %v431_v27 = vmul.f32 1.442695, %v421_v17  ;;  %v936_v28 = vadd.f32 %v896_v23, %v402_v18  ;;  %v377_v29 = vadd.f32 %v369_v53, %v351_v19  ;;  %v239_v33 = vmul.f32 %v804_v2, %v695_v60 }
  0x2c   : > { %v299_v30 = vadd.f32 %v291_v63, %v273_v21  ;;  %v221_v32 = vadd.f32 %v213_v25, %v187_v24  ;;  %v266_v34 = vmul.f32 %v810_v3, %v680_v20  ;;  %v370_v39 = vmul.f32 %v835_v7, %v688_v36 }
  0x2d   : > { %725 = vpow2.f32 %v431_v27  ;;  %v422_v35 = vsub.f32 0.0, %v936_v28  ;;  %v403_v26 = vadd.f32 %v395_v61, %v377_v29  ;;  %v292_v47 = vmul.f32 %v815_v4, %v688_v36 }
  0x2e   : > { %v325_v38 = vadd.f32 %v317_v15, %v299_v30  ;;  %v247_v40 = vadd.f32 %v239_v33, %v221_v32  ;;  %v396_v49 = vmul.f32 %v840_v8, %v696_v31  ;;  %v318_v51 = vmul.f32 %v820_v5, %v696_v31 }
  0x2f   : > { %v722_v37 = vpop.eup %721  ;;  %v433_v44 = vmul.f32 1.442695, %v422_v35  ;;  %v946_v45 = vadd.f32 %v896_v23, %v403_v26  ;;  %v188_v54 = vmul.f32 %v794_v0, %v680_v20  ;;  %v345_v61 = vmul.f32 %v825_v6, %v681_v59 }
  0x30   : > { %v943_v43 = vadd.f32 1.0, %v722_v37  ;;  %v352_v48 = vadd.f32 %v344_v22, %v325_v38  ;;  %v274_v50 = vadd.f32 %v266_v34, %v247_v40  ;;  %v724_v52 = vpop.eup %723  ;;  %v214_v10 = vmul.f32 %v799_v1, %v688_v36 }
  0x31   : > { %v956_v55 = vadd.f32 1.0, %v724_v52  ;;  %v423_v57 = vsub.f32 0.0, %v946_v45  ;;  %v371_v0 = vmul.f32 %v835_v7, %v689_v62  ;;  %v397_v12 = vmul.f32 %v840_v8, %v963_v9 }
  0x32   : > { %727 = vrcp.f32 %v943_v43  ;;  %v460_v42 = vand.u32 2147483647, %v943_v43  ;;  %v462_v53 = vand.u32 2147483648, %v943_v43  ;;  %v378_v58 = vadd.f32 %v370_v39, %v352_v48 }
  0x33   : > { %729 = vpow2.f32 %v433_v44  ;;  %v726_v60 = vpop.eup %725  ;;  %v300_v46 = vadd.f32 %v292_v47, %v274_v50  ;;  %vm456_vm0 = vweird.f32 %v943_v43  ;;  %v435_v14 = vmul.f32 1.442695, %v423_v57 }
  0x34   : > { %731 = vrcp.f32 %v956_v55  ;;  %v971_v13 = vadd.f32 1.0, %v726_v60  ;;  %v404_v63 = vadd.f32 %v396_v49, %v378_v58  ;;  %vm973_vm1 = vcmp.eq.f32.partialorder %v460_v42, 8.507059e+37 }
  0x35   : > { %v326_v15 = vadd.f32 %v318_v51, %v300_v46  ;;  %v463_v17 = vor.u32 1.1754944e-38, %v462_v53  ;;  %v222_v1 = vadd.f32 %v214_v10, %v188_v54  ;;  %v240_v18 = vmul.f32 %v804_v2, %v696_v31 }
  0x36   : > { %vm471_vm2 = vweird.f32 %v956_v55  ;;  %v475_v20 = vand.u32 2147483647, %v956_v55  ;;  %v477_v21 = vand.u32 2147483648, %v956_v55  ;;  %733 = vrcp.f32 %v971_v13 }
  0x37   : > { %v490_v25 = vand.u32 2147483647, %v971_v13  ;;  %735 = vpow2.f32 %v435_v14  ;;  %v985_v27 = vadd.f32 %v896_v23, %v404_v63  ;;  %v492_v2 = vand.u32 2147483648, %v971_v13 }
  0x38   : > { %v728_v19 = vpop.eup %727  ;;  %v353_v30 = vadd.f32 %v345_v61, %v326_v15  ;;  %v248_v35 = vadd.f32 %v240_v18, %v222_v1  ;;  %v267_v26 = vmul.f32 %v810_v3, %v681_v59  ;;  %vm993_vm5 = vcmp.eq.f32.partialorder %v475_v20, 8.507059e+37  ;;  %v682_v18 = vld [vmem:[%s830_s4 + $0x90] sm:$0xff] }
  0x39   : > { %v730_v22 = vpop.eup %729  ;;  %v452_v24 = vmul.f32 %v728_v19, %v943_v43  ;;  %vm457_vm3 = vweird.f32 %v728_v19  ;;  %v424_v34 = vsub.f32 0.0, %v985_v27  ;;  %v478_v38 = vor.u32 1.1754944e-38, %v477_v21 }
  0x3a   : > { %v988_v29 = vadd.f32 1.0, %v730_v22  ;;  %v732_v32 = vpop.eup %731  ;;  %vm486_vm6 = vweird.f32 %v971_v13  ;;  %vm999_vm7 = vcmp.eq.f32.partialorder %v490_v25, 8.507059e+37  ;;  %vm1006_vm8 = vmor %vm456_vm0, %vm457_vm3  ;;  %v493_v48 = vor.u32 1.1754944e-38, %v492_v2  ;;  %v690_v25 = vld [vmem:[%s830_s4 + $0x91] sm:$0xff] }
  0x3b   : > { %v453_v33 = vsub.f32 1.0, %v452_v24  ;;  %v467_v36 = vmul.f32 %v732_v32, %v956_v55  ;;  %v437_v44 = vmul.f32 1.442695, %v424_v34  ;;  %vm472_vm9 = vweird.f32 %v732_v32 }
  0x3c   : > { %737 = vrcp.f32 %v988_v29  ;;  %v734_v31 = vpop.eup %733  ;;  %v379_v49 = vadd.f32 %v371_v0, %v353_v30  ;;  %v275_v42 = vadd.f32 %v267_v26, %v248_v35  ;;  %v293_v53 = vmul.f32 %v815_v4, %v689_v62  ;;  %vm1020_vm10 = vmor %vm471_vm2, %vm472_vm9 }
  0x3d   : > { %v454_v39 = vmul.f32 %v728_v19, %v453_v33  ;;  %v468_v47 = vsub.f32 1.0, %v467_v36  ;;  %v736_v50 = vpop.eup %735  ;;  %v482_v52 = vmul.f32 %v734_v31, %v971_v13  ;;  %v505_v57 = vand.u32 2147483647, %v988_v29 }
  0x3e   : > { %v1014_v43 = vadd.f32 1.0, %v736_v50  ;;  %739 = vpow2.f32 %v437_v44  ;;  %vm487_vm11 = vweird.f32 %v734_v31  ;;  %v405_v46 = vadd.f32 %v397_v12, %v379_v49 }
  0x3f   : > { %v455_v51 = vadd.f32 %v728_v19, %v454_v39  ;;  %v469_v54 = vmul.f32 %v732_v32, %v468_v47  ;;  %v483_v60 = vsub.f32 1.0, %v482_v52  ;;  %v507_v55 = vand.u32 2147483648, %v988_v29  ;;  %vm1039_vm12 = vmor %vm486_vm6, %vm487_vm11  ;;  %v698_v39 = vld [vmem:[%s830_s4 + $0x92] sm:$0xff] }
  0x40   : > { %741 = vrcp.f32 %v1014_v43  ;;  %v301_v14 = vadd.f32 %v293_v53, %v275_v42  ;;  %vm501_vm13 = vweird.f32 %v988_v29  ;;  %v1045_v16 = vadd.f32 %v896_v23, %v405_v46 }
  0x41   : > { %v459_v58 = vsel %vm1006_vm8, %v728_v19, %v455_v51  ;;  %v470_v62 = vadd.f32 %v732_v32, %v469_v54  ;;  %v484_v0 = vmul.f32 %v734_v31, %v483_v60  ;;  %v319_v13 = vmul.f32 %v820_v5, %v963_v9 }
  0x42   : > { %v738_v61 = vpop.eup %737  ;;  %v464_v4 = vsel %vm973_vm1, %v463_v17, %v459_v58  ;;  %vm1055_vm15 = vcmp.eq.f32.partialorder %v505_v57, 8.507059e+37  ;;  %v508_v22 = vor.u32 1.1754944e-38, %v507_v55  ;;  %v425_v24 = vsub.f32 0.0, %v1045_v16 }
  0x43   : > { %v571_v10 = vmul.f32 %v464_v4, %v908_v41  ;;  %v497_v12 = vmul.f32 %v738_v61, %v988_v29  ;;  %v474_v63 = vsel %vm1020_vm10, %v732_v32, %v470_v62  ;;  %vm502_vm14 = vweird.f32 %v738_v61 }
  0x44   : > { %v479_v41 = vsel %vm993_vm5, %v478_v38, %v474_v63  ;;  %v485_v17 = vadd.f32 %v734_v31, %v484_v0  ;;  %v740_v19 = vpop.eup %739  ;;  %v327_v33 = vadd.f32 %v319_v13, %v301_v14  ;;  %vm1070_vm0 = vmor %vm501_vm13, %vm502_vm14  ;;  %vm516_vm1 = vweird.f32 %v1014_v43 }
  0x45   : > { %580 = vst.msk [vmem:[%s1027_s15] sm:$0xff] %vm579_vm4, %v571_v10  ;;  %v498_v1 = vsub.f32 1.0, %v497_v12  ;;  %v572_v20 = vmul.f32 %v479_v41, %v919_v56  ;;  %v448_v32 = vadd.f32 1.0, %v740_v19  ;;  %v439_v34 = vmul.f32 1.442695, %v425_v24 }
  0x46   : > { %v489_v2 = vsel %vm1039_vm12, %v734_v31, %v485_v17  ;;  %v742_v5 = vpop.eup %741  ;;  %v346_v35 = vmul.f32 %v825_v6, %v682_v18  ;;  %v372_v38 = vmul.f32 %v835_v7, %v690_v25  ;;  %v520_v29 = vand.u32 2147483647, %v1014_v43 }
  0x47   : > { %v499_v30 = vmul.f32 %v738_v61, %v498_v1  ;;  %581 = vst.msk [vmem:[%s1027_s15 + $0x8] sm:$0xff] %vm579_vm4, %v572_v20  ;;  %v494_v56 = vsel %vm999_vm7, %v493_v48, %v489_v2  ;;  %v512_v37 = vmul.f32 %v742_v5, %v1014_v43  ;;  %vm517_vm2 = vweird.f32 %v742_v5 }
  0x48   : > { %v573_v26 = vmul.f32 %v494_v56, %v926_v11  ;;  %v522_v40 = vand.u32 2147483648, %v1014_v43  ;;  %743 = vrcp.f32 %v448_v32  ;;  %v354_v11 = vadd.f32 %v346_v35, %v327_v33  ;;  %vm518_vm3 = vmor %vm516_vm1, %vm517_vm2 }
  0x49   : > { %v500_v36 = vadd.f32 %v738_v61, %v499_v30  ;;  %v513_v44 = vsub.f32 1.0, %v512_v37  ;;  %745 = vpow2.f32 %v439_v34  ;;  %v398_v7 = vmul.f32 %v840_v8, %v698_v39 }
  0x4a   : > { %582 = vst.msk [vmem:[%s1027_s15 + $0x10] sm:$0xff] %vm579_vm4, %v573_v26  ;;  %v380_v48 = vadd.f32 %v372_v38, %v354_v11  ;;  %v523_v49 = vor.u32 1.1754944e-38, %v522_v40  ;;  %vm521_vm5 = vcmp.eq.f32.partialorder %v520_v29, 8.507059e+37  ;;  %vm531_vm6 = vweird.f32 %v448_v32 }
  0x4b   : > { %v504_v6 = vsel %vm1070_vm0, %v738_v61, %v500_v36  ;;  %v514_v47 = vmul.f32 %v742_v5, %v513_v44  ;;  %v535_v57 = vand.u32 2147483647, %v448_v32  ;;  %v537_v58 = vand.u32 2147483648, %v448_v32 }
  0x4c   : > { %v509_v31 = vsel %vm1055_vm15, %v508_v22, %v504_v6  ;;  %v406_v51 = vadd.f32 %v398_v7, %v380_v48 }
  0x4d   : > { %v574_v3 = vmul.f32 %v509_v31, %v936_v28  ;;  %v515_v50 = vadd.f32 %v742_v5, %v514_v47  ;;  %v538_v62 = vor.u32 1.1754944e-38, %v537_v58  ;;  %vm536_vm9 = vcmp.eq.f32.partialorder %v535_v57, 8.507059e+37 }
  0x4e   : > { %v744_v52 = vpop.eup %743  ;;  %v418_v8 = vadd.f32 %v896_v23, %v406_v51 }
  0x4f   : > { %583 = vst.msk [vmem:[%s1027_s15 + $0x18] sm:$0xff] %vm579_vm4, %v574_v3  ;;  %v746_v42 = vpop.eup %745  ;;  %v519_v53 = vsel %vm518_vm3, %v742_v5, %v515_v50  ;;  %v527_v54 = vmul.f32 %v744_v52, %v448_v32  ;;  %vm532_vm7 = vweird.f32 %v744_v52 }
  0x50   : > { %v524_v28 = vsel %vm521_vm5, %v523_v49, %v519_v53  ;;  %v449_v59 = vadd.f32 1.0, %v746_v42  ;;  %v426_v46 = vsub.f32 0.0, %v418_v8  ;;  %vm533_vm8 = vmor %vm531_vm6, %vm532_vm7 }
  0x51   : > { %v575_v43 = vmul.f32 %v524_v28, %v946_v45  ;;  %v528_v60 = vsub.f32 1.0, %v527_v54 }
  0x52   : > { %747 = vrcp.f32 %v449_v59  ;;  %v441_v4 = vmul.f32 1.442695, %v426_v46  ;;  %v552_v14 = vand.u32 2147483648, %v449_v59  ;;  %vm546_vm10 = vweird.f32 %v449_v59 }
  0x53   : > { %584 = vst.msk [vmem:[%s1027_s15 + $0x20] sm:$0xff] %vm579_vm4, %v575_v43  ;;  %v529_v61 = vmul.f32 %v744_v52, %v528_v60  ;;  %v550_v41 = vand.u32 2147483647, %v449_v59 }
  0x54   : > { %749 = vpow2.f32 %v441_v4  ;;  %v553_v13 = vor.u32 1.1754944e-38, %v552_v14 }
  0x55   : > { %v530_v55 = vadd.f32 %v744_v52, %v529_v61  ;;  %vm551_vm13 = vcmp.eq.f32.partialorder %v550_v41, 8.507059e+37 }
  0x57   : > { %v534_v23 = vsel %vm533_vm8, %v744_v52, %v530_v55 }
  0x58   : > { %v748_v10 = vpop.eup %747  ;;  %v539_v0 = vsel %vm536_vm9, %v538_v62, %v534_v23 }
  0x59   : > { %v576_v12 = vmul.f32 %v539_v0, %v985_v27  ;;  %v542_v45 = vmul.f32 %v748_v10, %v449_v59  ;;  %vm547_vm11 = vweird.f32 %v748_v10 }
  0x5a   : > { %v750_v63 = vpop.eup %749  ;;  %vm548_vm12 = vmor %vm546_vm10, %vm547_vm11 }
  0x5b   : > { %585 = vst.msk [vmem:[%s1027_s15 + $0x28] sm:$0xff] %vm579_vm4, %v576_v12  ;;  %v543_v15 = vsub.f32 1.0, %v542_v45  ;;  %v450_v17 = vadd.f32 1.0, %v750_v63 }
  0x5d   : > { %v544_v1 = vmul.f32 %v748_v10, %v543_v15  ;;  %751 = vrcp.f32 %v450_v17  ;;  %v567_v24 = vand.u32 2147483648, %v450_v17  ;;  %vm561_vm14 = vweird.f32 %v450_v17 }
  0x5e   : > { %v565_v2 = vand.u32 2147483647, %v450_v17 }
  0x5f   : > { %v545_v18 = vadd.f32 %v748_v10, %v544_v1  ;;  %v568_v32 = vor.u32 1.1754944e-38, %v567_v24 }
  0x60   : > { %vm566_vm1 = vcmp.eq.f32.partialorder %v565_v2, 8.507059e+37 }
  0x61   : > { %v549_v19 = vsel %vm548_vm12, %v748_v10, %v545_v18 }
  0x62   : > { %v554_v20 = vsel %vm551_vm13, %v553_v13, %v549_v19 }
  0x63   : > { %v577_v27 = vmul.f32 %v554_v20, %v1045_v16  ;;  %v752_v21 = vpop.eup %751 }
  0x64   : > { %v557_v22 = vmul.f32 %v752_v21, %v450_v17  ;;  %vm562_vm15 = vweird.f32 %v752_v21 }
  0x65   : > { %586 = vst.msk [vmem:[%s1027_s15 + $0x30] sm:$0xff] %vm579_vm4, %v577_v27  ;;  %vm563_vm0 = vmor %vm561_vm14, %vm562_vm15 }
  0x66   : > { %v558_v25 = vsub.f32 1.0, %v557_v22 }
  0x68   : > { %v559_v30 = vmul.f32 %v752_v21, %v558_v25 }
  0x6a   : > { %v560_v33 = vadd.f32 %v752_v21, %v559_v30 }
  0x6c   : > { %v564_v5 = vsel %vm563_vm0, %v752_v21, %v560_v33 }
  0x6d   : > { %v569_v56 = vsel %vm566_vm1, %v568_v32, %v564_v5 }
  0x6e   : > { %v578_v9 = vmul.f32 %v569_v56, %v418_v8 }
  0x70   : > { %587 = vst.msk [vmem:[%s1027_s15 + $0x38] sm:$0xff] %vm579_vm4, %v578_v9 }
  0x71 PF: > { %s13_s12 = sadd.s32 1, %s759_s12  }
  0x72   : > { %p10_p4 = scmp.ge.s32.totalorder %s13_s12, 4  }
  0x74   :  { %12 = sbr.rel (!%p10_p4) target bundleno = 1 (0x1), region = 64 }

// kernel: ss2d_forward.9
= control target key start
LH: loop header
LB: loop body
LE: loop exit
PB: predicated region body
PF: predicated region fallthrough
CT: control target
= control target key end

     0   :  { %s1286_s24 = smov 0   ;;  %s1288_s25 = smov 0   ;;  %s1522_s0 = inlined_call_operand.vmem [shape: f32[2,4,64,64], index: 0, kind: input, shape index: {}]   ;;  %s1523_s1 = inlined_call_operand.vmem [shape: f32[2,4,64,64], index: 1, kind: input, shape index: {}]   ;;  %s1524_s2 = inlined_call_operand.vmem [shape: f32[4,16,64], index: 2, kind: input, shape index: {}]   ;;  %s1525_s3 = inlined_call_operand.vmem [shape: f32[2,4,64,16], index: 3, kind: input, shape index: {}]   ;;  %s1526_s4 = inlined_call_operand.vmem [shape: f32[2,4,64,16], index: 4, kind: input, shape index: {}]   ;;  %s1527_s5 = inlined_call_operand.vmem [shape: f32[4,1,64], index: 5, kind: input, shape index: {}]   ;;  %s1528_s6 = inlined_call_operand.vmem [shape: f32[4,1,64], index: 6, kind: input, shape index: {}]   ;;  %s1529_s7 = inlined_call_operand.vmem [shape: f32[2,4,64,64], index: 7, kind: output, shape index: {}]  }
   0x1   :  { %s1290_s26 = smov 0   ;;  %s1292_s27 = smov 0  }
   0x2   :  { %s1294_s28 = smov 0  }
   0x3 LB: > { %s26_s29 = sadd.s32 1, %s1223_s26  ;;  %s29_s30 = sadd.s32 1, %s1227_s27  ;;  %s1231_s28 = sphi %s1294_s28, %s17_s28   ;;  %s1227_s27 = sphi %s1292_s27, %s1533_s27   ;;  %s1223_s26 = sphi %s1290_s26, %s1532_s26   ;;  %s1219_s25 = sphi %s1288_s25, %s1531_s25   ;;  %s1215_s24 = sphi %s1286_s24, %s1530_s24  }
   0x4   : > { %p27_p0 = scmp.ge.s32.totalorder %s26_s29, 4  ;;  %p1052_p1 = scmp.ge.s32.totalorder %s1231_s28, 1 }
   0x5   : > { %p331_p2 = scmp.lt.s32.totalorder %s1231_s28, 9 }
   0x6   : > { %s1535_s29 = smov (%p27_p0, %s26_s29), 0  ;;  %s1537_s30 = smov (!%p27_p0, %s29_s30), %s1227_s27 }
   0x7   : > { %p332_p3 = pnand %p1052_p1, %p331_p2  ;;  %p31_p4 = scmp.ge.s32.totalorder %s1537_s30, 2 }
   0x8   : > { %p409_p5 = scmp.lt.s32.totalorder (!%p332_p3), %s1219_s25, 1  ;;  %p411_p6 = scmp.lt.s32.totalorder (!%p332_p3), %s1215_s24, 3 }
   0x9   : > { %s1539_s30 = smov (%p31_p4, %s1537_s30), 0  ;;  %335 = sbr.rel (%p332_p3) target bundleno = 361 (0x169), region = 48 }
   0xa   : > { %s1433_s22 = smov (!%p332_p3), 0  }
   0xe   : > { %s1541_s25 = smov (!%p409_p5, %s1219_s25), 1  ;;  %s1543_s24 = smov (!%p411_p6, %s1215_s24), 3  ;;  %v584_v34 = vlaneseq  ;;  %v1245_v42 = vmov 0.0   ;;  %vm557_vm3 = vcmask 523264  }
   0xf   : > { %s1054_s8 = sshll.u32 %s1541_s25, 5  ;;  %s1053_s9 = sshll.u32 %s1543_s24, 3 }
  0x10   : > { %s1074_s10 = sshll.u32 %s1543_s24, 4  ;;  %s415_s11 = sadd.s32 %s1054_s8, %s1053_s9  ;;  %v585_v36 = vshrl.u32 %v584_v34, 7  ;;  %v588_v37 = vand.u32 127, %v584_v34 }
  0x11   : > { %s431_s14 = scalar_lea.vmem %s1524_s2, %s1074_s10  ;;  %s1323_s15 = sshll.u32 %s415_s11, 3 }
  0x12   : > { %s452_s18 = scalar_lea.vmem %s1527_s5, %s1543_s24  ;;  %v1329_v0 = vld [vmem:[%s431_s14] sm:$0xff]  ;;  %v1331_v1 = vld [vmem:[%s431_s14 + $0x8] sm:$0xff]  ;;  %s426_s21 = scalar_lea.vmem %s1523_s1, %s1323_s15  ;;  %v586_v39 = vadd.s32 8, %v585_v36  ;;  %vm589_vm0 = vcmp.eq.s32.totalorder %v585_v36, %v588_v37 }
  0x13   : > { %s440_s25 = scalar_lea.vmem %s1525_s3, %s1323_s15  ;;  %s449_s10 = scalar_lea.vmem %s1526_s4, %s1323_s15  ;;  %v473_v2 = vld [vmem:[%s426_s21] sm:$0xff]  ;;  %v474_v3 = vld [vmem:[%s426_s21 + $0x8] sm:$0xff]  ;;  %v475_v4 = vld [vmem:[%s426_s21 + $0x10] sm:$0xff]  ;;  %v1379_v43 = vsel %vm589_vm0, 1.0, %v1245_v42 }
  0x14   : > { %s455_s13 = scalar_lea.vmem %s1528_s6, %s1543_s24  ;;  %s1353_s17 = scalar_lea.vmem %s1529_s7, %s1323_s15  ;;  %v476_v6 = vld [vmem:[%s426_s21 + $0x18] sm:$0xff]  ;;  %v477_v7 = vld [vmem:[%s426_s21 + $0x20] sm:$0xff]  ;;  %v478_v8 = vld [vmem:[%s426_s21 + $0x28] sm:$0xff]  ;;  %vm590_vm1 = vcmp.eq.s32.totalorder %v586_v39, %v588_v37  ;;  %v1431_v37 = vmov 0.0  }
  0x15   : > { %v1140_v5 = vld [vmem:[%s455_s13] ss:$0 sm:$0xff]  ;;  %v479_v9 = vld [vmem:[%s426_s21 + $0x30] sm:$0xff]  ;;  %v480_v14 = vld [vmem:[%s426_s21 + $0x38] sm:$0xff]  ;;  %v1381_v48 = vsel %vm590_vm1, 1.0, %v1245_v42  ;;  %s1390_s21 = scalar_lea.vmem %s1522_s0, %s1323_s15 }
  0x16   : > { %v1355_v10 = vadd.f32 %v1140_v5, %v473_v2  ;;  %v1357_v11 = vadd.f32 %v1140_v5, %v474_v3  ;;  %v1359_v12 = vadd.f32 %v1140_v5, %v475_v4  ;;  %v1361_v13 = vadd.f32 %v1140_v5, %v476_v6  ;;  %v472_v34 = vld [vmem:[%s1390_s21 + $0x38] sm:$0xff] }
  0x17   : > { %v1363_v15 = vadd.f32 %v1140_v5, %v477_v7  ;;  %v1365_v16 = vadd.f32 %v1140_v5, %v478_v8  ;;  %v1369_v19 = vadd.f32 %v1140_v5, %v479_v9  ;;  %v1373_v22 = vadd.f32 %v1140_v5, %v480_v14 }
  0x18   : > { %v493_v17 = vmin.f32 %v1355_v10, 20.0  ;;  %v494_v18 = vmin.f32 %v1357_v11, 20.0  ;;  %v495_v20 = vmin.f32 %v1359_v12, 20.0  ;;  %v496_v21 = vmin.f32 %v1361_v13, 20.0 }
  0x19   : > { %v497_v25 = vmin.f32 %v1363_v15, 20.0  ;;  %v498_v28 = vmin.f32 %v1365_v16, 20.0  ;;  %v499_v30 = vmin.f32 %v1369_v19, 20.0  ;;  %v500_v32 = vmin.f32 %v1373_v22, 20.0 }
  0x1a   : > { %v509_v23 = vmul.f32 1.442695, %v493_v17  ;;  %v511_v24 = vmul.f32 1.442695, %v494_v18  ;;  %v513_v26 = vmul.f32 1.442695, %v495_v20 }
  0x1b   : > { %v515_v27 = vmul.f32 1.442695, %v496_v21  ;;  %v517_v29 = vmul.f32 1.442695, %v497_v25  ;;  %v519_v31 = vmul.f32 1.442695, %v498_v28 }
  0x1c   : > { %1141 = vpow2.f32 %v509_v23  ;;  %v521_v33 = vmul.f32 1.442695, %v499_v30  ;;  %v523_v35 = vmul.f32 1.442695, %v500_v32  ;;  %vm501_vm2 = vcmp.gt.f32.partialorder %v1355_v10, 20.0  ;;  %v466_v18 = vld [vmem:[%s1390_s21 + $0x8] sm:$0xff] }
  0x1d   : > { %1143 = vpow2.f32 %v511_v24  ;;  %vm502_vm4 = vcmp.gt.f32.partialorder %v1357_v11, 20.0  ;;  %vm503_vm5 = vcmp.gt.f32.partialorder %v1359_v12, 20.0  ;;  %vm504_vm6 = vcmp.gt.f32.partialorder %v1361_v13, 20.0  ;;  %v467_v23 = vld [vmem:[%s1390_s21 + $0x10] sm:$0xff] }
  0x1e   : > { %1145 = vpow2.f32 %v513_v26  ;;  %vm505_vm7 = vcmp.gt.f32.partialorder %v1363_v15, 20.0  ;;  %vm506_vm8 = vcmp.gt.f32.partialorder %v1365_v16, 20.0  ;;  %vm507_vm9 = vcmp.gt.f32.partialorder %v1369_v19, 20.0  ;;  %v468_v26 = vld [vmem:[%s1390_s21 + $0x18] sm:$0xff] }
  0x1f   : > { %1147 = vpow2.f32 %v515_v27  ;;  %vm508_vm10 = vcmp.gt.f32.partialorder %v1373_v22, 20.0 }
  0x20   : > { %1149 = vpow2.f32 %v517_v29 }
  0x21   : > { %1151 = vpow2.f32 %v519_v31  ;;  %v470_v31 = vld [vmem:[%s1390_s21 + $0x28] sm:$0xff] }
  0x22   : > { %v1142_v38 = vpop.eup %1141  ;;  %1153 = vpow2.f32 %v521_v33 }
  0x23   : > { %v1144_v40 = vpop.eup %1143  ;;  %v525_v41 = vadd.f32 1.0, %v1142_v38  ;;  %1155 = vpow2.f32 %v523_v35 }
  0x24   : > { %v1146_v44 = vpop.eup %1145  ;;  %v526_v45 = vadd.f32 1.0, %v1144_v40 }
  0x25   : > { %v1148_v46 = vpop.eup %1147  ;;  %1157 = vlog2.f32 %v525_v41  ;;  %v527_v47 = vadd.f32 1.0, %v1146_v44 }
  0x26   : > { %v1150_v49 = vpop.eup %1149  ;;  %1159 = vlog2.f32 %v526_v45  ;;  %v528_v50 = vadd.f32 1.0, %v1148_v46 }
  0x27   : > { %v1152_v51 = vpop.eup %1151  ;;  %1161 = vlog2.f32 %v527_v47  ;;  %v529_v52 = vadd.f32 1.0, %v1150_v49 }
  0x28   : > { %v1154_v53 = vpop.eup %1153  ;;  %1163 = vlog2.f32 %v528_v50  ;;  %v530_v54 = vadd.f32 1.0, %v1152_v51 }
  0x29   : > { %v1156_v55 = vpop.eup %1155  ;;  %1165 = vlog2.f32 %v529_v52  ;;  %v531_v56 = vadd.f32 1.0, %v1154_v53 }
  0x2a   : > { %1167 = vlog2.f32 %v530_v54  ;;  %v532_v57 = vadd.f32 1.0, %v1156_v55 }
  0x2b   : > { %v1158_v58 = vpop.eup %1157  ;;  %1169 = vlog2.f32 %v531_v56 }
  0x2c   : > { %v1160_v59 = vpop.eup %1159  ;;  %v534_v60 = vmul.f32 0.6931472, %v1158_v58  ;;  %1171 = vlog2.f32 %v532_v57 }
  0x2d   : > { %v1162_v61 = vpop.eup %1161  ;;  %v536_v62 = vmul.f32 0.6931472, %v1160_v59 }
  0x2e   : > { %v1164_v63 = vpop.eup %1163  ;;  %v549_v2 = vsel %vm501_vm2, %v1355_v10, %v534_v60  ;;  %v538_v3 = vmul.f32 0.6931472, %v1162_v61  ;;  %v465_v10 = vld [vmem:[%s1390_s21] sm:$0xff] }
  0x2f   : > { %v1166_v4 = vpop.eup %1165  ;;  %558 = vst.msk [vmem:[#allocation2] sm:$0xff] %vm557_vm3, %v549_v2  ;;  %v550_v5 = vsel %vm502_vm4, %v1357_v11, %v536_v62  ;;  %v540_v6 = vmul.f32 0.6931472, %v1164_v63  ;;  %v566_v25 = vmul.f32 %v549_v2, %v465_v10 }
  0x30   : > { %v1168_v7 = vpop.eup %1167  ;;  %559 = vst.msk [vmem:[#allocation2 + $0x8] sm:$0xff] %vm557_vm3, %v550_v5  ;;  %v551_v8 = vsel %vm503_vm5, %v1359_v12, %v538_v3  ;;  %v542_v9 = vmul.f32 0.6931472, %v1166_v4  ;;  %v567_v28 = vmul.f32 %v550_v5, %v466_v18 }
  0x31   : > { %v1170_v14 = vpop.eup %1169  ;;  %560 = vst.msk [vmem:[#allocation2 + $0x10] sm:$0xff] %vm557_vm3, %v551_v8  ;;  %v552_v17 = vsel %vm504_vm6, %v1361_v13, %v540_v6  ;;  %v544_v11 = vmul.f32 0.6931472, %v1168_v7  ;;  %v568_v30 = vmul.f32 %v551_v8, %v467_v23 }
  0x32   : > { %v1172_v20 = vpop.eup %1171  ;;  %561 = vst.msk [vmem:[#allocation2 + $0x18] sm:$0xff] %vm557_vm3, %v552_v17  ;;  %v553_v12 = vsel %vm505_vm7, %v1363_v15, %v542_v9  ;;  %v546_v21 = vmul.f32 0.6931472, %v1170_v14  ;;  %v469_v15 = vld [vmem:[%s1390_s21 + $0x20] sm:$0xff]  ;;  %v569_v32 = vmul.f32 %v552_v17, %v468_v26 }
  0x33   : > { %562 = vst.msk [vmem:[#allocation2 + $0x20] sm:$0xff] %vm557_vm3, %v553_v12  ;;  %v554_v13 = vsel %vm506_vm8, %v1365_v16, %v544_v11  ;;  %v548_v24 = vmul.f32 0.6931472, %v1172_v20  ;;  %v471_v16 = vld [vmem:[%s1390_s21 + $0x30] sm:$0xff]  ;;  %v570_v33 = vmul.f32 %v553_v12, %v469_v15 }
  0x34   : > { %563 = vst.msk [vmem:[#allocation2 + $0x28] sm:$0xff] %vm557_vm3, %v554_v13  ;;  %v555_v27 = vsel %vm507_vm9, %v1369_v19, %v546_v21  ;;  %v571_v35 = vmul.f32 %v554_v13, %v470_v31 }
  0x35   : > { %564 = vst.msk [vmem:[#allocation2 + $0x30] sm:$0xff] %vm557_vm3, %v555_v27  ;;  %v556_v29 = vsel %vm508_vm10, %v1373_v22, %v548_v24  ;;  %v572_v19 = vmul.f32 %v555_v27, %v471_v16  ;;  %v1429_v22 = vmov 0.0  }
  0x36   : > { %565 = vst.msk [vmem:[#allocation2 + $0x38] sm:$0xff] %vm557_vm3, %v556_v29  ;;  %v573_v36 = vmul.f32 %v556_v29, %v472_v34 }
  0x37   : > { %574 = vst.msk [vmem:[#allocation3] sm:$0xff] %vm557_vm3, %v566_v25 }
  0x38   : > { %575 = vst.msk [vmem:[#allocation3 + $0x8] sm:$0xff] %vm557_vm3, %v567_v28 }
  0x39   : > { %576 = vst.msk [vmem:[#allocation3 + $0x10] sm:$0xff] %vm557_vm3, %v568_v30 }
  0x3a   : > { %577 = vst.msk [vmem:[#allocation3 + $0x18] sm:$0xff] %vm557_vm3, %v569_v32 }
  0x3b   : > { %578 = vst.msk [vmem:[#allocation3 + $0x20] sm:$0xff] %vm557_vm3, %v570_v33 }
  0x3c   : > { %579 = vst.msk [vmem:[#allocation3 + $0x28] sm:$0xff] %vm557_vm3, %v571_v35 }
  0x3d   : > { %580 = vst.msk [vmem:[#allocation3 + $0x30] sm:$0xff] %vm557_vm3, %v572_v19 }
  0x3e   : > { %581 = vst.msk [vmem:[#allocation3 + $0x38] sm:$0xff] %vm557_vm3, %v573_v36 }
  0x3f LB: >> { %s607_s9 = scalar_lea.vmem %s440_s25, %s1243_s22  ;;  %vm621_vm11 = vcmask 130048   ;;  %s603_s11 = scalar_lea.vmem [#allocation2], %s1243_s22  ;;  %vm798_vm12 = vcmask 516096   ;;  %s1243_s22 = sphi %s1433_s22, %s600_s22   ;;  %v1239_v37 = vphi %v1431_v37, %v633_v37   ;;  %v1235_v22 = vphi %v1429_v22, %v634_v22  }
  0x40   : >> { %v1173_v38 = vld [vmem:[%s607_s9] ss:$0 sm:$0xff]  ;;  %s605_s12 = scalar_lea.vmem [#allocation3], %s1243_s22  ;;  %s609_s16 = scalar_lea.vmem %s449_s10, %s1243_s22 }
  0x41   : >> { %v620_v39 = vmul.f32 %v1173_v38, %v1381_v48  ;;  %v619_v41 = vmul.f32 %v1173_v38, %v1379_v43  ;;  %v1174_v44 = vld [vmem:[%s603_s11] ss:$0 sm:$0xff]  ;;  %s797_s19 = scalar_lea.vmem %s1353_s17, %s1243_s22  ;;  %s600_s22 = sadd.s32 1, %s1243_s22  }
  0x42   : >> { %v613_v45 = vmul.f32 %v1174_v44, %v1331_v1  ;;  %v612_v47 = vmul.f32 %v1174_v44, %v1329_v0  ;;  %v610_v49 = vld [vmem:[%s609_s16] sm:$0x1]  ;;  %p597_p7 = scmp.ge.s32.totalorder %s600_s22, 64  }
  0x43   : >> { %v625_v40 = vsel %vm621_vm11, %v620_v39, 0.0  ;;  %v622_v42 = vsel %vm621_vm11, %v619_v41, 0.0  ;;  %v636_v50 = vsel %vm621_vm11, %v610_v49, 0  ;;  %v808_v15 = vld [vmem:[%s1390_s21] sm:$0xff] (%p597_p7)  ;;  %v809_v31 = vld [vmem:[%s1390_s21 + $0x8] sm:$0xff] (%p597_p7)  ;;  %v810_v43 = vld [vmem:[%s1390_s21 + $0x10] sm:$0xff] (%p597_p7) }
  0x44   : >> { %626 = vadd.xlane.f32.xlu0 %v625_v40  ;;  %v616_v46 = vmul.f32 1.442695, %v613_v45  ;;  %v614_v51 = vmul.f32 1.442695, %v612_v47  ;;  %v656_v53 = vand.u32 4294901760, %v636_v50  ;;  %v811_v34 = vld [vmem:[%s1390_s21 + $0x18] sm:$0xff] (%p597_p7) }
  0x45   : >> { %v1175_v54 = vld [vmem:[%s605_s12] ss:$0 sm:$0xff]  ;;  %v814_v44 = vld [vmem:[%s1390_s21 + $0x30] sm:$0xff] (%p597_p7)  ;;  %v815_v45 = vld [vmem:[%s1390_s21 + $0x38] sm:$0xff] (%p597_p7) }
  0x46   : >> { %1176 = vpow2.f32 %v616_v46  ;;  %v657_v58 = vsub.f32 %v636_v50, %v656_v53  ;;  %v1180_v30 = vld [vmem:[%s452_s18] ss:$0 sm:$0xff] (%p597_p7) }
  0x47   : >> { %1178 = vpow2.f32 %v614_v51  ;;  %v820_v48 = vmul.f32 (%p597_p7), %v1180_v30, %v808_v15  ;;  %v821_v32 = vmul.f32 (%p597_p7), %v1180_v30, %v809_v31  ;;  %v822_v16 = vmul.f32 (%p597_p7), %v1180_v30, %v810_v43  ;;  %v812_v35 = vld [vmem:[%s1390_s21 + $0x20] sm:$0xff] (%p597_p7) }
  0x48   : >> { %v658_v61 = vand.u32 4294901760, %v657_v58  ;;  %v823_v19 = vmul.f32 (%p597_p7), %v1180_v30, %v811_v34  ;;  %v826_v49 = vmul.f32 (%p597_p7), %v1180_v30, %v814_v44  ;;  %v827_v50 = vmul.f32 (%p597_p7), %v1180_v30, %v815_v45 }
  0x4a   : >> { %v659_v5 = vsub.f32 %v657_v58, %v658_v61 }
  0x4c   : >> { %623 = vadd.xlane.f32.xlu0 %v622_v42  ;;  %v1177_v52 = vpop.eup %1176  ;;  %v660_v9 = vand.u32 4294901760, %v659_v5 }
  0x4d   : >> { %v629_v55 = vmul.f32 %v1235_v22, %v1177_v52  ;;  %v1179_v59 = vpop.eup %1178 }
  0x4e   : >> { %v628_v62 = vmul.f32 %v1239_v37, %v1179_v59 }
  0xb7   : >> { %v627_v56 = vpop.xlane.xlu0 %626 }
  0xb8   : >> { %v632_v57 = vmul.f32 %v1175_v54, %v627_v56 }
  0xba   : >> { %v634_v22 = vadd.f32 %v632_v57, %v629_v55  }
  0xbc   : >> { %v652_v60 = vand.u32 4294901760, %v634_v22 }
  0xbe   : >> { %653 = vmatpush.msra.mxu0 %v652_v60  ;;  %737 = vmatpush.msra.mxu3 %v652_v60  ;;  %v680_v63 = vsub.f32 %v634_v22, %v652_v60  ;;  %v824_v22 = vmul.f32 (%p597_p7), %v1180_v30, %v812_v35 }
  0xbf   : >> { %v624_v2 = vpop.xlane.xlu0 %623 }
  0xc0   : >> { %v631_v3 = vmul.f32 %v1175_v54, %v624_v2  ;;  %712 = vmatpush.msra.mxu2 %v680_v63  ;;  %v681_v4 = vand.u32 4294901760, %v680_v63 }
  0xc2   : >> { %v633_v37 = vadd.f32 %v631_v3, %v628_v62   ;;  %v682_v6 = vsub.f32 %v680_v63, %v681_v4 }
  0xc4   : >> { %v654_v7 = vand.u32 4294901760, %v633_v37  ;;  %v683_v8 = vand.u32 4294901760, %v682_v6 }
  0xc6   : >> { %655 = vmatpush.msra.mxu0 %v654_v7  ;;  %684 = vmatpush.msra.mxu1 %v683_v8  ;;  %v686_v10 = vsub.f32 %v633_v37, %v654_v7  ;;  %v813_v37 = vld [vmem:[%s1390_s21 + $0x28] sm:$0xff] (%p597_p7) }
  0xc7   : >> { %739 = vmatpush.msra.mxu3 %v654_v7  ;;  %661 = vmatmul.f32.vlgmr.msra.gmra.mxu0 %v660_v9  ;;  %v825_v42 = vmul.f32 (%p597_p7), %v1180_v30, %v813_v37 }
  0xc8   : >> { %764 = vmatpush.msrb.mxu0 %v681_v4  ;;  %715 = vmatpush.msra.mxu2 %v686_v10  ;;  %v687_v14 = vand.u32 4294901760, %v686_v10 }
  0xc9   : >> { %718 = vmatmul.f32.vlgmr.msra.gmra.mxu2 %v657_v58  ;;  %743 = vmatmul.f32.vlgmr.msra.gmra.mxu3 %v658_v61 }
  0xca   : >> { %768 = vmatpush.msrb.mxu0 %v687_v14  ;;  %v688_v17 = vsub.f32 %v686_v10, %v687_v14 }
  0xcc   : >> { %v689_v11 = vand.u32 4294901760, %v688_v17 }
  0xce   : >> { %690 = vmatpush.msra.mxu1 %v689_v11 }
  0xcf   : >> { %692 = vmatmul.f32.vlgmr.msra.gmra.mxu1 %v656_v53  ;;  %770 = vmatmul.f32.vlgmr.msrb.gmra.mxu0 %v656_v53 }
  0xd0   : >> { %789 = vmatpush.msrb.mxu1 %v652_v60 }
  0xd2   : >> { %791 = vmatpush.msrb.mxu1 %v654_v7 }
  0xd7   : >> { %793 = vmatmul.f32.vlgmr.msrb.gmra.mxu1 %v656_v53 }
 0x144   : >> { %v662_v18 = vpop.f32.mrf.mxu0 }
 0x14c   : >> { %v693_v20 = vpop.f32.mrf.mxu1  ;;  %v719_v12 = vpop.f32.mrf.mxu2 }
 0x14d   : >> { %v694_v21 = vadd.f32 %v693_v20, %v662_v18  ;;  %v744_v23 = vpop.f32.mrf.mxu3  ;;  %v771_v24 = vpop.f32.mrf.mxu0 }
 0x14f   : >> { %v720_v13 = vadd.f32 %v719_v12, %v694_v21 }
 0x151   : >> { %v745_v25 = vadd.f32 %v744_v23, %v720_v13 }
 0x153   : >> { %v772_v26 = vadd.f32 %v771_v24, %v745_v25  ;;  %599 = sbr.rel (!%p597_p7) target bundleno = 63 (0x3f), region = 108 }
 0x154   : >> { %v794_v27 = vpop.f32.mrf.mxu1 }
 0x155   : >> { %v795_v28 = vadd.f32 %v794_v27, %v772_v26 }
 0x157   : >> { %799 = vst.msk [vmem:[%s797_s19] sm:$0x1] %vm798_vm12, %v795_v28 }
 0x15e   : > { %v800_v29 = vld [vmem:[%s1353_s17] sm:$0xff]  ;;  %v801_v0 = vld [vmem:[%s1353_s17 + $0x8] sm:$0xff]  ;;  %v802_v1 = vld [vmem:[%s1353_s17 + $0x10] sm:$0xff] }
 0x15f   : > { %v803_v33 = vld [vmem:[%s1353_s17 + $0x18] sm:$0xff]  ;;  %v804_v36 = vld [vmem:[%s1353_s17 + $0x20] sm:$0xff]  ;;  %v828_v38 = vadd.f32 %v820_v48, %v800_v29  ;;  %v829_v39 = vadd.f32 %v821_v32, %v801_v0  ;;  %v830_v40 = vadd.f32 %v822_v16, %v802_v1  ;;  %v805_v41 = vld [vmem:[%s1353_s17 + $0x28] sm:$0xff] }
 0x160   : > { %v831_v46 = vadd.f32 %v823_v19, %v803_v33  ;;  %v806_v47 = vld [vmem:[%s1353_s17 + $0x30] sm:$0xff]  ;;  %v832_v51 = vadd.f32 %v824_v22, %v804_v36  ;;  %v807_v52 = vld [vmem:[%s1353_s17 + $0x38] sm:$0xff]  ;;  %v833_v53 = vadd.f32 %v825_v42, %v805_v41 }
 0x161   : > { %836 = vst.msk [vmem:[%s1353_s17] sm:$0xff] %vm557_vm3, %v828_v38  ;;  %v834_v54 = vadd.f32 %v826_v49, %v806_v47  ;;  %v835_v55 = vadd.f32 %v827_v50, %v807_v52 }
 0x162   : > { %837 = vst.msk [vmem:[%s1353_s17 + $0x8] sm:$0xff] %vm557_vm3, %v829_v39 }
 0x163   : > { %838 = vst.msk [vmem:[%s1353_s17 + $0x10] sm:$0xff] %vm557_vm3, %v830_v40 }
 0x164   : > { %839 = vst.msk [vmem:[%s1353_s17 + $0x18] sm:$0xff] %vm557_vm3, %v831_v46 }
 0x165   : > { %840 = vst.msk [vmem:[%s1353_s17 + $0x20] sm:$0xff] %vm557_vm3, %v832_v51 }
 0x166   : > { %841 = vst.msk [vmem:[%s1353_s17 + $0x28] sm:$0xff] %vm557_vm3, %v833_v53 }
 0x167   : > { %842 = vst.msk [vmem:[%s1353_s17 + $0x30] sm:$0xff] %vm557_vm3, %v834_v54 }
 0x168   : > { %843 = vst.msk [vmem:[%s1353_s17 + $0x38] sm:$0xff] %vm557_vm3, %v835_v55 }
 0x169 PF: > { %s17_s28 = sadd.s32 1, %s1231_s28   ;;  %s1530_s24 = smov %s1223_s26 }
 0x16a   : > { %p14_p8 = scmp.ge.s32.totalorder %s17_s28, 10   ;;  %s1531_s25 = smov %s1227_s27 }
 0x16b   : > { %s1532_s26 = smov %s1535_s29  ;;  %s1533_s27 = smov %s1539_s30 }
 0x16c   :  { %16 = sbr.rel (!%p14_p8) target bundleno = 3 (0x3), region = 119 }

// kernel: ss2d_forward.10
= control target key start
LH: loop header
LB: loop body
LE: loop exit
PB: predicated region body
PF: predicated region fallthrough
CT: control target
= control target key end

     0   :  { %vm33_vm0 = vcmask 523264   ;;  %v906_v32 = vmov 64.0   ;;  %s1988_s0 = inlined_call_operand.vmem [shape: f32[128,64], index: 0, kind: input, shape index: {}]   ;;  %s1989_s2 = inlined_call_operand.vmem [shape: f32[1,64], index: 2, kind: input, shape index: {}]   ;;  %s1990_s3 = inlined_call_operand.vmem [shape: f32[1,64], index: 3, kind: input, shape index: {}]   ;;  %s1991_s1 = inlined_call_operand.vmem [shape: f32[128,64], index: 1, kind: input, shape index: {}]   ;;  %s1992_s4 = inlined_call_operand.vmem [shape: f32[128,64], index: 4, kind: output, shape index: {}]  }
   0x1   :  { %v935_v0 = vld [vmem:[%s1988_s0 + $0x20] sm:$0xff]  ;;  %v940_v1 = vld [vmem:[%s1988_s0 + $0x10] sm:$0xff]  ;;  %v956_v6 = vld [vmem:[%s1988_s0 + $0x28] sm:$0xff]  ;;  %808 = vrcp.f32 %v906_v32 }
   0x2   :  { %v945_v2 = vld [vmem:[%s1988_s0] sm:$0xff]  ;;  %v46_v3 = vsel %vm33_vm0, %v935_v0, 0.0  ;;  %v40_v4 = vsel %vm33_vm0, %v940_v1, 0.0  ;;  %v961_v7 = vld [vmem:[%s1988_s0 + $0x18] sm:$0xff]  ;;  %v966_v8 = vld [vmem:[%s1988_s0 + $0x8] sm:$0xff]  ;;  %v49_v9 = vsel %vm33_vm0, %v956_v6, 0.0 }
   0x3   :  { %v34_v5 = vsel %vm33_vm0, %v945_v2, 0.0  ;;  %47 = vadd.xlane.f32.xlu2 %v46_v3  ;;  %41 = vadd.xlane.f32.xlu1 %v40_v4  ;;  %v43_v10 = vsel %vm33_vm0, %v961_v7, 0.0  ;;  %v37_v11 = vsel %vm33_vm0, %v966_v8, 0.0  ;;  %v977_v12 = vld [vmem:[%s1988_s0 + $0x40] sm:$0xff]  ;;  %v982_v13 = vld [vmem:[%s1988_s0 + $0x38] sm:$0xff]  ;;  %v987_v14 = vld [vmem:[%s1988_s0 + $0x30] sm:$0xff] }
   0x4   :  { %35 = vadd.xlane.f32.xlu0 %v34_v5  ;;  %v58_v15 = vsel %vm33_vm0, %v977_v12, 0.0  ;;  %v55_v16 = vsel %vm33_vm0, %v982_v13, 0.0  ;;  %v52_v17 = vsel %vm33_vm0, %v987_v14, 0.0  ;;  %v998_v18 = vld [vmem:[%s1988_s0 + $0x58] sm:$0xff]  ;;  %v1003_v19 = vld [vmem:[%s1988_s0 + $0x50] sm:$0xff]  ;;  %v1008_v20 = vld [vmem:[%s1988_s0 + $0x48] sm:$0xff] }
   0x5   :  { %v67_v21 = vsel %vm33_vm0, %v998_v18, 0.0  ;;  %v64_v22 = vsel %vm33_vm0, %v1003_v19, 0.0  ;;  %v61_v23 = vsel %vm33_vm0, %v1008_v20, 0.0  ;;  %v1019_v24 = vld [vmem:[%s1988_s0 + $0x70] sm:$0xff]  ;;  %v1024_v25 = vld [vmem:[%s1988_s0 + $0x68] sm:$0xff]  ;;  %v1029_v26 = vld [vmem:[%s1988_s0 + $0x60] sm:$0xff] }
   0x6   :  { %v76_v27 = vsel %vm33_vm0, %v1019_v24, 0.0  ;;  %v73_v28 = vsel %vm33_vm0, %v1024_v25, 0.0  ;;  %v70_v29 = vsel %vm33_vm0, %v1029_v26, 0.0  ;;  %v1040_v30 = vld [vmem:[%s1988_s0 + $0x78] sm:$0xff] }
   0x7   :  { %v79_v31 = vsel %vm33_vm0, %v1040_v30, 0.0  ;;  %v809_v33 = vpop.eup %808 }
   0x8   :  { %v83_v34 = vmul.f32 64.0, %v809_v33  ;;  %vm87_vm1 = vweird.f32 %v809_v33 }
   0xa   :  { %v84_v35 = vsub.f32 1.0, %v83_v34 }
   0xb   :  { %50 = vadd.xlane.f32.xlu2 %v49_v9  ;;  %44 = vadd.xlane.f32.xlu1 %v43_v10 }
   0xc   :  { %38 = vadd.xlane.f32.xlu0 %v37_v11  ;;  %v85_v36 = vmul.f32 %v809_v33, %v84_v35 }
   0xe   :  { %v86_v37 = vadd.f32 %v809_v33, %v85_v36 }
  0x10   :  { %v1044_v38 = vsel %vm87_vm1, %v809_v33, %v86_v37 }
  0x13   :  { %59 = vadd.xlane.f32.xlu2 %v58_v15  ;;  %56 = vadd.xlane.f32.xlu1 %v55_v16 }
  0x14   :  { %53 = vadd.xlane.f32.xlu0 %v52_v17 }
  0x1b   :  { %68 = vadd.xlane.f32.xlu2 %v67_v21  ;;  %65 = vadd.xlane.f32.xlu1 %v64_v22 }
  0x1c   :  { %62 = vadd.xlane.f32.xlu0 %v61_v23 }
  0x23   :  { %77 = vadd.xlane.f32.xlu2 %v76_v27  ;;  %74 = vadd.xlane.f32.xlu1 %v73_v28 }
  0x24   :  { %71 = vadd.xlane.f32.xlu0 %v70_v29 }
  0x2c   :  { %80 = vadd.xlane.f32.xlu0 %v79_v31 }
  0x76   :  { %v48_v39 = vpop.xlane.xlu2 %47  ;;  %v42_v40 = vpop.xlane.xlu1 %41 }
  0x77   :  { %v91_v41 = vmul.f32 %v1044_v38, %v42_v40  ;;  %v36_v42 = vpop.xlane.xlu0 %35  ;;  %v93_v58 = vmul.f32 %v1044_v38, %v48_v39 }
  0x78   :  { %v89_v43 = vmul.f32 %v1044_v38, %v36_v42 }
  0x79   :  { %v1049_v44 = vsub.f32 %v940_v1, %v91_v41 }
  0x7a   :  { %v1052_v45 = vsub.f32 %v945_v2, %v89_v43  ;;  %v1082_v2 = vsub.f32 %v935_v0, %v93_v58 }
  0x7b   :  { %v123_v46 = vmul.f32 %v1049_v44, %v1049_v44 }
  0x7c   :  { %v121_v47 = vmul.f32 %v1052_v45, %v1052_v45  ;;  %v125_v11 = vmul.f32 %v1082_v2, %v1082_v2 }
  0x7d   :  { %v143_v48 = vsel %vm33_vm0, %v123_v46, 0.0 }
  0x7e   :  { %v51_v49 = vpop.xlane.xlu2 %50  ;;  %v45_v50 = vpop.xlane.xlu1 %44  ;;  %144 = vadd.xlane.f32.xlu0 %v143_v48  ;;  %v137_v51 = vsel %vm33_vm0, %v121_v47, 0.0 }
  0x7f   :  { %v94_v52 = vmul.f32 %v1044_v38, %v51_v49  ;;  %v92_v53 = vmul.f32 %v1044_v38, %v45_v50  ;;  %138 = vadd.xlane.f32.xlu1 %v137_v51  ;;  %v39_v54 = vpop.xlane.xlu0 %38 }
  0x80   :  { %v90_v55 = vmul.f32 %v1044_v38, %v39_v54 }
  0x81   :  { %v1064_v56 = vsub.f32 %v956_v6, %v94_v52  ;;  %v1067_v57 = vsub.f32 %v961_v7, %v92_v53 }
  0x82   :  { %v1071_v59 = vsub.f32 %v966_v8, %v90_v55 }
  0x83   :  { %v126_v60 = vmul.f32 %v1064_v56, %v1064_v56  ;;  %v124_v61 = vmul.f32 %v1067_v57, %v1067_v57 }
  0x84   :  { %v122_v62 = vmul.f32 %v1071_v59, %v1071_v59 }
  0x85   :  { %v152_v63 = vsel %vm33_vm0, %v126_v60, 0.0  ;;  %v146_v1 = vsel %vm33_vm0, %v124_v61, 0.0 }
  0x86   :  { %v60_v3 = vpop.xlane.xlu2 %59  ;;  %153 = vadd.xlane.f32.xlu0 %v152_v63  ;;  %v140_v4 = vsel %vm33_vm0, %v122_v62, 0.0  ;;  %v57_v5 = vpop.xlane.xlu1 %56  ;;  %v1161_v62 = vld [vmem:[%s1991_s1] sm:$0xff] }
  0x87   :  { %v97_v6 = vmul.f32 %v1044_v38, %v60_v3  ;;  %147 = vadd.xlane.f32.xlu1 %v146_v1  ;;  %141 = vadd.xlane.f32.xlu2 %v140_v4  ;;  %v54_v7 = vpop.xlane.xlu0 %53  ;;  %v96_v9 = vmul.f32 %v1044_v38, %v57_v5  ;;  %v449_v63 = vsub.f32 0.0, %v1161_v62  ;;  %v1167_v4 = vld [vmem:[%s1991_s1 + $0x10] sm:$0xff] }
  0x88   :  { %v95_v8 = vmul.f32 %v1044_v38, %v54_v7  ;;  %v451_v5 = vsub.f32 0.0, %v1167_v4  ;;  %v1173_v7 = vld [vmem:[%s1991_s1 + $0x18] sm:$0xff] }
  0x89   :  { %v1089_v10 = vsub.f32 %v977_v12, %v97_v6  ;;  %v1099_v16 = vsub.f32 %v982_v13, %v96_v9  ;;  %v149_v12 = vsel %vm33_vm0, %v125_v11, 0.0  ;;  %v465_v1 = vmul.f32 1.442695, %v449_v63 }
  0x8a   :  { %v1092_v0 = vsub.f32 %v987_v14, %v95_v8  ;;  %v469_v6 = vmul.f32 1.442695, %v451_v5  ;;  %v1178_v8 = vld [vmem:[%s1991_s1 + $0x8] sm:$0xff]  ;;  %v452_v11 = vsub.f32 0.0, %v1173_v7 }
  0x8b   :  { %v129_v15 = vmul.f32 %v1089_v10, %v1089_v10  ;;  %v128_v31 = vmul.f32 %v1099_v16, %v1099_v16  ;;  %810 = vpow2.f32 %v465_v1 }
  0x8c   :  { %v127_v17 = vmul.f32 %v1092_v0, %v1092_v0 }
  0x8d   :  { %v161_v21 = vsel %vm33_vm0, %v129_v15, 0.0  ;;  %v158_v36 = vsel %vm33_vm0, %v128_v31, 0.0  ;;  %v450_v15 = vsub.f32 0.0, %v1178_v8 }
  0x8e   :  { %v69_v22 = vpop.xlane.xlu2 %68  ;;  %162 = vadd.xlane.f32.xlu0 %v161_v21  ;;  %v155_v14 = vsel %vm33_vm0, %v127_v17, 0.0  ;;  %v66_v23 = vpop.xlane.xlu1 %65  ;;  %v1185_v17 = vld [vmem:[%s1991_s1 + $0x28] sm:$0xff] }
  0x8f   :  { %v100_v27 = vmul.f32 %v1044_v38, %v69_v22  ;;  %150 = vadd.xlane.f32.xlu2 %v149_v12  ;;  %156 = vadd.xlane.f32.xlu1 %v155_v14  ;;  %v63_v28 = vpop.xlane.xlu0 %62  ;;  %v99_v29 = vmul.f32 %v1044_v38, %v66_v23  ;;  %v454_v21 = vsub.f32 0.0, %v1185_v17  ;;  %v471_v12 = vmul.f32 1.442695, %v452_v11 }
  0x90   :  { %v98_v13 = vmul.f32 %v1044_v38, %v63_v28  ;;  %v467_v14 = vmul.f32 1.442695, %v450_v15 }
  0x91   :  { %v1112_v32 = vsub.f32 %v998_v18, %v100_v27  ;;  %v1120_v35 = vsub.f32 %v1003_v19, %v99_v29  ;;  %v475_v28 = vmul.f32 1.442695, %v454_v21  ;;  %v1194_v29 = vld [vmem:[%s1991_s1 + $0x20] sm:$0xff] }
  0x92   :  { %v1115_v33 = vsub.f32 %v1008_v20, %v98_v13  ;;  %v453_v31 = vsub.f32 0.0, %v1194_v29 }
  0x93   :  { %v132_v34 = vmul.f32 %v1112_v32, %v1112_v32  ;;  %v131_v46 = vmul.f32 %v1120_v35, %v1120_v35 }
  0x94   :  { %v130_v37 = vmul.f32 %v1115_v33, %v1115_v33 }
  0x95   :  { %v170_v39 = vsel %vm33_vm0, %v132_v34, 0.0  ;;  %v167_v51 = vsel %vm33_vm0, %v131_v46, 0.0 }
  0x96   :  { %v78_v40 = vpop.xlane.xlu2 %77  ;;  %171 = vadd.xlane.f32.xlu0 %v170_v39  ;;  %v164_v18 = vsel %vm33_vm0, %v130_v37, 0.0  ;;  %v75_v41 = vpop.xlane.xlu1 %74 }
  0x97   :  { %v103_v20 = vmul.f32 %v1044_v38, %v78_v40  ;;  %159 = vadd.xlane.f32.xlu2 %v158_v36  ;;  %165 = vadd.xlane.f32.xlu1 %v164_v18  ;;  %v72_v42 = vpop.xlane.xlu0 %71  ;;  %v102_v43 = vmul.f32 %v1044_v38, %v75_v41  ;;  %v473_v40 = vmul.f32 1.442695, %v453_v31 }
  0x98   :  { %v101_v19 = vmul.f32 %v1044_v38, %v72_v42 }
  0x99   :  { %v1133_v47 = vsub.f32 %v1019_v24, %v103_v20  ;;  %v1141_v50 = vsub.f32 %v1024_v25, %v102_v43  ;;  %v1206_v20 = vld [vmem:[%s1991_s1 + $0x30] sm:$0xff] }
  0x9a   :  { %v1136_v48 = vsub.f32 %v1029_v26, %v101_v19  ;;  %v455_v43 = vsub.f32 0.0, %v1206_v20 }
  0x9b   :  { %v135_v49 = vmul.f32 %v1133_v47, %v1133_v47  ;;  %v134_v55 = vmul.f32 %v1141_v50, %v1141_v50 }
  0x9c   :  { %v133_v52 = vmul.f32 %v1136_v48, %v1136_v48 }
  0x9d   :  { %v179_v53 = vsel %vm33_vm0, %v135_v49, 0.0  ;;  %v176_v58 = vsel %vm33_vm0, %v134_v55, 0.0 }
  0x9e   :  { %180 = vadd.xlane.f32.xlu0 %v179_v53  ;;  %v173_v24 = vsel %vm33_vm0, %v133_v52, 0.0 }
  0x9f   :  { %168 = vadd.xlane.f32.xlu2 %v167_v51  ;;  %174 = vadd.xlane.f32.xlu1 %v173_v24  ;;  %v81_v26 = vpop.xlane.xlu0 %80 }
  0xa0   :  { %v104_v54 = vmul.f32 %v1044_v38, %v81_v26  ;;  %v477_v26 = vmul.f32 1.442695, %v455_v43 }
  0xa2   :  { %v1152_v25 = vsub.f32 %v1040_v30, %v104_v54  ;;  %v811_v30 = vpop.eup %810 }
  0xa3   :  { %v497_v3 = vadd.f32 1.0, %v811_v30 }
  0xa4   :  { %v136_v60 = vmul.f32 %v1152_v25, %v1152_v25 }
  0xa5   :  { %812 = vrcp.f32 %v497_v3  ;;  %vm518_vm2 = vweird.f32 %v497_v3  ;;  %v524_v46 = vand.u32 2147483648, %v497_v3  ;;  %v522_v52 = vand.u32 2147483647, %v497_v3 }
  0xa6   :  { %v182_v61 = vsel %vm33_vm0, %v136_v60, 0.0  ;;  %814 = vpow2.f32 %v469_v6 }
  0xa7   :  { %177 = vadd.xlane.f32.xlu2 %v176_v58  ;;  %183 = vadd.xlane.f32.xlu1 %v182_v61  ;;  %816 = vpow2.f32 %v471_v12  ;;  %v525_v54 = vor.u32 1.1754944e-38, %v524_v46  ;;  %vm523_vm5 = vcmp.eq.f32.partialorder %v522_v52, 8.507059e+37 }
  0xab   :  { %v813_v9 = vpop.eup %812 }
  0xac   :  { %v815_v22 = vpop.eup %814  ;;  %v514_v23 = vmul.f32 %v813_v9, %v497_v3  ;;  %vm519_vm3 = vweird.f32 %v813_v9 }
  0xad   :  { %v1188_v27 = vadd.f32 1.0, %v815_v22  ;;  %v817_v34 = vpop.eup %816  ;;  %vm1216_vm4 = vmor %vm518_vm2, %vm519_vm3 }
  0xae   :  { %v515_v13 = vsub.f32 1.0, %v514_v23  ;;  %v1199_v39 = vadd.f32 1.0, %v817_v34 }
  0xaf   :  { %818 = vrcp.f32 %v1188_v27  ;;  %vm548_vm6 = vweird.f32 %v1188_v27  ;;  %v554_v15 = vand.u32 2147483648, %v1188_v27  ;;  %v552_v12 = vand.u32 2147483647, %v1188_v27 }
  0xb0   :  { %820 = vpow2.f32 %v467_v14  ;;  %v516_v37 = vmul.f32 %v813_v9, %v515_v13  ;;  %v569_v31 = vand.u32 2147483648, %v1199_v39  ;;  %vm563_vm9 = vweird.f32 %v1199_v39 }
  0xb1   :  { %822 = vpow2.f32 %v475_v28  ;;  %v1247_v28 = vld [vmem:[%s1991_s1 + $0x40] sm:$0xff]  ;;  %vm553_vm12 = vcmp.eq.f32.partialorder %v552_v12, 8.507059e+37 }
  0xb2   :  { %824 = vrcp.f32 %v1199_v39  ;;  %v517_v51 = vadd.f32 %v813_v9, %v516_v37 }
  0xb3   :  { %826 = vpow2.f32 %v473_v40 }
  0xb4   :  { %v521_v58 = vsel %vm1216_vm4, %v813_v9, %v517_v51  ;;  %v457_v51 = vsub.f32 0.0, %v1247_v28 }
  0xb5   :  { %v1197_v36 = vpop.eup %818  ;;  %v526_v5 = vsel %vm523_vm5, %v525_v54, %v521_v58 }
  0xb6   :  { %v821_v18 = vpop.eup %820  ;;  %v544_v41 = vmul.f32 %v1197_v36, %v1188_v27  ;;  %vm549_vm7 = vweird.f32 %v1197_v36  ;;  %v1250_v13 = vmul.f32 %v526_v5, %v1161_v62  ;;  %v567_v27 = vand.u32 2147483647, %v1199_v39 }
  0xb7   :  { %v823_v42 = vpop.eup %822  ;;  %v1209_v19 = vadd.f32 1.0, %v821_v18  ;;  %vm1239_vm8 = vmor %vm548_vm6, %vm549_vm7  ;;  %v555_v62 = vor.u32 1.1754944e-38, %v554_v15  ;;  %v481_v5 = vmul.f32 1.442695, %v457_v51 }
  0xb8   :  { %v1212_v49 = vadd.f32 1.0, %v823_v42  ;;  %v545_v53 = vsub.f32 1.0, %v544_v41  ;;  %v825_v55 = vpop.eup %824  ;;  %vm568_vm13 = vcmp.eq.f32.partialorder %v567_v27, 8.507059e+37 }
  0xb9   :  { %828 = vrcp.f32 %v1209_v19  ;;  %v827_v61 = vpop.eup %826  ;;  %v559_v63 = vmul.f32 %v825_v55, %v1199_v39  ;;  %vm564_vm10 = vweird.f32 %v825_v55  ;;  %vm533_vm14 = vweird.f32 %v1209_v19 }
  0xba   :  { %830 = vrcp.f32 %v1212_v49  ;;  %v546_v60 = vmul.f32 %v1197_v36, %v545_v53  ;;  %v1229_v30 = vadd.f32 1.0, %v827_v61  ;;  %vm1260_vm11 = vmor %vm563_vm9, %vm564_vm10  ;;  %v570_v53 = vor.u32 1.1754944e-38, %v569_v31 }
  0xbb   :  { %832 = vpow2.f32 %v477_v26  ;;  %v560_v6 = vsub.f32 1.0, %v559_v63  ;;  %v539_v63 = vand.u32 2147483648, %v1209_v19  ;;  %vm593_vm2 = vweird.f32 %v1212_v49 }
  0xbc   :  { %v547_v11 = vadd.f32 %v1197_v36, %v546_v60  ;;  %834 = vrcp.f32 %v1229_v30  ;;  %vm578_vm9 = vweird.f32 %v1229_v30 }
  0xbd   :  { %v561_v14 = vmul.f32 %v825_v55, %v560_v6 }
  0xbe   :  { %v551_v42 = vsel %vm1239_vm8, %v1197_v36, %v547_v11 }
  0xbf   :  { %v1225_v1 = vpop.eup %828  ;;  %v562_v18 = vadd.f32 %v825_v55, %v561_v14  ;;  %v556_v61 = vsel %vm553_vm12, %v555_v62, %v551_v42 }
  0xc0   :  { %v1231_v3 = vpop.eup %830  ;;  %v529_v9 = vmul.f32 %v1225_v1, %v1209_v19  ;;  %vm534_vm15 = vweird.f32 %v1225_v1  ;;  %v1294_v22 = vmul.f32 %v556_v61, %v1167_v4 }
  0xc1   :  { %v589_v21 = vmul.f32 %v1231_v3, %v1212_v49  ;;  %v833_v37 = vpop.eup %832  ;;  %v566_v36 = vsel %vm1260_vm11, %v825_v55, %v562_v18  ;;  %vm1285_vm1 = vmor %vm533_vm14, %vm534_vm15  ;;  %vm594_vm3 = vweird.f32 %v1231_v3 }
  0xc2   :  { %v530_v23 = vsub.f32 1.0, %v529_v9  ;;  %v1271_v26 = vadd.f32 1.0, %v833_v37  ;;  %v1278_v60 = vpop.eup %834  ;;  %v571_v55 = vsel %vm568_vm13, %v570_v53, %v566_v36  ;;  %v537_v9 = vand.u32 2147483647, %v1209_v19  ;;  %vm1296_vm4 = vmor %vm593_vm2, %vm594_vm3 }
  0xc3   :  { %v590_v34 = vsub.f32 1.0, %v589_v21  ;;  %v597_v21 = vand.u32 2147483647, %v1212_v49  ;;  %v599_v19 = vand.u32 2147483648, %v1212_v49  ;;  %v1305_v31 = vmul.f32 %v571_v55, %v1173_v7 }
  0xc4   :  { %v531_v39 = vmul.f32 %v1225_v1, %v530_v23  ;;  %v574_v23 = vmul.f32 %v1278_v60, %v1229_v30  ;;  %v540_v37 = vor.u32 1.1754944e-38, %v539_v63  ;;  %vm1312_vm5 = vcmp.eq.f32.partialorder %v537_v9, 8.507059e+37 }
  0xc5   :  { %v591_v58 = vmul.f32 %v1231_v3, %v590_v34  ;;  %vm1322_vm6 = vcmp.eq.f32.partialorder %v597_v21, 8.507059e+37  ;;  %v584_v36 = vand.u32 2147483648, %v1229_v30  ;;  %vm579_vm10 = vweird.f32 %v1278_v60 }
  0xc6   :  { %v532_v6 = vadd.f32 %v1225_v1, %v531_v39  ;;  %v575_v39 = vsub.f32 1.0, %v574_v23  ;;  %vm608_vm14 = vweird.f32 %v1271_v26 }
  0xc7   :  { %v592_v15 = vadd.f32 %v1231_v3, %v591_v58  ;;  %v1361_v12 = vor.u32 1.1754944e-38, %v584_v36 }
  0xc8   :  { %v536_v49 = vsel %vm1285_vm1, %v1225_v1, %v532_v6  ;;  %v576_v11 = vmul.f32 %v1278_v60, %v575_v39  ;;  %vm1385_vm1 = vmor %vm578_vm9, %vm579_vm10  ;;  %v1399_v39 = vld [vmem:[%s1989_s2] ss:$0 sm:$0xff] }
  0xc9   :  { %v596_v42 = vsel %vm1296_vm4, %v1231_v3, %v592_v15  ;;  %v1348_v63 = vsel %vm1312_vm5, %v540_v37, %v536_v49  ;;  %v582_v15 = vand.u32 2147483647, %v1229_v30 }
  0xcb   :  { %vm1389_vm2 = vcmp.eq.f32.partialorder %v582_v15, 8.507059e+37 }
  0xf1   :  { %v145_v40 = vpop.xlane.xlu0 %144 }
  0xf2   :  { %v139_v41 = vpop.xlane.xlu1 %138  ;;  %v187_v43 = vmul.f32 %v145_v40, %v1044_v38 }
  0xf3   :  { %v185_v52 = vmul.f32 %v139_v41, %v1044_v38 }
  0xf4   :  { %v1267_v24 = vadd.f32 1e-05, %v187_v43  ;;  %v600_v43 = vor.u32 1.1754944e-38, %v599_v19 }
  0xf5   :  { %v1273_v54 = vadd.f32 1e-05, %v185_v52 }
  0xf6   :  { %836 = vrsqrt.f32 %v1267_v24  ;;  %vm243_vm7 = vweird.f32 %v1267_v24  ;;  %v601_v6 = vsel %vm1322_vm6, %v600_v43, %v596_v42 }
  0xf7   :  { %838 = vrsqrt.f32 %v1273_v54  ;;  %vm223_vm8 = vweird.f32 %v1273_v54 }
  0xf8   :  { %840 = vrcp.f32 %v1271_v26 }
  0xf9   :  { %v154_v14 = vpop.xlane.xlu0 %153  ;;  %842 = vpow2.f32 %v481_v5 }
  0xfa   :  { %v148_v34 = vpop.xlane.xlu1 %147  ;;  %v142_v40 = vpop.xlane.xlu2 %141  ;;  %v190_v4 = vmul.f32 %v154_v14, %v1044_v38 }
  0xfb   :  { %v188_v18 = vmul.f32 %v148_v34, %v1044_v38  ;;  %v186_v41 = vmul.f32 %v142_v40, %v1044_v38  ;;  %v1367_v34 = vmul.f32 %v601_v6, %v1185_v17 }
  0xfc   :  { %v1317_v7 = vpop.eup %836  ;;  %v1326_v46 = vadd.f32 1e-05, %v190_v4  ;;  %v612_v4 = vand.u32 2147483647, %v1271_v26 }
  0xfd   :  { %v1328_v1 = vpop.eup %838  ;;  %v238_v51 = vmul.f32 %v1317_v7, %v1267_v24  ;;  %v1332_v52 = vadd.f32 1e-05, %v188_v18  ;;  %v1334_v53 = vadd.f32 1e-05, %v186_v41  ;;  %vm244_vm11 = vweird.f32 %v1317_v7 }
  0xfe   :  { %v218_v3 = vmul.f32 %v1328_v1, %v1273_v54  ;;  %844 = vrsqrt.f32 %v1326_v46  ;;  %v1341_v58 = vpop.eup %840  ;;  %vm224_vm12 = vweird.f32 %v1328_v1  ;;  %vm273_vm13 = vweird.f32 %v1326_v46  ;;  %vm245_vm3 = vmor %vm243_vm7, %vm244_vm11 }
  0xff   :  { %v239_v61 = vmul.f32 %v1317_v7, %v238_v51  ;;  %846 = vrsqrt.f32 %v1332_v52  ;;  %v1350_v5 = vpop.eup %842  ;;  %v604_v14 = vmul.f32 %v1341_v58, %v1271_v26  ;;  %vm609_vm15 = vweird.f32 %v1341_v58  ;;  %vm225_vm5 = vmor %vm223_vm8, %vm224_vm12 }
 0x100   :  { %v219_v55 = vmul.f32 %v1328_v1, %v218_v3  ;;  %848 = vrsqrt.f32 %v1334_v53  ;;  %v577_v41 = vadd.f32 %v1278_v60, %v576_v11  ;;  %vm253_vm4 = vweird.f32 %v1332_v52  ;;  %v1423_v11 = vld [vmem:[%s1990_s3] ss:$0 sm:$0xff]  ;;  %vm1449_vm10 = vmor %vm608_vm14, %vm609_vm15 }
 0x101   :  { %v240_v9 = vmul.f32 0.5, %v239_v61  ;;  %v605_v36 = vsub.f32 1.0, %v604_v14  ;;  %v614_v61 = vand.u32 2147483648, %v1271_v26  ;;  %vm233_vm6 = vweird.f32 %v1334_v53 }
 0x102   :  { %v220_v21 = vmul.f32 0.5, %v219_v55  ;;  %v151_v19 = vpop.xlane.xlu2 %150  ;;  %v157_v18 = vpop.xlane.xlu1 %156  ;;  %vm1470_vm14 = vcmp.eq.f32.partialorder %v612_v4, 8.507059e+37 }
 0x103   :  { %v241_v23 = vsub.f32 1.5, %v240_v9  ;;  %v189_v43 = vmul.f32 %v151_v19, %v1044_v38  ;;  %v191_v9 = vmul.f32 %v157_v18, %v1044_v38  ;;  %v615_v4 = vor.u32 1.1754944e-38, %v614_v61 }
 0x104   :  { %v1370_v37 = vpop.eup %844  ;;  %v221_v40 = vsub.f32 1.5, %v220_v21  ;;  %v754_v61 = vmul.f32 %v1348_v63, %v1178_v8 }
 0x105   :  { %v1375_v49 = vpop.eup %846  ;;  %v242_v27 = vmul.f32 %v1317_v7, %v241_v23  ;;  %v268_v17 = vmul.f32 %v1370_v37, %v1326_v46  ;;  %vm274_vm7 = vweird.f32 %v1370_v37  ;;  %v1431_v23 = vadd.f32 1e-05, %v189_v43 }
 0x106   :  { %v1394_v51 = vpop.eup %848  ;;  %v222_v3 = vmul.f32 %v1328_v1, %v221_v40  ;;  %v248_v30 = vmul.f32 %v1375_v49, %v1332_v52  ;;  %vm254_vm8 = vweird.f32 %v1375_v49  ;;  %v1453_v42 = vadd.f32 1e-05, %v191_v9  ;;  %vm275_vm11 = vmor %vm273_vm13, %vm274_vm7 }
 0x107   :  { %v246_v55 = vsel %vm245_vm3, %v1317_v7, %v242_v27  ;;  %v228_v6 = vmul.f32 %v1394_v51, %v1334_v53  ;;  %v269_v24 = vmul.f32 %v1370_v37, %v268_v17  ;;  %850 = vrsqrt.f32 %v1431_v23  ;;  %vm255_vm12 = vmor %vm253_vm4, %vm254_vm8 }
 0x108   :  { %v226_v15 = vsel %vm225_vm5, %v1328_v1, %v222_v3  ;;  %v379_v54 = vmul.f32 %v246_v55, %v1049_v44  ;;  %v249_v7 = vmul.f32 %v1375_v49, %v248_v30  ;;  %v581_v1 = vsel %vm1385_vm1, %v1278_v60, %v577_v41 }
 0x109   :  { %v377_v21 = vmul.f32 %v226_v15, %v1052_v45  ;;  %v229_v19 = vmul.f32 %v1394_v51, %v228_v6  ;;  %v270_v14 = vmul.f32 0.5, %v269_v24  ;;  %v606_v44 = vmul.f32 %v1341_v58, %v605_v36 }
 0x10a   :  { %v399_v40 = vmul.f32 %v1399_v39, %v379_v54  ;;  %v250_v18 = vmul.f32 0.5, %v249_v7  ;;  %vm234_vm9 = vweird.f32 %v1394_v51  ;;  %v1463_v15 = vadd.f32 1.0, %v1350_v5  ;;  %v1568_v54 = vld [vmem:[%s1991_s1 + $0x58] sm:$0xff] }
 0x10b   :  { %v397_v27 = vmul.f32 %v1399_v39, %v377_v21  ;;  %v230_v17 = vmul.f32 0.5, %v229_v19  ;;  %v271_v3 = vsub.f32 1.5, %v270_v14  ;;  %v607_v24 = vadd.f32 %v1341_v58, %v606_v44  ;;  %vm235_vm13 = vmor %vm233_vm6, %vm234_vm9 }
 0x10c   :  { %v419_v45 = vadd.f32 %v1423_v11, %v399_v40  ;;  %v251_v30 = vsub.f32 1.5, %v250_v18  ;;  %v586_v52 = vsel %vm1389_vm2, %v1361_v12, %v581_v1  ;;  %852 = vrsqrt.f32 %v1453_v42 }
 0x10d   :  { %v417_v43 = vadd.f32 %v1423_v11, %v397_v27  ;;  %v231_v55 = vsub.f32 1.5, %v230_v17  ;;  %v272_v60 = vmul.f32 %v1370_v37, %v271_v3  ;;  %v1488_v5 = vpop.eup %850  ;;  %854 = vrcp.f32 %v1463_v15  ;;  %v160_v17 = vpop.xlane.xlu2 %159 }
 0x10e   :  { %v771_v36 = vmul.f32 %v1294_v22, %v419_v45  ;;  %v252_v6 = vmul.f32 %v1375_v49, %v251_v30  ;;  %v258_v62 = vmul.f32 %v1488_v5, %v1431_v23  ;;  %v611_v7 = vsel %vm1449_vm10, %v1341_v58, %v607_v24 }
 0x10f   :  { %v769_v26 = vmul.f32 %v1250_v13, %v417_v43  ;;  %v232_v9 = vmul.f32 %v1394_v51, %v231_v55  ;;  %v276_v22 = vsel %vm275_vm11, %v1370_v37, %v272_v60  ;;  %vm263_vm15 = vweird.f32 %v1431_v23  ;;  %v1542_v55 = vld [vmem:[%s1991_s1 + $0x48] sm:$0xff] }
 0x110   :  { %787 = vst.msk [vmem:[%s1992_s4 + $0x10] sm:$0xff] %vm33_vm0, %v771_v36  ;;  %v256_v46 = vsel %vm255_vm12, %v1375_v49, %v252_v6  ;;  %v382_v13 = vmul.f32 %v276_v22, %v1064_v56  ;;  %v163_v56 = vpop.xlane.xlu0 %162  ;;  %v259_v58 = vmul.f32 %v1488_v5, %v258_v62  ;;  %vm264_vm1 = vweird.f32 %v1488_v5  ;;  %v166_v36 = vpop.xlane.xlu1 %165 }
 0x111   :  { %785 = vst.msk [vmem:[%s1992_s4] sm:$0xff] %vm33_vm0, %v769_v26  ;;  %v380_v37 = vmul.f32 %v256_v46, %v1067_v57  ;;  %v236_v53 = vsel %vm235_vm13, %v1394_v51, %v232_v9  ;;  %v1507_v57 = vld [vmem:[%s1991_s1 + $0x38] sm:$0xff]  ;;  %v193_v14 = vmul.f32 %v163_v56, %v1044_v38  ;;  %v1524_v8 = vsel %vm1470_vm14, %v615_v4, %v611_v7  ;;  %vm265_vm4 = vmor %vm263_vm15, %vm264_vm1 }
 0x112   :  { %v378_v49 = vmul.f32 %v236_v53, %v1071_v59  ;;  %v402_v12 = vmul.f32 %v1399_v39, %v382_v13  ;;  %v1513_v59 = vmul.f32 %v586_v52, %v1194_v29  ;;  %v456_v29 = vsub.f32 0.0, %v1507_v57  ;;  %v1527_v63 = vpop.eup %852 }
 0x113   :  { %v400_v51 = vmul.f32 %v1399_v39, %v380_v37  ;;  %v260_v44 = vmul.f32 0.5, %v259_v58  ;;  %v1531_v27 = vadd.f32 1e-05, %v193_v14  ;;  %v1533_v3 = vpop.eup %854  ;;  %v278_v30 = vmul.f32 %v1527_v63, %v1453_v42 }
 0x114   :  { %v398_v21 = vmul.f32 %v1399_v39, %v378_v49  ;;  %v422_v19 = vadd.f32 %v1423_v11, %v402_v12  ;;  %vm638_vm2 = vweird.f32 %v1463_v15  ;;  %v479_v43 = vmul.f32 1.442695, %v456_v29 }
 0x115   :  { %v420_v40 = vadd.f32 %v1423_v11, %v400_v51  ;;  %v261_v60 = vsub.f32 1.5, %v260_v44  ;;  %v642_v41 = vand.u32 2147483647, %v1463_v15  ;;  %v279_v6 = vmul.f32 %v1527_v63, %v278_v30 }
 0x116   :  { %v418_v18 = vadd.f32 %v1423_v11, %v398_v21  ;;  %v774_v1 = vmul.f32 %v1367_v34, %v422_v19  ;;  %vm639_vm3 = vweird.f32 %v1533_v3  ;;  %856 = vrsqrt.f32 %v1531_v27 }
 0x117   :  { %v772_v45 = vmul.f32 %v1305_v31, %v420_v40  ;;  %v634_v31 = vmul.f32 %v1533_v3, %v1463_v15  ;;  %v192_v24 = vmul.f32 %v160_v17, %v1044_v38  ;;  %v262_v26 = vmul.f32 %v1488_v5, %v261_v60  ;;  %vm1586_vm6 = vmor %vm638_vm2, %vm639_vm3 }
 0x118   :  { %v770_v34 = vmul.f32 %v754_v61, %v418_v18  ;;  %790 = vst.msk [vmem:[%s1992_s4 + $0x28] sm:$0xff] %vm33_vm0, %v774_v1  ;;  %858 = vpow2.f32 %v479_v43  ;;  %v458_v22 = vsub.f32 0.0, %v1542_v55  ;;  %v280_v46 = vmul.f32 0.5, %v279_v6  ;;  %v172_v62 = vpop.xlane.xlu0 %171 }
 0x119   :  { %788 = vst.msk [vmem:[%s1992_s4 + $0x18] sm:$0xff] %vm33_vm0, %v772_v45  ;;  %v635_v9 = vsub.f32 1.0, %v634_v31  ;;  %v644_v13 = vand.u32 2147483648, %v1463_v15  ;;  %v1575_v52 = vadd.f32 1e-05, %v192_v24  ;;  %v194_v37 = vmul.f32 %v166_v36, %v1044_v38 }
 0x11a   :  { %786 = vst.msk [vmem:[%s1992_s4 + $0x8] sm:$0xff] %vm33_vm0, %v770_v34  ;;  %v266_v53 = vsel %vm265_vm4, %v1488_v5, %v262_v26  ;;  %vm284_vm5 = vweird.f32 %v1527_v63  ;;  %v483_v56 = vmul.f32 1.442695, %v458_v22  ;;  %v281_v12 = vsub.f32 1.5, %v280_v46 }
 0x11b   :  { %v636_v4 = vmul.f32 %v1533_v3, %v635_v9  ;;  %v381_v49 = vmul.f32 %v266_v53, %v1082_v2  ;;  %860 = vrsqrt.f32 %v1575_v52  ;;  %v460_v5 = vsub.f32 0.0, %v1568_v54 }
 0x11c   :  { %vm283_vm7 = vweird.f32 %v1453_v42  ;;  %862 = vpow2.f32 %v483_v56  ;;  %v1594_v2 = vadd.f32 1e-05, %v194_v37  ;;  %v1596_v51 = vpop.eup %856  ;;  %v282_v61 = vmul.f32 %v1527_v63, %v281_v12 }
 0x11d   :  { %v637_v7 = vadd.f32 %v1533_v3, %v636_v4  ;;  %v401_v15 = vmul.f32 %v1399_v39, %v381_v49  ;;  %vm1600_vm8 = vcmp.eq.f32.partialorder %v642_v41, 8.507059e+37  ;;  %v645_v19 = vor.u32 1.1754944e-38, %v644_v13  ;;  %vm285_vm9 = vmor %vm283_vm7, %vm284_vm5 }
 0x11e   :  { %v859_v58 = vpop.eup %858  ;;  %v298_v14 = vmul.f32 %v1596_v51, %v1531_v27  ;;  %864 = vrsqrt.f32 %v1594_v2  ;;  %v196_v40 = vmul.f32 %v172_v62, %v1044_v38  ;;  %v286_v18 = vsel %vm285_vm9, %v1527_v63, %v282_v61 }
 0x11f   :  { %v641_v42 = vsel %vm1586_vm6, %v1533_v3, %v637_v7  ;;  %v421_v29 = vadd.f32 %v1423_v11, %v401_v15  ;;  %v1615_v1 = vadd.f32 1.0, %v859_v58  ;;  %v487_v44 = vmul.f32 1.442695, %v460_v5 }
 0x120   :  { %v759_v17 = vmul.f32 %v1524_v8, %v1206_v20  ;;  %v383_v45 = vmul.f32 %v286_v18, %v1092_v0  ;;  %v299_v3 = vmul.f32 %v1596_v51, %v298_v14  ;;  %v646_v34 = vsel %vm1600_vm8, %v645_v19, %v641_v42 }
 0x121   :  { %v1621_v30 = vpop.eup %860  ;;  %v773_v43 = vmul.f32 %v1513_v59, %v421_v29  ;;  %vm303_vm10 = vweird.f32 %v1531_v27  ;;  %866 = vrcp.f32 %v1615_v1  ;;  %v627_v20 = vand.u32 2147483647, %v1615_v1  ;;  %v1636_v59 = vld [vmem:[%s1991_s1 + $0x50] sm:$0xff]  ;;  %v169_v29 = vpop.xlane.xlu2 %168 }
 0x122   :  { %v863_v63 = vpop.eup %862  ;;  %v403_v60 = vmul.f32 %v1399_v39, %v383_v45  ;;  %v300_v31 = vmul.f32 0.5, %v299_v3  ;;  %v288_v0 = vmul.f32 %v1621_v30, %v1575_v52  ;;  %vm293_vm11 = vweird.f32 %v1575_v52  ;;  %v1697_v45 = vld [vmem:[%s1991_s1 + $0x60] sm:$0xff] }
 0x123   :  { %789 = vst.msk [vmem:[%s1992_s4 + $0x20] sm:$0xff] %vm33_vm0, %v773_v43  ;;  %v629_v8 = vand.u32 2147483648, %v1615_v1  ;;  %v1643_v41 = vadd.f32 1.0, %v863_v63  ;;  %868 = vpow2.f32 %v487_v44  ;;  %v1645_v36 = vadd.f32 1e-05, %v196_v40 }
 0x124   :  { %v1647_v6 = vpop.eup %864  ;;  %v423_v24 = vadd.f32 %v1423_v11, %v403_v60  ;;  %v301_v26 = vsub.f32 1.5, %v300_v31  ;;  %vm304_vm12 = vweird.f32 %v1596_v51  ;;  %v289_v9 = vmul.f32 %v1621_v30, %v288_v0 }
 0x125   :  { %v761_v22 = vmul.f32 %v646_v34, %v1247_v28  ;;  %vm623_vm14 = vweird.f32 %v1615_v1  ;;  %870 = vrcp.f32 %v1643_v41  ;;  %v459_v46 = vsub.f32 0.0, %v1636_v59  ;;  %vm305_vm15 = vmor %vm303_vm10, %vm304_vm12 }
 0x126   :  { %v775_v13 = vmul.f32 %v759_v17, %v423_v24  ;;  %v302_v37 = vmul.f32 %v1596_v51, %v301_v26  ;;  %vm1657_vm13 = vcmp.eq.f32.partialorder %v627_v20, 8.507059e+37  ;;  %v290_v4 = vmul.f32 0.5, %v289_v9 }
 0x127   :  { %v308_v56 = vmul.f32 %v1647_v6, %v1594_v2  ;;  %v867_v49 = vpop.eup %866  ;;  %v630_v28 = vor.u32 1.1754944e-38, %v629_v8  ;;  %vm294_vm1 = vweird.f32 %v1621_v30  ;;  %v657_v12 = vand.u32 2147483647, %v1643_v41 }
 0x128   :  { %vm313_vm2 = vweird.f32 %v1594_v2  ;;  %872 = vrsqrt.f32 %v1645_v36  ;;  %791 = vst.msk [vmem:[%s1992_s4 + $0x30] sm:$0xff] %vm33_vm0, %v775_v13  ;;  %v306_v23 = vsel %vm305_vm15, %v1596_v51, %v302_v37  ;;  %v619_v5 = vmul.f32 %v867_v49, %v1615_v1  ;;  %vm295_vm5 = vmor %vm293_vm11, %vm294_vm1 }
 0x129   :  { %v291_v27 = vsub.f32 1.5, %v290_v4  ;;  %vm653_vm3 = vweird.f32 %v1643_v41  ;;  %v869_v62 = vpop.eup %868  ;;  %v385_v7 = vmul.f32 %v306_v23, %v1089_v10  ;;  %v659_v15 = vand.u32 2147483648, %v1643_v41 }
 0x12a   :  { %v309_v61 = vmul.f32 %v1647_v6, %v308_v56  ;;  %v485_v21 = vmul.f32 1.442695, %v459_v46  ;;  %v620_v19 = vsub.f32 1.0, %v619_v5  ;;  %vm624_vm4 = vweird.f32 %v867_v49 }
 0x12b   :  { %v292_v58 = vmul.f32 %v1621_v30, %v291_v27  ;;  %v1680_v42 = vadd.f32 1.0, %v869_v62  ;;  %v871_v51 = vpop.eup %870  ;;  %v405_v14 = vmul.f32 %v1399_v39, %v385_v7  ;;  %vm1687_vm6 = vcmp.eq.f32.partialorder %v657_v12, 8.507059e+37  ;;  %vm1705_vm8 = vmor %vm623_vm14, %vm624_vm4 }
 0x12c   :  { %v310_v40 = vmul.f32 0.5, %v309_v61  ;;  %874 = vpow2.f32 %v485_v21  ;;  %v621_v18 = vmul.f32 %v867_v49, %v620_v19  ;;  %v649_v17 = vmul.f32 %v871_v51, %v1643_v41 }
 0x12d   :  { %v296_v44 = vsel %vm295_vm5, %v1621_v30, %v292_v58  ;;  %vm314_vm7 = vweird.f32 %v1647_v6  ;;  %v425_v3 = vadd.f32 %v1423_v11, %v405_v14  ;;  %876 = vrcp.f32 %v1680_v42  ;;  %v175_v58 = vpop.xlane.xlu1 %174  ;;  %v1767_v14 = vld [vmem:[%s1991_s1 + $0x70] sm:$0xff] }
 0x12e   :  { %v1699_v52 = vpop.eup %872  ;;  %v384_v30 = vmul.f32 %v296_v44, %v1099_v16  ;;  %v311_v34 = vsub.f32 1.5, %v310_v40  ;;  %v622_v63 = vadd.f32 %v867_v49, %v621_v18  ;;  %v650_v60 = vsub.f32 1.0, %v649_v17  ;;  %vm315_vm10 = vmor %vm313_vm2, %vm314_vm7 }
 0x12f   :  { %vm654_vm9 = vweird.f32 %v871_v51  ;;  %v195_v31 = vmul.f32 %v169_v29, %v1044_v38  ;;  %v777_v20 = vmul.f32 %v761_v22, %v425_v3  ;;  %v461_v1 = vsub.f32 0.0, %v1697_v45  ;;  %v1780_v3 = vld [vmem:[%s1991_s1 + $0x68] sm:$0xff] }
 0x130   :  { %v404_v0 = vmul.f32 %v1399_v39, %v384_v30  ;;  %v312_v8 = vmul.f32 %v1647_v6, %v311_v34  ;;  %v626_v24 = vsel %vm1705_vm8, %v867_v49, %v622_v63  ;;  %v651_v26 = vmul.f32 %v871_v51, %v650_v60  ;;  %vm1733_vm11 = vmor %vm653_vm3, %vm654_vm9 }
 0x131   :  { %v660_v16 = vor.u32 1.1754944e-38, %v659_v15  ;;  %v328_v9 = vmul.f32 %v1699_v52, %v1645_v36  ;;  %793 = vst.msk [vmem:[%s1992_s4 + $0x40] sm:$0xff] %vm33_vm0, %v777_v20  ;;  %v631_v46 = vsel %vm1657_vm13, %v630_v28, %v626_v24  ;;  %v687_v4 = vand.u32 2147483647, %v1680_v42 }
 0x132   :  { %v875_v22 = vpop.eup %874  ;;  %v424_v13 = vadd.f32 %v1423_v11, %v404_v0  ;;  %v316_v37 = vsel %vm315_vm10, %v1647_v6, %v312_v8  ;;  %v760_v56 = vmul.f32 %v631_v46, %v1507_v57  ;;  %v652_v49 = vadd.f32 %v871_v51, %v651_v26 }
 0x133   :  { %v386_v12 = vmul.f32 %v316_v37, %v1115_v33  ;;  %v329_v53 = vmul.f32 %v1699_v52, %v328_v9  ;;  %v877_v28 = vpop.eup %876  ;;  %vm683_vm12 = vweird.f32 %v1680_v42  ;;  %v1743_v23 = vadd.f32 1.0, %v875_v22 }
 0x134   :  { %v1745_v41 = vadd.f32 1e-05, %v195_v31  ;;  %v489_v5 = vmul.f32 1.442695, %v461_v1  ;;  %v776_v27 = vmul.f32 %v760_v56, %v424_v13  ;;  %v656_v6 = vsel %vm1733_vm11, %v871_v51, %v652_v49  ;;  %v178_v13 = vpop.xlane.xlu2 %177 }
 0x135   :  { %v406_v62 = vmul.f32 %v1399_v39, %v386_v12  ;;  %v679_v57 = vmul.f32 %v877_v28, %v1680_v42  ;;  %v661_v33 = vsel %vm1687_vm6, %v660_v16, %v656_v6  ;;  %v689_v7 = vand.u32 2147483648, %v1680_v42  ;;  %v1831_v6 = vld [vmem:[%s1991_s1 + $0x78] sm:$0xff]  ;;  %v184_v29 = vpop.xlane.xlu1 %183 }
 0x136   :  { %v330_v15 = vmul.f32 0.5, %v329_v53  ;;  %878 = vrcp.f32 %v1743_v23  ;;  %792 = vst.msk [vmem:[%s1992_s4 + $0x38] sm:$0xff] %vm33_vm0, %v776_v27  ;;  %v762_v61 = vmul.f32 %v661_v33, %v1542_v55  ;;  %vm684_vm14 = vweird.f32 %v877_v28  ;;  %v181_v55 = vpop.xlane.xlu0 %180 }
 0x137   :  { %v426_v21 = vadd.f32 %v1423_v11, %v406_v62  ;;  %v680_v19 = vsub.f32 1.0, %v679_v57  ;;  %vm333_vm13 = vweird.f32 %v1645_v36  ;;  %vm334_vm15 = vweird.f32 %v1699_v52  ;;  %vm1771_vm1 = vmor %vm683_vm12, %vm684_vm14 }
 0x138   :  { %v331_v51 = vsub.f32 1.5, %v330_v15  ;;  %880 = vrsqrt.f32 %v1745_v41  ;;  %v690_v18 = vor.u32 1.1754944e-38, %v689_v7  ;;  %v197_v17 = vmul.f32 %v175_v58, %v1044_v38  ;;  %vm335_vm3 = vmor %vm333_vm13, %vm334_vm15 }
 0x139   :  { %v778_v10 = vmul.f32 %v762_v61, %v426_v21  ;;  %v681_v40 = vmul.f32 %v877_v28, %v680_v19  ;;  %882 = vpow2.f32 %v489_v5  ;;  %vm688_vm2 = vcmp.eq.f32.partialorder %v687_v4, 8.507059e+37 }
 0x13a   :  { %v332_v44 = vmul.f32 %v1699_v52, %v331_v51  ;;  %vm668_vm4 = vweird.f32 %v1743_v23  ;;  %v463_v43 = vsub.f32 0.0, %v1767_v14  ;;  %v672_v63 = vand.u32 2147483647, %v1743_v23 }
 0x13b   :  { %794 = vst.msk [vmem:[%s1992_s4 + $0x48] sm:$0xff] %vm33_vm0, %v778_v10  ;;  %v682_v42 = vadd.f32 %v877_v28, %v681_v40  ;;  %v1796_v60 = vadd.f32 1e-05, %v197_v17  ;;  %v199_v31 = vmul.f32 %v181_v55, %v1044_v38  ;;  %v462_v8 = vsub.f32 0.0, %v1780_v3 }
 0x13c   :  { %v1792_v30 = vpop.eup %878  ;;  %v336_v34 = vsel %vm335_vm3, %v1699_v52, %v332_v44  ;;  %v674_v52 = vand.u32 2147483648, %v1743_v23  ;;  %v493_v26 = vmul.f32 1.442695, %v463_v43  ;;  %vm323_vm6 = vweird.f32 %v1745_v41 }
 0x13d   :  { %v686_v20 = vsel %vm1771_vm1, %v877_v28, %v682_v42  ;;  %v388_v36 = vmul.f32 %v336_v34, %v1112_v32  ;;  %v664_v0 = vmul.f32 %v1792_v30, %v1743_v23  ;;  %884 = vrsqrt.f32 %v1796_v60 }
 0x13e   :  { %v881_v1 = vpop.eup %880  ;;  %v691_v24 = vsel %vm688_vm2, %v690_v18, %v686_v20  ;;  %vm669_vm5 = vweird.f32 %v1792_v30  ;;  %886 = vpow2.f32 %v493_v26  ;;  %v1813_v37 = vadd.f32 1e-05, %v199_v31 }
 0x13f   :  { %v883_v16 = vpop.eup %882  ;;  %v764_v9 = vmul.f32 %v691_v24, %v1568_v54  ;;  %v408_v22 = vmul.f32 %v1399_v39, %v388_v36  ;;  %v665_v46 = vsub.f32 1.0, %v664_v0  ;;  %v318_v32 = vmul.f32 %v881_v1, %v1745_v41  ;;  %vm1823_vm7 = vmor %vm668_vm4, %vm669_vm5 }
 0x140   :  { %v1811_v2 = vadd.f32 1.0, %v883_v16  ;;  %v491_v12 = vmul.f32 1.442695, %v462_v8  ;;  %v198_v54 = vmul.f32 %v178_v13, %v1044_v38  ;;  %vm1835_vm8 = vcmp.eq.f32.partialorder %v672_v63, 8.507059e+37 }
 0x141   :  { %v428_v4 = vadd.f32 %v1423_v11, %v408_v22  ;;  %v666_v56 = vmul.f32 %v1792_v30, %v665_v46  ;;  %v319_v49 = vmul.f32 %v881_v1, %v318_v32  ;;  %v675_v7 = vor.u32 1.1754944e-38, %v674_v52 }
 0x142   :  { %888 = vrcp.f32 %v1811_v2  ;;  %v702_v23 = vand.u32 2147483647, %v1811_v2  ;;  %v704_v33 = vand.u32 2147483648, %v1811_v2  ;;  %vm324_vm9 = vweird.f32 %v881_v1 }
 0x143   :  { %v780_v53 = vmul.f32 %v764_v9, %v428_v4  ;;  %v667_v28 = vadd.f32 %v1792_v30, %v666_v56  ;;  %v320_v27 = vmul.f32 0.5, %v319_v49  ;;  %890 = vrsqrt.f32 %v1813_v37  ;;  %v1833_v62 = vpop.eup %884  ;;  %vm325_vm12 = vmor %vm323_vm6, %vm324_vm9 }
 0x144   :  { %892 = vpow2.f32 %v491_v12  ;;  %v338_v61 = vmul.f32 %v1833_v62, %v1796_v60  ;;  %v887_v21 = vpop.eup %886  ;;  %vm343_vm10 = vweird.f32 %v1796_v60  ;;  %v1851_v58 = vadd.f32 1e-05, %v198_v54 }
 0x145   :  { %796 = vst.msk [vmem:[%s1992_s4 + $0x58] sm:$0xff] %vm33_vm0, %v780_v53  ;;  %v321_v15 = vsub.f32 1.5, %v320_v27  ;;  %v671_v19 = vsel %vm1823_vm7, %v1792_v30, %v667_v28  ;;  %v464_v51 = vsub.f32 0.0, %v1831_v6  ;;  %vm698_vm11 = vweird.f32 %v1811_v2 }
 0x146   :  { %v339_v40 = vmul.f32 %v1833_v62, %v338_v61  ;;  %v1856_v55 = vadd.f32 1.0, %v887_v21  ;;  %vm1860_vm14 = vcmp.eq.f32.partialorder %v702_v23, 8.507059e+37  ;;  %v705_v17 = vor.u32 1.1754944e-38, %v704_v33 }
 0x147   :  { %v322_v10 = vmul.f32 %v881_v1, %v321_v15  ;;  %vm344_vm13 = vweird.f32 %v1833_v62  ;;  %894 = vrsqrt.f32 %v1851_v58  ;;  %v676_v43 = vsel %vm1835_vm8, %v675_v7, %v671_v19 }
 0x148   :  { %v889_v18 = vpop.eup %888  ;;  %v340_v63 = vmul.f32 0.5, %v339_v40  ;;  %vm363_vm15 = vweird.f32 %v1813_v37  ;;  %896 = vrcp.f32 %v1856_v55  ;;  %v200_v20 = vmul.f32 %v184_v29, %v1044_v38  ;;  %vm345_vm2 = vmor %vm343_vm10, %vm344_vm13 }
 0x149   :  { %v1866_v42 = vpop.eup %890  ;;  %v326_v30 = vsel %vm325_vm12, %v881_v1, %v322_v10  ;;  %v694_v34 = vmul.f32 %v889_v18, %v1811_v2  ;;  %vm699_vm1 = vweird.f32 %v889_v18  ;;  %v732_v8 = vand.u32 2147483647, %v1856_v55 }
 0x14a   :  { %v893_v41 = vpop.eup %892  ;;  %v387_v31 = vmul.f32 %v326_v30, %v1120_v35  ;;  %v341_v0 = vsub.f32 1.5, %v340_v63  ;;  %v358_v1 = vmul.f32 %v1866_v42, %v1813_v37  ;;  %v763_v24 = vmul.f32 %v676_v43, %v1636_v59  ;;  %vm1895_vm3 = vmor %vm698_vm11, %vm699_vm1 }
 0x14b   :  { %v695_v36 = vsub.f32 1.0, %v694_v34  ;;  %v1880_v26 = vadd.f32 1.0, %v893_v41  ;;  %v495_v16 = vmul.f32 1.442695, %v464_v51  ;;  %v734_v38 = vand.u32 2147483648, %v1856_v55 }
 0x14c   :  { %v407_v52 = vmul.f32 %v1399_v39, %v387_v31  ;;  %v342_v9 = vmul.f32 %v1833_v62, %v341_v0  ;;  %v359_v22 = vmul.f32 %v1866_v42, %v358_v1  ;;  %vm728_vm4 = vweird.f32 %v1856_v55 }
 0x14d   :  { %v696_v35 = vmul.f32 %v889_v18, %v695_v36  ;;  %v1889_v46 = vpop.eup %894  ;;  %898 = vrcp.f32 %v1880_v26  ;;  %v1901_v60 = vadd.f32 1e-05, %v200_v20  ;;  %vm1904_vm5 = vcmp.eq.f32.partialorder %v732_v8, 8.507059e+37 }
 0x14e   :  { %v427_v59 = vadd.f32 %v1423_v11, %v407_v52  ;;  %v346_v4 = vsel %vm345_vm2, %v1833_v62, %v342_v9  ;;  %v360_v49 = vmul.f32 0.5, %v359_v22  ;;  %v897_v12 = vpop.eup %896  ;;  %vm364_vm6 = vweird.f32 %v1866_v42 }
 0x14f   :  { %v697_v13 = vadd.f32 %v889_v18, %v696_v35  ;;  %v389_v54 = vmul.f32 %v346_v4, %v1136_v48  ;;  %v348_v53 = vmul.f32 %v1889_v46, %v1851_v58  ;;  %v724_v5 = vmul.f32 %v897_v12, %v1856_v55  ;;  %vm365_vm8 = vmor %vm363_vm15, %vm364_vm6 }
 0x150   :  { %v779_v2 = vmul.f32 %v763_v24, %v427_v59  ;;  %v735_v27 = vor.u32 1.1754944e-38, %v734_v38  ;;  %v361_v62 = vsub.f32 1.5, %v360_v49  ;;  %v717_v23 = vand.u32 2147483647, %v1880_v26 }
 0x151   :  { %v701_v28 = vsel %vm1895_vm3, %v889_v18, %v697_v13  ;;  %v409_v57 = vmul.f32 %v1399_v39, %v389_v54  ;;  %v349_v33 = vmul.f32 %v1889_v46, %v348_v53  ;;  %v725_v15 = vsub.f32 1.0, %v724_v5 }
 0x152   :  { %795 = vst.msk [vmem:[%s1992_s4 + $0x50] sm:$0xff] %vm33_vm0, %v779_v2  ;;  %v706_v48 = vsel %vm1860_vm14, %v705_v17, %v701_v28  ;;  %vm729_vm7 = vweird.f32 %v897_v12  ;;  %v362_v61 = vmul.f32 %v1866_v42, %v361_v62  ;;  %v719_v51 = vand.u32 2147483648, %v1880_v26 }
 0x153   :  { %v765_v7 = vmul.f32 %v706_v48, %v1697_v45  ;;  %v899_v21 = vpop.eup %898  ;;  %v429_v19 = vadd.f32 %v1423_v11, %v409_v57  ;;  %v350_v10 = vmul.f32 0.5, %v349_v33  ;;  %900 = vpow2.f32 %v495_v16  ;;  %vm1937_vm10 = vmor %vm728_vm4, %vm729_vm7 }
 0x154   :  { %v726_v40 = vmul.f32 %v897_v12, %v725_v15  ;;  %v366_v29 = vsel %vm365_vm8, %v1866_v42, %v362_v61  ;;  %v709_v45 = vmul.f32 %v899_v21, %v1880_v26  ;;  %vm354_vm9 = vweird.f32 %v1889_v46 }
 0x155   :  { %v781_v18 = vmul.f32 %v765_v7, %v429_v19  ;;  %v391_v37 = vmul.f32 %v366_v29, %v1133_v47  ;;  %v351_v17 = vsub.f32 1.5, %v350_v10  ;;  %902 = vrsqrt.f32 %v1901_v60 }
 0x156   :  { %v727_v43 = vadd.f32 %v897_v12, %v726_v40  ;;  %v710_v30 = vsub.f32 1.0, %v709_v45  ;;  %vm713_vm11 = vweird.f32 %v1880_v26  ;;  %vm714_vm12 = vweird.f32 %v899_v21 }
 0x157   :  { %797 = vst.msk [vmem:[%s1992_s4 + $0x60] sm:$0xff] %vm33_vm0, %v781_v18  ;;  %v411_v55 = vmul.f32 %v1399_v39, %v391_v37  ;;  %v352_v42 = vmul.f32 %v1889_v46, %v351_v17  ;;  %vm353_vm14 = vweird.f32 %v1851_v58  ;;  %vm1953_vm13 = vcmp.eq.f32.partialorder %v717_v23, 8.507059e+37  ;;  %vm715_vm1 = vmor %vm713_vm11, %vm714_vm12 }
 0x158   :  { %v731_v47 = vsel %vm1937_vm10, %v897_v12, %v727_v43  ;;  %v711_v34 = vmul.f32 %v899_v21, %v710_v30  ;;  %vm355_vm15 = vmor %vm353_vm14, %vm354_vm9  ;;  %v720_v36 = vor.u32 1.1754944e-38, %v719_v51 }
 0x159   :  { %v901_v41 = vpop.eup %900  ;;  %v736_v31 = vsel %vm1904_vm5, %v735_v27, %v731_v47  ;;  %v431_v20 = vadd.f32 %v1423_v11, %v411_v55  ;;  %v356_v58 = vsel %vm355_vm15, %v1889_v46, %v352_v42  ;;  %vm373_vm5 = vweird.f32 %v1901_v60 }
 0x15a   :  { %v767_v0 = vmul.f32 %v736_v31, %v1767_v14  ;;  %v712_v8 = vadd.f32 %v899_v21, %v711_v34  ;;  %v390_v1 = vmul.f32 %v356_v58, %v1141_v50  ;;  %v512_v24 = vadd.f32 1.0, %v901_v41 }
 0x15b   :  { %v903_v52 = vpop.eup %902 }
 0x15c   :  { %v783_v26 = vmul.f32 %v767_v0, %v431_v20  ;;  %v716_v16 = vsel %vm715_vm1, %v899_v21, %v712_v8  ;;  %v410_v35 = vmul.f32 %v1399_v39, %v390_v1  ;;  %904 = vrcp.f32 %v512_v24 }
 0x15d   :  { %v721_v9 = vsel %vm1953_vm13, %v720_v36, %v716_v16  ;;  %v368_v50 = vmul.f32 %v903_v52, %v1901_v60  ;;  %v749_v4 = vand.u32 2147483648, %v512_v24  ;;  %vm374_vm2 = vweird.f32 %v903_v52 }
 0x15e   :  { %799 = vst.msk [vmem:[%s1992_s4 + $0x70] sm:$0xff] %vm33_vm0, %v783_v26  ;;  %v766_v14 = vmul.f32 %v721_v9, %v1780_v3  ;;  %v430_v38 = vadd.f32 %v1423_v11, %v410_v35  ;;  %vm743_vm3 = vweird.f32 %v512_v24  ;;  %v747_v3 = vand.u32 2147483647, %v512_v24  ;;  %vm375_vm6 = vmor %vm373_vm5, %vm374_vm2 }
 0x15f   :  { %v369_v46 = vmul.f32 %v903_v52, %v368_v50  ;;  %v750_v54 = vor.u32 1.1754944e-38, %v749_v4 }
 0x160   :  { %v782_v22 = vmul.f32 %v766_v14, %v430_v38  ;;  %vm748_vm8 = vcmp.eq.f32.partialorder %v747_v3, 8.507059e+37 }
 0x161   :  { %v370_v32 = vmul.f32 0.5, %v369_v46 }
 0x162   :  { %v905_v59 = vpop.eup %904  ;;  %798 = vst.msk [vmem:[%s1992_s4 + $0x68] sm:$0xff] %vm33_vm0, %v782_v22 }
 0x163   :  { %v739_v13 = vmul.f32 %v905_v59, %v512_v24  ;;  %v371_v56 = vsub.f32 1.5, %v370_v32  ;;  %vm744_vm4 = vweird.f32 %v905_v59 }
 0x164   :  { %vm745_vm7 = vmor %vm743_vm3, %vm744_vm4 }
 0x165   :  { %v740_v49 = vsub.f32 1.0, %v739_v13  ;;  %v372_v12 = vmul.f32 %v903_v52, %v371_v56 }
 0x167   :  { %v741_v2 = vmul.f32 %v905_v59, %v740_v49  ;;  %v376_v53 = vsel %vm375_vm6, %v903_v52, %v372_v12 }
 0x168   :  { %v392_v5 = vmul.f32 %v376_v53, %v1152_v25 }
 0x169   :  { %v742_v28 = vadd.f32 %v905_v59, %v741_v2 }
 0x16a   :  { %v412_v62 = vmul.f32 %v1399_v39, %v392_v5 }
 0x16b   :  { %v746_v27 = vsel %vm745_vm7, %v905_v59, %v742_v28 }
 0x16c   :  { %v751_v48 = vsel %vm748_vm8, %v750_v54, %v746_v27  ;;  %v432_v23 = vadd.f32 %v1423_v11, %v412_v62 }
 0x16d   :  { %v768_v57 = vmul.f32 %v751_v48, %v1831_v6 }
 0x16f   :  { %v784_v33 = vmul.f32 %v768_v57, %v432_v23 }
 0x171   :  { %800 = vst.msk [vmem:[%s1992_s4 + $0x78] sm:$0xff] %vm33_vm0, %v784_v33 }

// kernel: ss2d_forward.12
= control target key start
LH: loop header
LB: loop body
LE: loop exit
PB: predicated region body
PF: predicated region fallthrough
CT: control target
= control target key end

     0   :  { %vm15_vm0 = vcmask 517120   ;;  %v67_v2 = vmov 64.0   ;;  %s103_s0 = inlined_call_operand.vmem [shape: f32[2,64], index: 0, kind: input, shape index: {}]   ;;  %s104_s1 = inlined_call_operand.vmem [shape: f32[1,64], index: 1, kind: input, shape index: {}]   ;;  %s105_s2 = inlined_call_operand.vmem [shape: f32[1,64], index: 2, kind: input, shape index: {}]   ;;  %s106_s3 = inlined_call_operand.vmem [shape: f32[2,64], index: 3, kind: output, shape index: {}]  }
   0x1   :  { %v14_v0 = vld [vmem:[%s103_s0] sm:$0x3]  ;;  %63 = vrcp.f32 %v67_v2 }
   0x2   :  { %v16_v1 = vsel %vm15_vm0, %v14_v0, 0.0  ;;  %v61_v23 = vld [vmem:[%s104_s1] ss:$0 sm:$0xff] }
   0x3   :  { %17 = vadd.xlane.f32.xlu0 %v16_v1  ;;  %v62_v25 = vld [vmem:[%s105_s2] ss:$0 sm:$0xff] }
   0x7   :  { %v64_v3 = vpop.eup %63 }
   0x8   :  { %v20_v4 = vmul.f32 64.0, %v64_v3  ;;  %vm24_vm1 = vweird.f32 %v64_v3 }
   0xa   :  { %v21_v5 = vsub.f32 1.0, %v20_v4 }
   0xc   :  { %v22_v6 = vmul.f32 %v64_v3, %v21_v5 }
   0xe   :  { %v23_v7 = vadd.f32 %v64_v3, %v22_v6 }
  0x10   :  { %v25_v8 = vsel %vm24_vm1, %v64_v3, %v23_v7 }
  0x76   :  { %v18_v9 = vpop.xlane.xlu0 %17 }
  0x77   :  { %v26_v10 = vmul.f32 %v25_v8, %v18_v9 }
  0x79   :  { %v27_v11 = vsub.f32 %v14_v0, %v26_v10 }
  0x7b   :  { %v28_v12 = vmul.f32 %v27_v11, %v27_v11 }
  0x7d   :  { %v29_v13 = vsel %vm15_vm0, %v28_v12, 0.0 }
  0x7e   :  { %30 = vadd.xlane.f32.xlu0 %v29_v13 }
  0xf1   :  { %v31_v14 = vpop.xlane.xlu0 %30 }
  0xf2   :  { %v32_v15 = vmul.f32 %v31_v14, %v25_v8 }
  0xf4   :  { %v33_v16 = vadd.f32 1e-05, %v32_v15 }
  0xf6   :  { %65 = vrsqrt.f32 %v33_v16  ;;  %vm40_vm3 = vweird.f32 %v33_v16 }
  0xfc   :  { %v66_v17 = vpop.eup %65 }
  0xfd   :  { %v35_v18 = vmul.f32 %v66_v17, %v33_v16  ;;  %vm41_vm2 = vweird.f32 %v66_v17 }
  0xfe   :  { %vm42_vm4 = vmor %vm40_vm3, %vm41_vm2 }
  0xff   :  { %v36_v19 = vmul.f32 %v66_v17, %v35_v18 }
 0x101   :  { %v37_v20 = vmul.f32 0.5, %v36_v19 }
 0x103   :  { %v38_v21 = vsub.f32 1.5, %v37_v20 }
 0x105   :  { %v39_v22 = vmul.f32 %v66_v17, %v38_v21 }
 0x107   :  { %v43_v24 = vsel %vm42_vm4, %v66_v17, %v39_v22 }
 0x108   :  { %v44_v26 = vmul.f32 %v43_v24, %v27_v11 }
 0x10a   :  { %v49_v27 = vmul.f32 %v61_v23, %v44_v26 }
 0x10c   :  { %v54_v28 = vadd.f32 %v62_v25, %v49_v27 }
 0x10e   :  { %55 = vst.msk [vmem:[%s106_s3] sm:$0x3] %vm15_vm0, %v54_v28 }

// kernel: ss2d_forward.13
= control target key start
LH: loop header
LB: loop body
LE: loop exit
PB: predicated region body
PF: predicated region fallthrough
CT: control target
= control target key end

     0   :  { %vm43_vm0 = vcmask 523264   ;;  %s1442_s0 = inlined_call_operand.vmem [shape: f32[128,64], index: 0, kind: input, shape index: {}]   ;;  %s1443_s1 = inlined_call_operand.vmem [shape: f32[64,32], index: 1, kind: input, shape index: {}]   ;;  %s1444_s2 = inlined_call_operand.vmem [shape: f32[1,32], index: 2, kind: input, shape index: {}]   ;;  %s1445_s3 = inlined_call_operand.hbm [shape: f32[128,32], index: 3, kind: output, shape index: {}]  }
   0x1   :  { %v38_v0 = vld [vmem:[%s1443_s1 + $0x38] sm:$0xff]  ;;  %v37_v1 = vld [vmem:[%s1443_s1 + $0x30] sm:$0xff]  ;;  %v36_v2 = vld [vmem:[%s1443_s1 + $0x28] sm:$0xff] }
   0x2   :  { %v907_v3 = vand.u32 4294901760, %v38_v0  ;;  %v909_v4 = vand.u32 4294901760, %v37_v1  ;;  %v911_v5 = vand.u32 4294901760, %v36_v2  ;;  %v35_v6 = vld [vmem:[%s1443_s1 + $0x20] sm:$0xff]  ;;  %v34_v7 = vld [vmem:[%s1443_s1 + $0x18] sm:$0xff]  ;;  %v33_v8 = vld [vmem:[%s1443_s1 + $0x10] sm:$0xff] }
   0x3   :  { %v922_v9 = vand.u32 4294901760, %v35_v6  ;;  %v924_v10 = vand.u32 4294901760, %v34_v7  ;;  %v926_v11 = vand.u32 4294901760, %v33_v8  ;;  %v32_v12 = vld [vmem:[%s1443_s1 + $0x8] sm:$0xff]  ;;  %v31_v13 = vld [vmem:[%s1443_s1] sm:$0xff] }
   0x4   :  { %v23_v14 = vld [vmem:[%s1442_s0 + $0x40] sm:$0xff]  ;;  %829 = vmatpush.msra.mxu2 %v907_v3  ;;  %v939_v15 = vsub.f32 %v38_v0, %v907_v3  ;;  %v942_v16 = vsub.f32 %v37_v1, %v909_v4  ;;  %v944_v17 = vand.u32 4294901760, %v32_v12  ;;  %v947_v18 = vsub.f32 %v36_v2, %v911_v5  ;;  %101 = vmatpush.msra.mxu0 %v907_v3 }
   0x5   :  { %v950_v19 = vand.u32 4294901760, %v31_v13  ;;  %v953_v20 = vsub.f32 %v35_v6, %v922_v9  ;;  %v69_v21 = vsel %vm43_vm0, %v23_v14, 0  ;;  %v957_v22 = vsub.f32 %v34_v7, %v924_v10 }
   0x6   :  { %830 = vmatpush.msra.mxu2 %v909_v4  ;;  %v255_v23 = vand.u32 4294901760, %v939_v15  ;;  %v261_v24 = vand.u32 4294901760, %v942_v16  ;;  %v267_v25 = vand.u32 4294901760, %v947_v18  ;;  %v963_v26 = vand.u32 4294901760, %v69_v21  ;;  %103 = vmatpush.msra.mxu0 %v909_v4 }
   0x7   :  { %8 = vsyncpa [#allocation3], 0  ;;  %v273_v27 = vand.u32 4294901760, %v953_v20  ;;  %v279_v28 = vand.u32 4294901760, %v957_v22  ;;  %v969_v29 = vsub.f32 %v33_v8, %v926_v11  ;;  %v972_v30 = vsub.f32 %v32_v12, %v944_v17  ;;  %v24_v37 = vld [vmem:[%s1442_s0 + $0x48] sm:$0xff]  ;;  %v15_v38 = vld [vmem:[%s1442_s0] sm:$0xff] }
   0x8   :  { %831 = vmatpush.msra.mxu2 %v911_v5  ;;  %v256_v31 = vsub.f32 %v939_v15, %v255_v23  ;;  %v262_v32 = vsub.f32 %v942_v16, %v261_v24  ;;  %v268_v33 = vsub.f32 %v947_v18, %v267_v25  ;;  %v985_v34 = vsub.f32 %v69_v21, %v963_v26  ;;  %v25_v45 = vld [vmem:[%s1442_s0 + $0x50] sm:$0xff]  ;;  %v16_v46 = vld [vmem:[%s1442_s0 + $0x8] sm:$0xff]  ;;  %v26_v0 = vld [vmem:[%s1442_s0 + $0x58] sm:$0xff]  ;;  %s817_s8 = sshll.u32 %s1445_s3, 4  ;;  %s876_s9 = smov 128   ;;  %s818_s8 = int_to_ptr.hbm [resolvable:$true] %s817_s8 }
   0x9   :  { %v274_v35 = vsub.f32 %v953_v20, %v273_v27  ;;  %v285_v36 = vand.u32 4294901760, %v969_v29  ;;  %105 = vmatpush.msra.mxu0 %v911_v5  ;;  %v280_v43 = vsub.f32 %v957_v22, %v279_v28  ;;  %v291_v44 = vand.u32 4294901760, %v972_v30  ;;  %v17_v55 = vld [vmem:[%s1442_s0 + $0x10] sm:$0xff]  ;;  %s877_s10 = smov 8  }
   0xa   :  { %832 = vmatpush.msra.mxu2 %v922_v9  ;;  %v257_v39 = vand.u32 4294901760, %v256_v31  ;;  %v263_v40 = vand.u32 4294901760, %v262_v32  ;;  %v182_v41 = vand.u32 4294901760, %v985_v34  ;;  %v269_v42 = vand.u32 4294901760, %v268_v33 }
   0xb   :  { %107 = vmatpush.msra.mxu0 %v922_v9  ;;  %v1016_v48 = vsub.f32 %v31_v13, %v950_v19  ;;  %v72_v49 = vsel %vm43_vm0, %v24_v37, 0  ;;  %v45_v50 = vsel %vm43_vm0, %v15_v38, 0  ;;  %v275_v51 = vand.u32 4294901760, %v274_v35 }
   0xc   :  { %833 = vmatpush.msra.mxu2 %v924_v10  ;;  %837 = vmatpush.msra.mxu3 %v257_v39  ;;  %v183_v47 = vsub.f32 %v985_v34, %v182_v41  ;;  %v286_v52 = vsub.f32 %v969_v29, %v285_v36  ;;  %v1023_v53 = vand.u32 4294901760, %v72_v49  ;;  %v1026_v54 = vand.u32 4294901760, %v45_v50 }
   0xd   :  { %258 = vmatpush.msra.mxu1 %v257_v39  ;;  %109 = vmatpush.msra.mxu0 %v924_v10  ;;  %v297_v57 = vand.u32 4294901760, %v1016_v48  ;;  %v75_v58 = vsel %vm43_vm0, %v25_v45, 0  ;;  %v48_v59 = vsel %vm43_vm0, %v16_v46, 0  ;;  %v281_v1 = vand.u32 4294901760, %v280_v43 }
   0xe   :  { %834 = vmatpush.msra.mxu2 %v926_v11  ;;  %838 = vmatpush.msra.mxu3 %v263_v40  ;;  %v184_v56 = vand.u32 4294901760, %v183_v47  ;;  %v1036_v60 = vsub.f32 %v72_v49, %v1023_v53  ;;  %v1040_v61 = vsub.f32 %v45_v50, %v1026_v54  ;;  %v1042_v62 = vand.u32 4294901760, %v75_v58  ;;  %v27_v50 = vld [vmem:[%s1442_s0 + $0x60] sm:$0xff] }
   0xf   :  { %264 = vmatpush.msra.mxu1 %v263_v40  ;;  %111 = vmatpush.msra.mxu0 %v926_v11  ;;  %v1044_v63 = vand.u32 4294901760, %v48_v59  ;;  %v292_v2 = vsub.f32 %v972_v30, %v291_v44  ;;  %v51_v6 = vsel %vm43_vm0, %v17_v55, 0  ;;  %v287_v13 = vand.u32 4294901760, %v286_v52  ;;  %v18_v40 = vld [vmem:[%s1442_s0 + $0x18] sm:$0xff] }
  0x10   :  { %835 = vmatpush.msra.mxu2 %v944_v17  ;;  %839 = vmatpush.msra.mxu3 %v269_v42  ;;  %v190_v7 = vand.u32 4294901760, %v1036_v60  ;;  %v118_v8 = vand.u32 4294901760, %v1040_v61  ;;  %v298_v14 = vsub.f32 %v1016_v48, %v297_v57  ;;  %v1065_v21 = vsub.f32 %v75_v58, %v1042_v62 }
  0x11   :  { %270 = vmatpush.msra.mxu1 %v269_v42  ;;  %113 = vmatpush.msra.mxu0 %v944_v17  ;;  %v1058_v12 = vsub.f32 %v48_v59, %v1044_v63  ;;  %v78_v31 = vsel %vm43_vm0, %v26_v0, 0  ;;  %v1075_v37 = vand.u32 4294901760, %v51_v6  ;;  %v293_v38 = vand.u32 4294901760, %v292_v2 }
  0x12   :  { %836 = vmatpush.msra.mxu2 %v950_v19  ;;  %840 = vmatpush.msra.mxu3 %v275_v51  ;;  %v191_v32 = vsub.f32 %v1036_v60, %v190_v7  ;;  %v119_v33 = vsub.f32 %v1040_v61, %v118_v8  ;;  %v299_v42 = vand.u32 4294901760, %v298_v14  ;;  %v1083_v43 = vand.u32 4294901760, %v78_v31 }
  0x13   :  { %185 = vmatmul.f32.vlgmr.msra.gmra.mxu2 %v184_v56  ;;  %276 = vmatpush.msra.mxu1 %v275_v51  ;;  %v126_v35 = vand.u32 4294901760, %v1058_v12  ;;  %v198_v46 = vand.u32 4294901760, %v1065_v21  ;;  %v1090_v49 = vsub.f32 %v51_v6, %v1075_v37  ;;  %v54_v51 = vsel %vm43_vm0, %v18_v40, 0  ;;  %v28_v6 = vld [vmem:[%s1442_s0 + $0x68] sm:$0xff] }
  0x14   :  { %841 = vmatpush.msra.mxu3 %v281_v1  ;;  %376 = vmatpush.msrb.mxu2 %v939_v15  ;;  %v120_v39 = vand.u32 4294901760, %v119_v33  ;;  %v192_v45 = vand.u32 4294901760, %v191_v32  ;;  %v1100_v52 = vsub.f32 %v78_v31, %v1083_v43  ;;  %v81_v55 = vsel %vm43_vm0, %v27_v50, 0 }
  0x15   :  { %282 = vmatpush.msra.mxu1 %v281_v1  ;;  %115 = vmatpush.msra.mxu0 %v950_v19  ;;  %v127_v47 = vsub.f32 %v1058_v12, %v126_v35  ;;  %v199_v15 = vsub.f32 %v1065_v21, %v198_v46  ;;  %v134_v56 = vand.u32 4294901760, %v1090_v49  ;;  %v1110_v58 = vand.u32 4294901760, %v54_v51 }
  0x16   :  { %842 = vmatpush.msra.mxu3 %v287_v13  ;;  %379 = vmatpush.msrb.mxu2 %v942_v16  ;;  %v19_v16 = vld [vmem:[%s1442_s0 + $0x20] sm:$0xff]  ;;  %v206_v0 = vand.u32 4294901760, %v1100_v52  ;;  %v84_v31 = vsel %vm43_vm0, %v28_v6, 0  ;;  %vm794_vm1 = vcmask 261120  }
  0x17   :  { %288 = vmatpush.msra.mxu1 %v287_v13  ;;  %121 = vmatmul.f32.vlgmr.msra.gmra.mxu0 %v120_v39  ;;  %v200_v59 = vand.u32 4294901760, %v199_v15  ;;  %v135_v1 = vsub.f32 %v1090_v49, %v134_v56  ;;  %v1128_v2 = vsub.f32 %v54_v51, %v1110_v58  ;;  %v29_v39 = vld [vmem:[%s1442_s0 + $0x70] sm:$0xff] }
  0x18   :  { %843 = vmatpush.msra.mxu3 %v293_v38  ;;  %611 = vmatpush.msrb.mxu0 %v255_v23  ;;  %v128_v23 = vand.u32 4294901760, %v127_v47 }
  0x19   :  { %294 = vmatpush.msra.mxu1 %v293_v38  ;;  %382 = vmatpush.msrb.mxu2 %v947_v18  ;;  %v136_v18 = vand.u32 4294901760, %v135_v1 }
  0x1a   :  { %844 = vmatpush.msra.mxu3 %v299_v42  ;;  %615 = vmatpush.msrb.mxu0 %v261_v24  ;;  %v1120_v24 = vand.u32 4294901760, %v81_v55 }
  0x1b   :  { %193 = vmatmul.f32.gmra.mxu2 %v192_v45  ;;  %334 = vmatmul.f32.vlgmr.msra.gmra.mxu3 %v963_v26 }
  0x1c   :  { %488 = vmatpush.msrb.mxu3 %v907_v3  ;;  %300 = vmatpush.msra.mxu1 %v299_v42  ;;  %v1140_v13 = vsub.f32 %v81_v55, %v1120_v24  ;;  %v87_v42 = vsel %vm43_vm0, %v29_v39, 0 }
  0x1d   :  { %302 = vmatmul.f32.vlgmr.msra.gmra.mxu1 %v1026_v54  ;;  %385 = vmatpush.msrb.mxu2 %v953_v20 }
  0x1e   :  { %490 = vmatpush.msrb.mxu3 %v909_v4  ;;  %714 = vmatpush.msrb.mxu1 %v907_v3  ;;  %v57_v3 = vsel %vm43_vm0, %v19_v16, 0  ;;  %v214_v32 = vand.u32 4294901760, %v1140_v13 }
  0x1f   :  { %129 = vmatmul.f32.gmra.mxu0 %v128_v23  ;;  %388 = vmatpush.msrb.mxu2 %v957_v22  ;;  %v1149_v14 = vand.u32 4294901760, %v57_v3  ;;  %v22_v23 = vld [vmem:[%s1442_s0 + $0x38] sm:$0xff] }
  0x20   :  { %492 = vmatpush.msrb.mxu3 %v911_v5  ;;  %716 = vmatpush.msrb.mxu1 %v909_v4  ;;  %v207_v4 = vsub.f32 %v1100_v52, %v206_v0  ;;  %v215_v40 = vsub.f32 %v1140_v13, %v214_v32 }
  0x21   :  { %619 = vmatpush.msrb.mxu0 %v267_v25  ;;  %391 = vmatpush.msrb.mxu2 %v969_v29  ;;  %v142_v25 = vand.u32 4294901760, %v1128_v2  ;;  %v1169_v38 = vsub.f32 %v57_v3, %v1149_v14  ;;  %v1201_v29 = vand.u32 4294901760, %v87_v42 }
  0x22   :  { %494 = vmatpush.msrb.mxu3 %v922_v9  ;;  %718 = vmatpush.msrb.mxu1 %v911_v5  ;;  %v20_v5 = vld [vmem:[%s1442_s0 + $0x28] sm:$0xff]  ;;  %v208_v33 = vand.u32 4294901760, %v207_v4  ;;  %v66_v4 = vsel %vm43_vm0, %v22_v23, 0 }
  0x23   :  { %201 = vmatmul.f32.gmra.mxu2 %v200_v59  ;;  %338 = vmatmul.f32.gmra.mxu3 %v1023_v53  ;;  %v143_v20 = vsub.f32 %v1128_v2, %v142_v25 }
  0x24   :  { %496 = vmatpush.msrb.mxu3 %v924_v10  ;;  %623 = vmatpush.msrb.mxu0 %v273_v27  ;;  %v1166_v27 = vand.u32 4294901760, %v84_v31 }
  0x25   :  { %306 = vmatmul.f32.gmra.mxu1 %v1044_v63  ;;  %394 = vmatpush.msrb.mxu2 %v972_v30  ;;  %v144_v22 = vand.u32 4294901760, %v143_v20  ;;  %v172_v20 = vand.u32 4294901760, %v66_v4 }
  0x26   :  { %720 = vmatpush.msrb.mxu1 %v922_v9  ;;  %498 = vmatpush.msrb.mxu3 %v926_v11  ;;  %v60_v9 = vsel %vm43_vm0, %v20_v5, 0 }
  0x27   :  { %137 = vmatmul.f32.gmra.mxu0 %v136_v18  ;;  %397 = vmatpush.msrb.mxu2 %v1016_v48  ;;  %v1192_v45 = vand.u32 4294901760, %v60_v9  ;;  %v1219_v48 = vsub.f32 %v87_v42, %v1201_v29  ;;  %v173_v42 = vsub.f32 %v66_v4, %v172_v20 }
  0x28   :  { %627 = vmatpush.msrb.mxu0 %v279_v28  ;;  %722 = vmatpush.msrb.mxu1 %v924_v10  ;;  %v1189_v10 = vsub.f32 %v84_v31, %v1166_v27  ;;  %v150_v28 = vand.u32 4294901760, %v1169_v38 }
  0x29   :  { %500 = vmatpush.msrb.mxu3 %v944_v17  ;;  %v230_v16 = vand.u32 4294901760, %v1219_v48 }
  0x2a   :  { %631 = vmatpush.msrb.mxu0 %v285_v36  ;;  %724 = vmatpush.msrb.mxu1 %v926_v11  ;;  %v21_v11 = vld [vmem:[%s1442_s0 + $0x30] sm:$0xff]  ;;  %v216_v36 = vand.u32 4294901760, %v215_v40  ;;  %v222_v47 = vand.u32 4294901760, %v1189_v10  ;;  %v151_v30 = vsub.f32 %v1169_v38, %v150_v28 }
  0x2b   :  { %209 = vmatmul.f32.gmra.mxu2 %v208_v33  ;;  %342 = vmatmul.f32.gmra.mxu3 %v1042_v62  ;;  %v63_v50 = vsel %vm43_vm0, %v21_v11, 0  ;;  %v231_v18 = vsub.f32 %v1219_v48, %v230_v16 }
  0x2c   :  { %502 = vmatpush.msrb.mxu3 %v950_v19  ;;  %635 = vmatpush.msrb.mxu0 %v291_v44  ;;  %v1211_v44 = vsub.f32 %v60_v9, %v1192_v45  ;;  %v152_v51 = vand.u32 4294901760, %v151_v30  ;;  %v1226_v15 = vand.u32 4294901760, %v63_v50 }
  0x2d   :  { %310 = vmatmul.f32.gmra.mxu1 %v1075_v37  ;;  %v232_v39 = vand.u32 4294901760, %v231_v18 }
  0x2e   :  { %726 = vmatpush.msrb.mxu1 %v944_v17  ;;  %639 = vmatpush.msrb.mxu0 %v297_v57  ;;  %v30_v17 = vld [vmem:[%s1442_s0 + $0x78] sm:$0xff]  ;;  %v223_v57 = vsub.f32 %v1189_v10, %v222_v47  ;;  %v158_v55 = vand.u32 4294901760, %v1211_v44  ;;  %v165_v6 = vsub.f32 %v63_v50, %v1226_v15 }
  0x2f   :  { %145 = vmatmul.f32.gmra.mxu0 %v144_v22 }
  0x30   :  { %728 = vmatpush.msrb.mxu1 %v950_v19  ;;  %v90_v19 = vsel %vm43_vm0, %v30_v17, 0  ;;  %v224_v59 = vand.u32 4294901760, %v223_v57  ;;  %v159_v1 = vsub.f32 %v1211_v44, %v158_v55  ;;  %v166_v33 = vand.u32 4294901760, %v165_v6 }
  0x31   :  { %v1237_v3 = vand.u32 4294901760, %v90_v19 }
  0x32   :  { %v160_v31 = vand.u32 4294901760, %v159_v1  ;;  %v167_v40 = vsub.f32 %v165_v6, %v166_v33 }
  0x33   :  { %217 = vmatmul.f32.gmra.mxu2 %v216_v36  ;;  %346 = vmatmul.f32.gmra.mxu3 %v1083_v43  ;;  %v1246_v5 = vsub.f32 %v90_v19, %v1237_v3  ;;  %v174_v36 = vand.u32 4294901760, %v173_v42 }
  0x34   :  { %v168_v11 = vand.u32 4294901760, %v167_v40 }
  0x35   :  { %314 = vmatmul.f32.gmra.mxu1 %v1110_v58  ;;  %v238_v9 = vand.u32 4294901760, %v1246_v5  ;;  %v175_v50 = vsub.f32 %v173_v42, %v174_v36 }
  0x37   :  { %153 = vmatmul.f32.gmra.mxu0 %v152_v51  ;;  %v239_v22 = vsub.f32 %v1246_v5, %v238_v9  ;;  %v176_v17 = vand.u32 4294901760, %v175_v50 }
  0x39   :  { %v240_v30 = vand.u32 4294901760, %v239_v22 }
  0x3b   :  { %225 = vmatmul.f32.gmra.mxu2 %v224_v59  ;;  %350 = vmatmul.f32.gmra.mxu3 %v1120_v24 }
  0x3d   :  { %318 = vmatmul.f32.gmra.mxu1 %v1149_v14 }
  0x3f   :  { %161 = vmatmul.f32.gmra.mxu0 %v160_v31 }
  0x43   :  { %233 = vmatmul.f32.gmra.mxu2 %v232_v39  ;;  %354 = vmatmul.f32.gmra.mxu3 %v1166_v27 }
  0x45   :  { %322 = vmatmul.f32.gmra.mxu1 %v1192_v45 }
  0x47   :  { %169 = vmatmul.f32.gmra.mxu0 %v168_v11 }
  0x4b   :  { %241 = vmatmul.f32.gmra.mxu2 %v240_v30  ;;  %358 = vmatmul.f32.gmra.mxu3 %v1201_v29 }
  0x4d   :  { %326 = vmatmul.f32.gmra.mxu1 %v1226_v15 }
  0x4f   :  { %177 = vmatmul.f32.gmra.mxu0 %v176_v17 }
  0x53   :  { %362 = vmatmul.f32.gmra.mxu3 %v1237_v3  ;;  %400 = vmatmul.f32.vlgmr.msrb.gmra.mxu2 %v1040_v61 }
  0x55   :  { %330 = vmatmul.f32.gmra.mxu1 %v172_v20 }
  0x57   :  { %641 = vmatmul.f32.vlgmr.msrb.gmra.mxu0 %v1026_v54 }
  0x5b   :  { %405 = vmatmul.f32.gmra.mxu2 %v1058_v12  ;;  %506 = vmatmul.f32.vlgmr.msrb.gmra.mxu3 %v118_v8 }
  0x5d   :  { %730 = vmatmul.f32.vlgmr.msrb.gmra.mxu1 %v1026_v54  ;;  %v1294_v54 = vld [vmem:[%s1444_s2] ss:$0 sm:$0xff]  ;;  %s875_s2 = smov [#allocation2]  }
  0x5e   :  { %s815_s5 = sshll.u32 %s875_s2, 4  ;;  %s816_s5 = int_to_ptr.vmem [resolvable:$true] %s815_s5 }
  0x5f   :  { %645 = vmatmul.f32.gmra.mxu0 %v1044_v63 }
  0x63   :  { %410 = vmatmul.f32.gmra.mxu2 %v1090_v49  ;;  %512 = vmatmul.f32.gmra.mxu3 %v126_v35 }
  0x65   :  { %734 = vmatmul.f32.gmra.mxu1 %v1044_v63 }
  0x67   :  { %649 = vmatmul.f32.gmra.mxu0 %v1075_v37 }
  0x6b   :  { %415 = vmatmul.f32.gmra.mxu2 %v1128_v2  ;;  %518 = vmatmul.f32.gmra.mxu3 %v134_v56 }
  0x6d   :  { %738 = vmatmul.f32.gmra.mxu1 %v1075_v37 }
  0x6f   :  { %653 = vmatmul.f32.gmra.mxu0 %v1110_v58 }
  0x73   :  { %420 = vmatmul.f32.gmra.mxu2 %v1169_v38  ;;  %524 = vmatmul.f32.gmra.mxu3 %v142_v25 }
  0x75   :  { %742 = vmatmul.f32.gmra.mxu1 %v1110_v58 }
  0x77   :  { %657 = vmatmul.f32.gmra.mxu0 %v1149_v14 }
  0x7b   :  { %425 = vmatmul.f32.gmra.mxu2 %v1211_v44  ;;  %530 = vmatmul.f32.gmra.mxu3 %v150_v28 }
  0x7d   :  { %746 = vmatmul.f32.gmra.mxu1 %v1149_v14 }
  0x7f   :  { %661 = vmatmul.f32.gmra.mxu0 %v1192_v45 }
  0x83   :  { %430 = vmatmul.f32.gmra.mxu2 %v165_v6  ;;  %536 = vmatmul.f32.gmra.mxu3 %v158_v55 }
  0x85   :  { %750 = vmatmul.f32.gmra.mxu1 %v1192_v45 }
  0x87   :  { %665 = vmatmul.f32.gmra.mxu0 %v1226_v15 }
  0x8b   :  { %435 = vmatmul.f32.gmra.mxu2 %v173_v42  ;;  %542 = vmatmul.f32.gmra.mxu3 %v166_v33 }
  0x8d   :  { %754 = vmatmul.f32.gmra.mxu1 %v1226_v15 }
  0x8f   :  { %669 = vmatmul.f32.gmra.mxu0 %v172_v20 }
  0x93   :  { %440 = vmatmul.f32.gmra.mxu2 %v985_v34  ;;  %548 = vmatmul.f32.gmra.mxu3 %v174_v36 }
  0x94   :  { %v1296_v61 = vpop.f32.mrf.mxu0 }
  0x95   :  { %758 = vmatmul.f32.gmra.mxu1 %v172_v20 }
  0x96   :  { %v186_v63 = vpop.f32.mrf.mxu2 }
  0x97   :  { %v187_v8 = vadd.f32 %v1294_v54, %v186_v63  ;;  %673 = vmatmul.f32.gmra.mxu0 %v963_v26 }
  0x9a   :  { %v1300_v12 = vpop.f32.mrf.mxu1 }
  0x9b   :  { %445 = vmatmul.f32.gmra.mxu2 %v1036_v60  ;;  %554 = vmatmul.f32.gmra.mxu3 %v182_v41 }
  0x9c   :  { %v1305_v35 = vpop.f32.mrf.mxu0 }
  0x9d   :  { %762 = vmatmul.f32.gmra.mxu1 %v963_v26 }
  0x9e   :  { %v194_v37 = vpop.f32.mrf.mxu2  ;;  %v335_v49 = vpop.f32.mrf.mxu3 }
  0x9f   :  { %v195_v56 = vadd.f32 %v1294_v54, %v194_v37  ;;  %v1309_v58 = vadd.f32 %v335_v49, %v187_v8  ;;  %677 = vmatmul.f32.gmra.mxu0 %v1023_v53 }
  0xa2   :  { %v1312_v2 = vpop.f32.mrf.mxu1 }
  0xa3   :  { %450 = vmatmul.f32.gmra.mxu2 %v1065_v21  ;;  %560 = vmatmul.f32.gmra.mxu3 %v190_v7 }
  0xa4   :  { %v1317_v34 = vpop.f32.mrf.mxu0 }
  0xa5   :  { %766 = vmatmul.f32.gmra.mxu1 %v1023_v53  ;;  %v139_v37 = vadd.f32 %v1294_v54, %v1317_v34 }
  0xa6   :  { %v202_v26 = vpop.f32.mrf.mxu2  ;;  %v339_v41 = vpop.f32.mrf.mxu3 }
  0xa7   :  { %v203_v25 = vadd.f32 %v1294_v54, %v202_v26  ;;  %v1321_v14 = vadd.f32 %v339_v41, %v195_v56  ;;  %681 = vmatmul.f32.gmra.mxu0 %v1042_v62 }
  0xaa   :  { %v1324_v38 = vpop.f32.mrf.mxu1 }
  0xab   :  { %455 = vmatmul.f32.gmra.mxu2 %v1100_v52  ;;  %566 = vmatmul.f32.gmra.mxu3 %v198_v46 }
  0xac   :  { %v1329_v60 = vpop.f32.mrf.mxu0 }
  0xad   :  { %770 = vmatmul.f32.gmra.mxu1 %v1042_v62 }
  0xae   :  { %v210_v53 = vpop.f32.mrf.mxu2  ;;  %v343_v7 = vpop.f32.mrf.mxu3 }
  0xaf   :  { %v211_v28 = vadd.f32 %v1294_v54, %v210_v53  ;;  %v1333_v45 = vadd.f32 %v343_v7, %v203_v25  ;;  %685 = vmatmul.f32.gmra.mxu0 %v1083_v43 }
  0xb2   :  { %v1336_v44 = vpop.f32.mrf.mxu1 }
  0xb3   :  { %460 = vmatmul.f32.gmra.mxu2 %v1140_v13  ;;  %572 = vmatmul.f32.gmra.mxu3 %v206_v0 }
  0xb4   :  { %v1341_v21 = vpop.f32.mrf.mxu0 }
  0xb5   :  { %774 = vmatmul.f32.gmra.mxu1 %v1083_v43 }
  0xb6   :  { %v218_v62 = vpop.f32.mrf.mxu2  ;;  %v347_v46 = vpop.f32.mrf.mxu3 }
  0xb7   :  { %v219_v57 = vadd.f32 %v1294_v54, %v218_v62  ;;  %v1345_v51 = vadd.f32 %v347_v46, %v211_v28  ;;  %689 = vmatmul.f32.gmra.mxu0 %v1120_v24  ;;  %v147_v28 = vadd.f32 %v1294_v54, %v1329_v60 }
  0xb9   :  { %v316_v34 = vadd.f32 %v1336_v44, %v147_v28 }
  0xba   :  { %v1348_v55 = vpop.f32.mrf.mxu1 }
  0xbb   :  { %465 = vmatmul.f32.gmra.mxu2 %v1189_v10  ;;  %578 = vmatmul.f32.gmra.mxu3 %v214_v32 }
  0xbc   :  { %v1353_v52 = vpop.f32.mrf.mxu0 }
  0xbd   :  { %778 = vmatmul.f32.gmra.mxu1 %v1120_v24 }
  0xbe   :  { %v226_v43 = vpop.f32.mrf.mxu2  ;;  %v351_v0 = vpop.f32.mrf.mxu3 }
  0xbf   :  { %v227_v15 = vadd.f32 %v1294_v54, %v226_v43  ;;  %v1357_v19 = vadd.f32 %v351_v0, %v219_v57  ;;  %693 = vmatmul.f32.gmra.mxu0 %v1166_v27 }
  0xc2   :  { %v1360_v23 = vpop.f32.mrf.mxu1 }
  0xc3   :  { %470 = vmatmul.f32.gmra.mxu2 %v1219_v48  ;;  %584 = vmatmul.f32.gmra.mxu3 %v222_v47 }
  0xc4   :  { %v1365_v13 = vpop.f32.mrf.mxu0 }
  0xc5   :  { %782 = vmatmul.f32.gmra.mxu1 %v1166_v27 }
  0xc6   :  { %v234_v24 = vpop.f32.mrf.mxu2  ;;  %v355_v32 = vpop.f32.mrf.mxu3 }
  0xc7   :  { %v235_v59 = vadd.f32 %v1294_v54, %v234_v24  ;;  %v1369_v1 = vadd.f32 %v355_v32, %v227_v15  ;;  %697 = vmatmul.f32.gmra.mxu0 %v1201_v29  ;;  %v155_v32 = vadd.f32 %v1294_v54, %v1341_v21 }
  0xc9   :  { %v320_v60 = vadd.f32 %v1348_v55, %v155_v32 }
  0xca   :  { %v1372_v6 = vpop.f32.mrf.mxu1 }
  0xcb   :  { %475 = vmatmul.f32.gmra.mxu2 %v1246_v5  ;;  %590 = vmatmul.f32.gmra.mxu3 %v230_v16  ;;  %v131_v5 = vadd.f32 %v1294_v54, %v1305_v35  ;;  %v312_v35 = vadd.f32 %v1324_v38, %v139_v37 }
  0xcc   :  { %v1377_v10 = vpop.f32.mrf.mxu0 }
  0xcd   :  { %786 = vmatmul.f32.gmra.mxu1 %v1201_v29  ;;  %v123_v29 = vadd.f32 %v1294_v54, %v1296_v61  ;;  %v308_v50 = vadd.f32 %v1312_v2, %v131_v5 }
  0xce   :  { %v242_v27 = vpop.f32.mrf.mxu2  ;;  %v359_v47 = vpop.f32.mrf.mxu3 }
  0xcf   :  { %v243_v4 = vadd.f32 %v1294_v54, %v242_v27  ;;  %v1381_v18 = vadd.f32 %v359_v47, %v235_v59  ;;  %701 = vmatmul.f32.gmra.mxu0 %v1237_v3  ;;  %v304_v40 = vadd.f32 %v1300_v12, %v123_v29  ;;  %v163_v29 = vadd.f32 %v1294_v54, %v1353_v52 }
  0xd1   :  { %v324_v21 = vadd.f32 %v1360_v23, %v163_v29 }
  0xd2   :  { %v1384_v31 = vpop.f32.mrf.mxu1 }
  0xd3   :  { %596 = vmatmul.f32.gmra.mxu3 %v238_v9 }
  0xd4   :  { %v642_v33 = vpop.f32.mrf.mxu0 }
  0xd5   :  { %790 = vmatmul.f32.gmra.mxu1 %v1237_v3 }
  0xd6   :  { %v363_v48 = vpop.f32.mrf.mxu3  ;;  %v401_v16 = vpop.f32.mrf.mxu2 }
  0xd7   :  { %v1391_v20 = vadd.f32 %v363_v48, %v243_v4  ;;  %v402_v22 = vadd.f32 %v401_v16, %v304_v40 }
  0xda   :  { %v731_v39 = vpop.f32.mrf.mxu1 }
  0xdc   :  { %v646_v42 = vpop.f32.mrf.mxu0 }
  0xde   :  { %v406_v11 = vpop.f32.mrf.mxu2  ;;  %v507_v36 = vpop.f32.mrf.mxu3 }
  0xdf   :  { %v508_v9 = vadd.f32 %v507_v36, %v402_v22  ;;  %v407_v63 = vadd.f32 %v406_v11, %v308_v50 }
  0xe1   :  { %v643_v30 = vadd.f32 %v642_v33, %v508_v9  ;;  %v171_v9 = vadd.f32 %v1294_v54, %v1365_v13 }
  0xe2   :  { %v735_v3 = vpop.f32.mrf.mxu1 }
  0xe3   :  { %v732_v17 = vadd.f32 %v731_v39, %v643_v30  ;;  %v328_v52 = vadd.f32 %v1372_v6, %v171_v9 }
  0xe4   :  { %v650_v61 = vpop.f32.mrf.mxu0 }
  0xe5   :  { %795 = vst.msk [vmem:[#allocation2] sm:$0xff] %vm794_vm1, %v732_v17 }
  0xe6   :  { %v411_v8 = vpop.f32.mrf.mxu2  ;;  %v513_v12 = vpop.f32.mrf.mxu3 }
  0xe7   :  { %v514_v49 = vadd.f32 %v513_v12, %v407_v63  ;;  %v412_v53 = vadd.f32 %v411_v8, %v312_v35  ;;  %v179_v12 = vadd.f32 %v1294_v54, %v1377_v10 }
  0xe9   :  { %v647_v56 = vadd.f32 %v646_v42, %v514_v49  ;;  %v332_v13 = vadd.f32 %v1384_v31, %v179_v12 }
  0xea   :  { %v739_v26 = vpop.f32.mrf.mxu1 }
  0xeb   :  { %v736_v41 = vadd.f32 %v735_v3, %v647_v56 }
  0xec   :  { %v654_v25 = vpop.f32.mrf.mxu0 }
  0xed   :  { %796 = vst.msk [vmem:[#allocation2 + $0x8] sm:$0xff] %vm794_vm1, %v736_v41 }
  0xee   :  { %v416_v2 = vpop.f32.mrf.mxu2  ;;  %v519_v7 = vpop.f32.mrf.mxu3 }
  0xef   :  { %v520_v62 = vadd.f32 %v519_v7, %v412_v53  ;;  %v417_v15 = vadd.f32 %v416_v2, %v316_v34 }
  0xf1   :  { %v651_v46 = vadd.f32 %v650_v61, %v520_v62 }
  0xf2   :  { %v743_v57 = vpop.f32.mrf.mxu1 }
  0xf3   :  { %v740_v43 = vadd.f32 %v739_v26, %v651_v46 }
  0xf4   :  { %v658_v0 = vpop.f32.mrf.mxu0 }
  0xf5   :  { %797 = vst.msk [vmem:[#allocation2 + $0x10] sm:$0xff] %vm794_vm1, %v740_v43 }
  0xf6   :  { %v421_v38 = vpop.f32.mrf.mxu2  ;;  %v525_v24 = vpop.f32.mrf.mxu3 }
  0xf7   :  { %v526_v59 = vadd.f32 %v525_v24, %v417_v15  ;;  %v422_v48 = vadd.f32 %v421_v38, %v320_v60 }
  0xf9   :  { %v655_v27 = vadd.f32 %v654_v25, %v526_v59 }
  0xfa   :  { %v747_v47 = vpop.f32.mrf.mxu1 }
  0xfb   :  { %v744_v4 = vadd.f32 %v743_v57, %v655_v27 }
  0xfc   :  { %v662_v33 = vpop.f32.mrf.mxu0 }
  0xfd   :  { %798 = vst.msk [vmem:[#allocation2 + $0x18] sm:$0xff] %vm794_vm1, %v744_v4 }
  0xfe   :  { %v426_v44 = vpop.f32.mrf.mxu2  ;;  %v531_v16 = vpop.f32.mrf.mxu3 }
  0xff   :  { %v532_v39 = vadd.f32 %v531_v16, %v422_v48  ;;  %v427_v36 = vadd.f32 %v426_v44, %v324_v21 }
 0x101   :  { %v659_v40 = vadd.f32 %v658_v0, %v532_v39 }
 0x102   :  { %v751_v42 = vpop.f32.mrf.mxu1 }
 0x103   :  { %v748_v22 = vadd.f32 %v747_v47, %v659_v40 }
 0x104   :  { %v666_v11 = vpop.f32.mrf.mxu0 }
 0x105   :  { %799 = vst.msk [vmem:[#allocation2 + $0x20] sm:$0xff] %vm794_vm1, %v748_v22 }
 0x106   :  { %v431_v55 = vpop.f32.mrf.mxu2  ;;  %v537_v5 = vpop.f32.mrf.mxu3 }
 0x107   :  { %v538_v30 = vadd.f32 %v537_v5, %v427_v36  ;;  %v432_v63 = vadd.f32 %v431_v55, %v328_v52 }
 0x109   :  { %v663_v3 = vadd.f32 %v662_v33, %v538_v30 }
 0x10a   :  { %v755_v50 = vpop.f32.mrf.mxu1 }
 0x10b   :  { %v752_v17 = vadd.f32 %v751_v42, %v663_v3 }
 0x10c   :  { %v670_v61 = vpop.f32.mrf.mxu0 }
 0x10d   :  { %800 = vst.msk [vmem:[#allocation2 + $0x28] sm:$0xff] %vm794_vm1, %v752_v17 }
 0x10e   :  { %v436_v23 = vpop.f32.mrf.mxu2  ;;  %v543_v8 = vpop.f32.mrf.mxu3 }
 0x10f   :  { %v544_v37 = vadd.f32 %v543_v8, %v432_v63  ;;  %v437_v41 = vadd.f32 %v436_v23, %v332_v13 }
 0x111   :  { %v667_v49 = vadd.f32 %v666_v11, %v544_v37 }
 0x112   :  { %v759_v56 = vpop.f32.mrf.mxu1 }
 0x113   :  { %v756_v26 = vadd.f32 %v755_v50, %v667_v49 }
 0x114   :  { %v674_v35 = vpop.f32.mrf.mxu0 }
 0x115   :  { %801 = vst.msk [vmem:[#allocation2 + $0x30] sm:$0xff] %vm794_vm1, %v756_v26 }
 0x116   :  { %v441_v6 = vpop.f32.mrf.mxu2  ;;  %v549_v25 = vpop.f32.mrf.mxu3 }
 0x117   :  { %v550_v53 = vadd.f32 %v549_v25, %v437_v41  ;;  %v442_v46 = vadd.f32 %v441_v6, %v1309_v58 }
 0x119   :  { %v671_v2 = vadd.f32 %v670_v61, %v550_v53 }
 0x11a   :  { %v763_v7 = vpop.f32.mrf.mxu1 }
 0x11b   :  { %v760_v28 = vadd.f32 %v759_v56, %v671_v2 }
 0x11c   :  { %v678_v62 = vpop.f32.mrf.mxu0 }
 0x11d   :  { %802 = vst.msk [vmem:[#allocation2 + $0x38] sm:$0xff] %vm794_vm1, %v760_v28 }
 0x11e   :  { %v446_v54 = vpop.f32.mrf.mxu2  ;;  %v555_v10 = vpop.f32.mrf.mxu3 }
 0x11f   :  { %v556_v57 = vadd.f32 %v555_v10, %v442_v46  ;;  %v447_v15 = vadd.f32 %v446_v54, %v1321_v14 }
 0x121   :  { %v675_v31 = vadd.f32 %v674_v35, %v556_v57 }
 0x122   :  { %v767_v34 = vpop.f32.mrf.mxu1 }
 0x123   :  { %v764_v43 = vadd.f32 %v763_v7, %v675_v31 }
 0x124   :  { %v682_v0 = vpop.f32.mrf.mxu0 }
 0x125   :  { %803 = vst.msk [vmem:[#allocation2 + $0x40] sm:$0xff] %vm794_vm1, %v764_v43 }
 0x126   :  { %v451_v38 = vpop.f32.mrf.mxu2  ;;  %v561_v24 = vpop.f32.mrf.mxu3 }
 0x127   :  { %v562_v32 = vadd.f32 %v561_v24, %v447_v15  ;;  %v452_v58 = vadd.f32 %v451_v38, %v1333_v45 }
 0x129   :  { %v679_v59 = vadd.f32 %v678_v62, %v562_v32 }
 0x12a   :  { %v771_v27 = vpop.f32.mrf.mxu1 }
 0x12b   :  { %v768_v47 = vadd.f32 %v767_v34, %v679_v59 }
 0x12c   :  { %v686_v60 = vpop.f32.mrf.mxu0 }
 0x12d   :  { %804 = vst.msk [vmem:[#allocation2 + $0x48] sm:$0xff] %vm794_vm1, %v768_v47 }
 0x12e   :  { %v456_v4 = vpop.f32.mrf.mxu2  ;;  %v567_v33 = vpop.f32.mrf.mxu3 }
 0x12f   :  { %v568_v48 = vadd.f32 %v567_v33, %v452_v58  ;;  %v457_v14 = vadd.f32 %v456_v4, %v1345_v51 }
 0x131   :  { %v683_v44 = vadd.f32 %v682_v0, %v568_v48 }
 0x132   :  { %v775_v16 = vpop.f32.mrf.mxu1 }
 0x133   :  { %v772_v29 = vadd.f32 %v771_v27, %v683_v44 }
 0x134   :  { %v690_v21 = vpop.f32.mrf.mxu0 }
 0x135   :  { %805 = vst.msk [vmem:[#allocation2 + $0x50] sm:$0xff] %vm794_vm1, %v772_v29 }
 0x136   :  { %v461_v39 = vpop.f32.mrf.mxu2  ;;  %v573_v40 = vpop.f32.mrf.mxu3 }
 0x137   :  { %v574_v42 = vadd.f32 %v573_v40, %v457_v14  ;;  %v462_v36 = vadd.f32 %v461_v39, %v1357_v19 }
 0x139   :  { %v687_v22 = vadd.f32 %v686_v60, %v574_v42 }
 0x13a   :  { %v779_v11 = vpop.f32.mrf.mxu1 }
 0x13b   :  { %v776_v45 = vadd.f32 %v775_v16, %v687_v22 }
 0x13c   :  { %v694_v3 = vpop.f32.mrf.mxu0 }
 0x13d   :  { %806 = vst.msk [vmem:[#allocation2 + $0x58] sm:$0xff] %vm794_vm1, %v776_v45 }
 0x13e   :  { %v466_v55 = vpop.f32.mrf.mxu2  ;;  %v579_v5 = vpop.f32.mrf.mxu3 }
 0x13f   :  { %v580_v9 = vadd.f32 %v579_v5, %v462_v36  ;;  %v467_v52 = vadd.f32 %v466_v55, %v1369_v1 }
 0x141   :  { %v691_v30 = vadd.f32 %v690_v21, %v580_v9 }
 0x142   :  { %v783_v51 = vpop.f32.mrf.mxu1 }
 0x143   :  { %v780_v50 = vadd.f32 %v779_v11, %v691_v30 }
 0x144   :  { %v698_v12 = vpop.f32.mrf.mxu0 }
 0x145   :  { %807 = vst.msk [vmem:[#allocation2 + $0x60] sm:$0xff] %vm794_vm1, %v780_v50 }
 0x146   :  { %v585_v17 = vpop.f32.mrf.mxu3  ;;  %v471_v63 = vpop.f32.mrf.mxu2 }
 0x147   :  { %v586_v61 = vadd.f32 %v585_v17, %v467_v52  ;;  %v472_v19 = vadd.f32 %v471_v63, %v1381_v18 }
 0x149   :  { %v695_v23 = vadd.f32 %v694_v3, %v586_v61 }
 0x14a   :  { %v787_v49 = vpop.f32.mrf.mxu1 }
 0x14b   :  { %v784_v8 = vadd.f32 %v783_v51, %v695_v23 }
 0x14c   :  { %v702_v6 = vpop.f32.mrf.mxu0 }
 0x14d   :  { %808 = vst.msk [vmem:[#allocation2 + $0x68] sm:$0xff] %vm794_vm1, %v784_v8 }
 0x14e   :  { %v591_v37 = vpop.f32.mrf.mxu3  ;;  %v476_v26 = vpop.f32.mrf.mxu2 }
 0x14f   :  { %v592_v56 = vadd.f32 %v591_v37, %v472_v19  ;;  %v477_v1 = vadd.f32 %v476_v26, %v1391_v20 }
 0x151   :  { %v699_v13 = vadd.f32 %v698_v12, %v592_v56 }
 0x152   :  { %v791_v18 = vpop.f32.mrf.mxu1 }
 0x153   :  { %v788_v35 = vadd.f32 %v787_v49, %v699_v13 }
 0x155   :  { %809 = vst.msk [vmem:[#allocation2 + $0x70] sm:$0xff] %vm794_vm1, %v788_v35 }
 0x156   :  { %v597_v41 = vpop.f32.mrf.mxu3 }
 0x157   :  { %v598_v25 = vadd.f32 %v597_v41, %v477_v1 }
 0x159   :  { %v703_v53 = vadd.f32 %v702_v6, %v598_v25 }
 0x15b   :  { %v792_v2 = vadd.f32 %v791_v18, %v703_v53 }
 0x15d   :  { %810 = vst.msk [vmem:[#allocation2 + $0x78] sm:$0xff] %vm794_vm1, %v792_v2 }
 0x15e   :  { %823 = dma.vmem_to_hbm [thread:$0]  %s816_s5, 2048, %s818_s8, [#allocation3], %s876_s9, %s876_s9, %s877_s10  }
 0x15f   :  { %873 = dma.done.wait [#allocation3], 2048  }
 0x160   :  { %874 = vsyncadd [#allocation3], 4294965248 }
 0x161   :  { %828 = vsyncpa [#allocation3], 1 }

// kernel: ss2d_forward.11
= control target key start
LH: loop header
LB: loop body
LE: loop exit
PB: predicated region body
PF: predicated region fallthrough
CT: control target
= control target key end

     0   :  { %s1286_s24 = smov 0   ;;  %s1288_s25 = smov 0   ;;  %s1522_s0 = inlined_call_operand.vmem [shape: f32[2,2,64,4], index: 0, kind: input, shape index: {}]   ;;  %s1523_s1 = inlined_call_operand.vmem [shape: f32[2,2,64,4], index: 1, kind: input, shape index: {}]   ;;  %s1524_s2 = inlined_call_operand.vmem [shape: f32[2,16,4], index: 2, kind: input, shape index: {}]   ;;  %s1525_s3 = inlined_call_operand.vmem [shape: f32[2,2,64,16], index: 3, kind: input, shape index: {}]   ;;  %s1526_s4 = inlined_call_operand.vmem [shape: f32[2,2,64,16], index: 4, kind: input, shape index: {}]   ;;  %s1527_s5 = inlined_call_operand.vmem [shape: f32[2,1,4], index: 5, kind: input, shape index: {}]   ;;  %s1528_s6 = inlined_call_operand.vmem [shape: f32[2,1,4], index: 6, kind: input, shape index: {}]   ;;  %s1529_s7 = inlined_call_operand.vmem [shape: f32[2,2,64,4], index: 7, kind: output, shape index: {}]  }
   0x1   :  { %s1290_s26 = smov 0   ;;  %s1292_s27 = smov 0  }
   0x2   :  { %s1294_s28 = smov 0  }
   0x3 LB: > { %s26_s29 = sadd.s32 1, %s1223_s26  ;;  %s29_s30 = sadd.s32 1, %s1227_s27  ;;  %s1231_s28 = sphi %s1294_s28, %s17_s28   ;;  %s1227_s27 = sphi %s1292_s27, %s1533_s27   ;;  %s1223_s26 = sphi %s1290_s26, %s1532_s26   ;;  %s1219_s25 = sphi %s1288_s25, %s1531_s25   ;;  %s1215_s24 = sphi %s1286_s24, %s1530_s24  }
   0x4   : > { %p27_p0 = scmp.ge.s32.totalorder %s26_s29, 2  ;;  %p1052_p1 = scmp.ge.s32.totalorder %s1231_s28, 1 }
   0x5   : > { %p331_p2 = scmp.lt.s32.totalorder %s1231_s28, 5 }
   0x6   : > { %s1535_s29 = smov (%p27_p0, %s26_s29), 0  ;;  %s1537_s30 = smov (!%p27_p0, %s29_s30), %s1227_s27 }
   0x7   : > { %p332_p3 = pnand %p1052_p1, %p331_p2  ;;  %p31_p4 = scmp.ge.s32.totalorder %s1537_s30, 2 }
   0x8   : > { %p409_p5 = scmp.lt.s32.totalorder (!%p332_p3), %s1219_s25, 1  ;;  %p411_p6 = scmp.lt.s32.totalorder (!%p332_p3), %s1215_s24, 1 }
   0x9   : > { %s1539_s30 = smov (%p31_p4, %s1537_s30), 0  ;;  %335 = sbr.rel (%p332_p3) target bundleno = 361 (0x169), region = 48 }
   0xa   : > { %s1433_s22 = smov (!%p332_p3), 0  }
   0xe   : > { %s1541_s25 = smov (!%p409_p5, %s1219_s25), 1  ;;  %s1543_s24 = smov (!%p411_p6, %s1215_s24), 1  ;;  %v584_v34 = vlaneseq  ;;  %v1245_v42 = vmov 0.0   ;;  %vm557_vm3 = vcmask 31744  }
   0xf   : > { %s1054_s8 = sshll.u32 %s1541_s25, 4  ;;  %s1053_s9 = sshll.u32 %s1543_s24, 3 }
  0x10   : > { %s1074_s10 = sshll.u32 %s1543_s24, 4  ;;  %s415_s11 = sadd.s32 %s1054_s8, %s1053_s9  ;;  %v585_v36 = vshrl.u32 %v584_v34, 7  ;;  %v588_v37 = vand.u32 127, %v584_v34 }
  0x11   : > { %s431_s14 = scalar_lea.vmem %s1524_s2, %s1074_s10  ;;  %s1323_s15 = sshll.u32 %s415_s11, 3 }
  0x12   : > { %s452_s18 = scalar_lea.vmem %s1527_s5, %s1543_s24  ;;  %v1329_v0 = vld [vmem:[%s431_s14] sm:$0xff]  ;;  %v1331_v1 = vld [vmem:[%s431_s14 + $0x8] sm:$0xff]  ;;  %s426_s21 = scalar_lea.vmem %s1523_s1, %s1323_s15  ;;  %v586_v39 = vadd.s32 8, %v585_v36  ;;  %vm589_vm0 = vcmp.eq.s32.totalorder %v585_v36, %v588_v37 }
  0x13   : > { %s440_s25 = scalar_lea.vmem %s1525_s3, %s1323_s15  ;;  %s449_s10 = scalar_lea.vmem %s1526_s4, %s1323_s15  ;;  %v473_v2 = vld [vmem:[%s426_s21] sm:$0xff]  ;;  %v474_v3 = vld [vmem:[%s426_s21 + $0x8] sm:$0xff]  ;;  %v475_v4 = vld [vmem:[%s426_s21 + $0x10] sm:$0xff]  ;;  %v1379_v43 = vsel %vm589_vm0, 1.0, %v1245_v42 }
  0x14   : > { %s455_s13 = scalar_lea.vmem %s1528_s6, %s1543_s24  ;;  %s1353_s17 = scalar_lea.vmem %s1529_s7, %s1323_s15  ;;  %v476_v6 = vld [vmem:[%s426_s21 + $0x18] sm:$0xff]  ;;  %v477_v7 = vld [vmem:[%s426_s21 + $0x20] sm:$0xff]  ;;  %v478_v8 = vld [vmem:[%s426_s21 + $0x28] sm:$0xff]  ;;  %vm590_vm1 = vcmp.eq.s32.totalorder %v586_v39, %v588_v37  ;;  %v1431_v37 = vmov 0.0  }
  0x15   : > { %v1140_v5 = vld [vmem:[%s455_s13] ss:$0 sm:$0xff]  ;;  %v479_v9 = vld [vmem:[%s426_s21 + $0x30] sm:$0xff]  ;;  %v480_v14 = vld [vmem:[%s426_s21 + $0x38] sm:$0xff]  ;;  %v1381_v48 = vsel %vm590_vm1, 1.0, %v1245_v42  ;;  %s1390_s21 = scalar_lea.vmem %s1522_s0, %s1323_s15 }
  0x16   : > { %v1355_v10 = vadd.f32 %v1140_v5, %v473_v2  ;;  %v1357_v11 = vadd.f32 %v1140_v5, %v474_v3  ;;  %v1359_v12 = vadd.f32 %v1140_v5, %v475_v4  ;;  %v1361_v13 = vadd.f32 %v1140_v5, %v476_v6  ;;  %v472_v34 = vld [vmem:[%s1390_s21 + $0x38] sm:$0xff] }
  0x17   : > { %v1363_v15 = vadd.f32 %v1140_v5, %v477_v7  ;;  %v1365_v16 = vadd.f32 %v1140_v5, %v478_v8  ;;  %v1369_v19 = vadd.f32 %v1140_v5, %v479_v9  ;;  %v1373_v22 = vadd.f32 %v1140_v5, %v480_v14 }
  0x18   : > { %v493_v17 = vmin.f32 %v1355_v10, 20.0  ;;  %v494_v18 = vmin.f32 %v1357_v11, 20.0  ;;  %v495_v20 = vmin.f32 %v1359_v12, 20.0  ;;  %v496_v21 = vmin.f32 %v1361_v13, 20.0 }
  0x19   : > { %v497_v25 = vmin.f32 %v1363_v15, 20.0  ;;  %v498_v28 = vmin.f32 %v1365_v16, 20.0  ;;  %v499_v30 = vmin.f32 %v1369_v19, 20.0  ;;  %v500_v32 = vmin.f32 %v1373_v22, 20.0 }
  0x1a   : > { %v509_v23 = vmul.f32 1.442695, %v493_v17  ;;  %v511_v24 = vmul.f32 1.442695, %v494_v18  ;;  %v513_v26 = vmul.f32 1.442695, %v495_v20 }
  0x1b   : > { %v515_v27 = vmul.f32 1.442695, %v496_v21  ;;  %v517_v29 = vmul.f32 1.442695, %v497_v25  ;;  %v519_v31 = vmul.f32 1.442695, %v498_v28 }
  0x1c   : > { %1141 = vpow2.f32 %v509_v23  ;;  %v521_v33 = vmul.f32 1.442695, %v499_v30  ;;  %v523_v35 = vmul.f32 1.442695, %v500_v32  ;;  %vm501_vm2 = vcmp.gt.f32.partialorder %v1355_v10, 20.0  ;;  %v466_v18 = vld [vmem:[%s1390_s21 + $0x8] sm:$0xff] }
  0x1d   : > { %1143 = vpow2.f32 %v511_v24  ;;  %vm502_vm4 = vcmp.gt.f32.partialorder %v1357_v11, 20.0  ;;  %vm503_vm5 = vcmp.gt.f32.partialorder %v1359_v12, 20.0  ;;  %vm504_vm6 = vcmp.gt.f32.partialorder %v1361_v13, 20.0  ;;  %v467_v23 = vld [vmem:[%s1390_s21 + $0x10] sm:$0xff] }
  0x1e   : > { %1145 = vpow2.f32 %v513_v26  ;;  %vm505_vm7 = vcmp.gt.f32.partialorder %v1363_v15, 20.0  ;;  %vm506_vm8 = vcmp.gt.f32.partialorder %v1365_v16, 20.0  ;;  %vm507_vm9 = vcmp.gt.f32.partialorder %v1369_v19, 20.0  ;;  %v468_v26 = vld [vmem:[%s1390_s21 + $0x18] sm:$0xff] }
  0x1f   : > { %1147 = vpow2.f32 %v515_v27  ;;  %vm508_vm10 = vcmp.gt.f32.partialorder %v1373_v22, 20.0 }
  0x20   : > { %1149 = vpow2.f32 %v517_v29 }
  0x21   : > { %1151 = vpow2.f32 %v519_v31  ;;  %v470_v31 = vld [vmem:[%s1390_s21 + $0x28] sm:$0xff] }
  0x22   : > { %v1142_v38 = vpop.eup %1141  ;;  %1153 = vpow2.f32 %v521_v33 }
  0x23   : > { %v1144_v40 = vpop.eup %1143  ;;  %v525_v41 = vadd.f32 1.0, %v1142_v38  ;;  %1155 = vpow2.f32 %v523_v35 }
  0x24   : > { %v1146_v44 = vpop.eup %1145  ;;  %v526_v45 = vadd.f32 1.0, %v1144_v40 }
  0x25   : > { %v1148_v46 = vpop.eup %1147  ;;  %1157 = vlog2.f32 %v525_v41  ;;  %v527_v47 = vadd.f32 1.0, %v1146_v44 }
  0x26   : > { %v1150_v49 = vpop.eup %1149  ;;  %1159 = vlog2.f32 %v526_v45  ;;  %v528_v50 = vadd.f32 1.0, %v1148_v46 }
  0x27   : > { %v1152_v51 = vpop.eup %1151  ;;  %1161 = vlog2.f32 %v527_v47  ;;  %v529_v52 = vadd.f32 1.0, %v1150_v49 }
  0x28   : > { %v1154_v53 = vpop.eup %1153  ;;  %1163 = vlog2.f32 %v528_v50  ;;  %v530_v54 = vadd.f32 1.0, %v1152_v51 }
  0x29   : > { %v1156_v55 = vpop.eup %1155  ;;  %1165 = vlog2.f32 %v529_v52  ;;  %v531_v56 = vadd.f32 1.0, %v1154_v53 }
  0x2a   : > { %1167 = vlog2.f32 %v530_v54  ;;  %v532_v57 = vadd.f32 1.0, %v1156_v55 }
  0x2b   : > { %v1158_v58 = vpop.eup %1157  ;;  %1169 = vlog2.f32 %v531_v56 }
  0x2c   : > { %v1160_v59 = vpop.eup %1159  ;;  %v534_v60 = vmul.f32 0.6931472, %v1158_v58  ;;  %1171 = vlog2.f32 %v532_v57 }
  0x2d   : > { %v1162_v61 = vpop.eup %1161  ;;  %v536_v62 = vmul.f32 0.6931472, %v1160_v59 }
  0x2e   : > { %v1164_v63 = vpop.eup %1163  ;;  %v549_v2 = vsel %vm501_vm2, %v1355_v10, %v534_v60  ;;  %v538_v3 = vmul.f32 0.6931472, %v1162_v61  ;;  %v465_v10 = vld [vmem:[%s1390_s21] sm:$0xff] }
  0x2f   : > { %v1166_v4 = vpop.eup %1165  ;;  %558 = vst.msk [vmem:[#allocation2] sm:$0xff] %vm557_vm3, %v549_v2  ;;  %v550_v5 = vsel %vm502_vm4, %v1357_v11, %v536_v62  ;;  %v540_v6 = vmul.f32 0.6931472, %v1164_v63  ;;  %v566_v25 = vmul.f32 %v549_v2, %v465_v10 }
  0x30   : > { %v1168_v7 = vpop.eup %1167  ;;  %559 = vst.msk [vmem:[#allocation2 + $0x8] sm:$0xff] %vm557_vm3, %v550_v5  ;;  %v551_v8 = vsel %vm503_vm5, %v1359_v12, %v538_v3  ;;  %v542_v9 = vmul.f32 0.6931472, %v1166_v4  ;;  %v567_v28 = vmul.f32 %v550_v5, %v466_v18 }
  0x31   : > { %v1170_v14 = vpop.eup %1169  ;;  %560 = vst.msk [vmem:[#allocation2 + $0x10] sm:$0xff] %vm557_vm3, %v551_v8  ;;  %v552_v17 = vsel %vm504_vm6, %v1361_v13, %v540_v6  ;;  %v544_v11 = vmul.f32 0.6931472, %v1168_v7  ;;  %v568_v30 = vmul.f32 %v551_v8, %v467_v23 }
  0x32   : > { %v1172_v20 = vpop.eup %1171  ;;  %561 = vst.msk [vmem:[#allocation2 + $0x18] sm:$0xff] %vm557_vm3, %v552_v17  ;;  %v553_v12 = vsel %vm505_vm7, %v1363_v15, %v542_v9  ;;  %v546_v21 = vmul.f32 0.6931472, %v1170_v14  ;;  %v469_v15 = vld [vmem:[%s1390_s21 + $0x20] sm:$0xff]  ;;  %v569_v32 = vmul.f32 %v552_v17, %v468_v26 }
  0x33   : > { %562 = vst.msk [vmem:[#allocation2 + $0x20] sm:$0xff] %vm557_vm3, %v553_v12  ;;  %v554_v13 = vsel %vm506_vm8, %v1365_v16, %v544_v11  ;;  %v548_v24 = vmul.f32 0.6931472, %v1172_v20  ;;  %v471_v16 = vld [vmem:[%s1390_s21 + $0x30] sm:$0xff]  ;;  %v570_v33 = vmul.f32 %v553_v12, %v469_v15 }
  0x34   : > { %563 = vst.msk [vmem:[#allocation2 + $0x28] sm:$0xff] %vm557_vm3, %v554_v13  ;;  %v555_v27 = vsel %vm507_vm9, %v1369_v19, %v546_v21  ;;  %v571_v35 = vmul.f32 %v554_v13, %v470_v31 }
  0x35   : > { %564 = vst.msk [vmem:[#allocation2 + $0x30] sm:$0xff] %vm557_vm3, %v555_v27  ;;  %v556_v29 = vsel %vm508_vm10, %v1373_v22, %v548_v24  ;;  %v572_v19 = vmul.f32 %v555_v27, %v471_v16  ;;  %v1429_v22 = vmov 0.0  }
  0x36   : > { %565 = vst.msk [vmem:[#allocation2 + $0x38] sm:$0xff] %vm557_vm3, %v556_v29  ;;  %v573_v36 = vmul.f32 %v556_v29, %v472_v34 }
  0x37   : > { %574 = vst.msk [vmem:[#allocation3] sm:$0xff] %vm557_vm3, %v566_v25 }
  0x38   : > { %575 = vst.msk [vmem:[#allocation3 + $0x8] sm:$0xff] %vm557_vm3, %v567_v28 }
  0x39   : > { %576 = vst.msk [vmem:[#allocation3 + $0x10] sm:$0xff] %vm557_vm3, %v568_v30 }
  0x3a   : > { %577 = vst.msk [vmem:[#allocation3 + $0x18] sm:$0xff] %vm557_vm3, %v569_v32 }
  0x3b   : > { %578 = vst.msk [vmem:[#allocation3 + $0x20] sm:$0xff] %vm557_vm3, %v570_v33 }
  0x3c   : > { %579 = vst.msk [vmem:[#allocation3 + $0x28] sm:$0xff] %vm557_vm3, %v571_v35 }
  0x3d   : > { %580 = vst.msk [vmem:[#allocation3 + $0x30] sm:$0xff] %vm557_vm3, %v572_v19 }
  0x3e   : > { %581 = vst.msk [vmem:[#allocation3 + $0x38] sm:$0xff] %vm557_vm3, %v573_v36 }
  0x3f LB: >> { %s607_s9 = scalar_lea.vmem %s440_s25, %s1243_s22  ;;  %vm621_vm11 = vcmask 130048   ;;  %s603_s11 = scalar_lea.vmem [#allocation2], %s1243_s22  ;;  %vm798_vm12 = vcmask 24576   ;;  %s1243_s22 = sphi %s1433_s22, %s600_s22   ;;  %v1239_v37 = vphi %v1431_v37, %v633_v37   ;;  %v1235_v22 = vphi %v1429_v22, %v634_v22  }
  0x40   : >> { %v1173_v38 = vld [vmem:[%s607_s9] ss:$0 sm:$0xff]  ;;  %s605_s12 = scalar_lea.vmem [#allocation3], %s1243_s22  ;;  %s609_s16 = scalar_lea.vmem %s449_s10, %s1243_s22 }
  0x41   : >> { %v620_v39 = vmul.f32 %v1173_v38, %v1381_v48  ;;  %v619_v41 = vmul.f32 %v1173_v38, %v1379_v43  ;;  %v1174_v44 = vld [vmem:[%s603_s11] ss:$0 sm:$0xff]  ;;  %s797_s19 = scalar_lea.vmem %s1353_s17, %s1243_s22  ;;  %s600_s22 = sadd.s32 1, %s1243_s22  }
  0x42   : >> { %v613_v45 = vmul.f32 %v1174_v44, %v1331_v1  ;;  %v612_v47 = vmul.f32 %v1174_v44, %v1329_v0  ;;  %v610_v49 = vld [vmem:[%s609_s16] sm:$0x1]  ;;  %p597_p7 = scmp.ge.s32.totalorder %s600_s22, 64  }
  0x43   : >> { %v625_v40 = vsel %vm621_vm11, %v620_v39, 0.0  ;;  %v622_v42 = vsel %vm621_vm11, %v619_v41, 0.0  ;;  %v636_v50 = vsel %vm621_vm11, %v610_v49, 0  ;;  %v808_v15 = vld [vmem:[%s1390_s21] sm:$0xff] (%p597_p7)  ;;  %v809_v31 = vld [vmem:[%s1390_s21 + $0x8] sm:$0xff] (%p597_p7)  ;;  %v810_v43 = vld [vmem:[%s1390_s21 + $0x10] sm:$0xff] (%p597_p7) }
  0x44   : >> { %626 = vadd.xlane.f32.xlu0 %v625_v40  ;;  %v616_v46 = vmul.f32 1.442695, %v613_v45  ;;  %v614_v51 = vmul.f32 1.442695, %v612_v47  ;;  %v656_v53 = vand.u32 4294901760, %v636_v50  ;;  %v811_v34 = vld [vmem:[%s1390_s21 + $0x18] sm:$0xff] (%p597_p7) }
  0x45   : >> { %v1175_v54 = vld [vmem:[%s605_s12] ss:$0 sm:$0xff]  ;;  %v814_v44 = vld [vmem:[%s1390_s21 + $0x30] sm:$0xff] (%p597_p7)  ;;  %v815_v45 = vld [vmem:[%s1390_s21 + $0x38] sm:$0xff] (%p597_p7) }
  0x46   : >> { %1176 = vpow2.f32 %v616_v46  ;;  %v657_v58 = vsub.f32 %v636_v50, %v656_v53  ;;  %v1180_v30 = vld [vmem:[%s452_s18] ss:$0 sm:$0xff] (%p597_p7) }
  0x47   : >> { %1178 = vpow2.f32 %v614_v51  ;;  %v820_v48 = vmul.f32 (%p597_p7), %v1180_v30, %v808_v15  ;;  %v821_v32 = vmul.f32 (%p597_p7), %v1180_v30, %v809_v31  ;;  %v822_v16 = vmul.f32 (%p597_p7), %v1180_v30, %v810_v43  ;;  %v812_v35 = vld [vmem:[%s1390_s21 + $0x20] sm:$0xff] (%p597_p7) }
  0x48   : >> { %v658_v61 = vand.u32 4294901760, %v657_v58  ;;  %v823_v19 = vmul.f32 (%p597_p7), %v1180_v30, %v811_v34  ;;  %v826_v49 = vmul.f32 (%p597_p7), %v1180_v30, %v814_v44  ;;  %v827_v50 = vmul.f32 (%p597_p7), %v1180_v30, %v815_v45 }
  0x4a   : >> { %v659_v5 = vsub.f32 %v657_v58, %v658_v61 }
  0x4c   : >> { %623 = vadd.xlane.f32.xlu0 %v622_v42  ;;  %v1177_v52 = vpop.eup %1176  ;;  %v660_v9 = vand.u32 4294901760, %v659_v5 }
  0x4d   : >> { %v629_v55 = vmul.f32 %v1235_v22, %v1177_v52  ;;  %v1179_v59 = vpop.eup %1178 }
  0x4e   : >> { %v628_v62 = vmul.f32 %v1239_v37, %v1179_v59 }
  0xb7   : >> { %v627_v56 = vpop.xlane.xlu0 %626 }
  0xb8   : >> { %v632_v57 = vmul.f32 %v1175_v54, %v627_v56 }
  0xba   : >> { %v634_v22 = vadd.f32 %v632_v57, %v629_v55  }
  0xbc   : >> { %v652_v60 = vand.u32 4294901760, %v634_v22 }
  0xbe   : >> { %653 = vmatpush.msra.mxu0 %v652_v60  ;;  %737 = vmatpush.msra.mxu3 %v652_v60  ;;  %v680_v63 = vsub.f32 %v634_v22, %v652_v60  ;;  %v824_v22 = vmul.f32 (%p597_p7), %v1180_v30, %v812_v35 }
  0xbf   : >> { %v624_v2 = vpop.xlane.xlu0 %623 }
  0xc0   : >> { %v631_v3 = vmul.f32 %v1175_v54, %v624_v2  ;;  %712 = vmatpush.msra.mxu2 %v680_v63  ;;  %v681_v4 = vand.u32 4294901760, %v680_v63 }
  0xc2   : >> { %v633_v37 = vadd.f32 %v631_v3, %v628_v62   ;;  %v682_v6 = vsub.f32 %v680_v63, %v681_v4 }
  0xc4   : >> { %v654_v7 = vand.u32 4294901760, %v633_v37  ;;  %v683_v8 = vand.u32 4294901760, %v682_v6 }
  0xc6   : >> { %655 = vmatpush.msra.mxu0 %v654_v7  ;;  %684 = vmatpush.msra.mxu1 %v683_v8  ;;  %v686_v10 = vsub.f32 %v633_v37, %v654_v7  ;;  %v813_v37 = vld [vmem:[%s1390_s21 + $0x28] sm:$0xff] (%p597_p7) }
  0xc7   : >> { %739 = vmatpush.msra.mxu3 %v654_v7  ;;  %661 = vmatmul.f32.vlgmr.msra.gmra.mxu0 %v660_v9  ;;  %v825_v42 = vmul.f32 (%p597_p7), %v1180_v30, %v813_v37 }
  0xc8   : >> { %764 = vmatpush.msrb.mxu0 %v681_v4  ;;  %715 = vmatpush.msra.mxu2 %v686_v10  ;;  %v687_v14 = vand.u32 4294901760, %v686_v10 }
  0xc9   : >> { %718 = vmatmul.f32.vlgmr.msra.gmra.mxu2 %v657_v58  ;;  %743 = vmatmul.f32.vlgmr.msra.gmra.mxu3 %v658_v61 }
  0xca   : >> { %768 = vmatpush.msrb.mxu0 %v687_v14  ;;  %v688_v17 = vsub.f32 %v686_v10, %v687_v14 }
  0xcc   : >> { %v689_v11 = vand.u32 4294901760, %v688_v17 }
  0xce   : >> { %690 = vmatpush.msra.mxu1 %v689_v11 }
  0xcf   : >> { %692 = vmatmul.f32.vlgmr.msra.gmra.mxu1 %v656_v53  ;;  %770 = vmatmul.f32.vlgmr.msrb.gmra.mxu0 %v656_v53 }
  0xd0   : >> { %789 = vmatpush.msrb.mxu1 %v652_v60 }
  0xd2   : >> { %791 = vmatpush.msrb.mxu1 %v654_v7 }
  0xd7   : >> { %793 = vmatmul.f32.vlgmr.msrb.gmra.mxu1 %v656_v53 }
 0x144   : >> { %v662_v18 = vpop.f32.mrf.mxu0 }
 0x14c   : >> { %v693_v20 = vpop.f32.mrf.mxu1  ;;  %v719_v12 = vpop.f32.mrf.mxu2 }
 0x14d   : >> { %v694_v21 = vadd.f32 %v693_v20, %v662_v18  ;;  %v744_v23 = vpop.f32.mrf.mxu3  ;;  %v771_v24 = vpop.f32.mrf.mxu0 }
 0x14f   : >> { %v720_v13 = vadd.f32 %v719_v12, %v694_v21 }
 0x151   : >> { %v745_v25 = vadd.f32 %v744_v23, %v720_v13 }
 0x153   : >> { %v772_v26 = vadd.f32 %v771_v24, %v745_v25  ;;  %599 = sbr.rel (!%p597_p7) target bundleno = 63 (0x3f), region = 108 }
 0x154   : >> { %v794_v27 = vpop.f32.mrf.mxu1 }
 0x155   : >> { %v795_v28 = vadd.f32 %v794_v27, %v772_v26 }
 0x157   : >> { %799 = vst.msk [vmem:[%s797_s19] sm:$0x1] %vm798_vm12, %v795_v28 }
 0x15e   : > { %v800_v29 = vld [vmem:[%s1353_s17] sm:$0xff]  ;;  %v801_v0 = vld [vmem:[%s1353_s17 + $0x8] sm:$0xff]  ;;  %v802_v1 = vld [vmem:[%s1353_s17 + $0x10] sm:$0xff] }
 0x15f   : > { %v803_v33 = vld [vmem:[%s1353_s17 + $0x18] sm:$0xff]  ;;  %v804_v36 = vld [vmem:[%s1353_s17 + $0x20] sm:$0xff]  ;;  %v828_v38 = vadd.f32 %v820_v48, %v800_v29  ;;  %v829_v39 = vadd.f32 %v821_v32, %v801_v0  ;;  %v830_v40 = vadd.f32 %v822_v16, %v802_v1  ;;  %v805_v41 = vld [vmem:[%s1353_s17 + $0x28] sm:$0xff] }
 0x160   : > { %v831_v46 = vadd.f32 %v823_v19, %v803_v33  ;;  %v806_v47 = vld [vmem:[%s1353_s17 + $0x30] sm:$0xff]  ;;  %v832_v51 = vadd.f32 %v824_v22, %v804_v36  ;;  %v807_v52 = vld [vmem:[%s1353_s17 + $0x38] sm:$0xff]  ;;  %v833_v53 = vadd.f32 %v825_v42, %v805_v41 }
 0x161   : > { %836 = vst.msk [vmem:[%s1353_s17] sm:$0xff] %vm557_vm3, %v828_v38  ;;  %v834_v54 = vadd.f32 %v826_v49, %v806_v47  ;;  %v835_v55 = vadd.f32 %v827_v50, %v807_v52 }
 0x162   : > { %837 = vst.msk [vmem:[%s1353_s17 + $0x8] sm:$0xff] %vm557_vm3, %v829_v39 }
 0x163   : > { %838 = vst.msk [vmem:[%s1353_s17 + $0x10] sm:$0xff] %vm557_vm3, %v830_v40 }
 0x164   : > { %839 = vst.msk [vmem:[%s1353_s17 + $0x18] sm:$0xff] %vm557_vm3, %v831_v46 }
 0x165   : > { %840 = vst.msk [vmem:[%s1353_s17 + $0x20] sm:$0xff] %vm557_vm3, %v832_v51 }
 0x166   : > { %841 = vst.msk [vmem:[%s1353_s17 + $0x28] sm:$0xff] %vm557_vm3, %v833_v53 }
 0x167   : > { %842 = vst.msk [vmem:[%s1353_s17 + $0x30] sm:$0xff] %vm557_vm3, %v834_v54 }
 0x168   : > { %843 = vst.msk [vmem:[%s1353_s17 + $0x38] sm:$0xff] %vm557_vm3, %v835_v55 }
 0x169 PF: > { %s17_s28 = sadd.s32 1, %s1231_s28   ;;  %s1530_s24 = smov %s1223_s26 }
 0x16a   : > { %p14_p8 = scmp.ge.s32.totalorder %s17_s28, 6   ;;  %s1531_s25 = smov %s1227_s27 }
 0x16b   : > { %s1532_s26 = smov %s1535_s29  ;;  %s1533_s27 = smov %s1539_s30 }
 0x16c   :  { %16 = sbr.rel (!%p14_p8) target bundleno = 3 (0x3), region = 119 }

</bundles_post_ra>
